<compile_context>
chip_gen: v7x
topology: tpu7x:2x2x1
jax: 0.10.0
libtpu: 0.0.40
codegen_flags: <defaults>
</compile_context>

<pallas_src>
import functools

import jax
import jax.numpy as jnp
from jax.experimental import pallas as pl
from jax.experimental.pallas import tpu as pltpu

_GRAY_W = (0.2989, 0.587, 0.114)   # torchvision rgb_to_grayscale weights
_LANE = 128
_SUBLANE = 8


def _mod1(x):
    # x mod 1.0, result in [0, 1)   (== torch fmod for non-negative x)
    return x - jnp.floor(x)


def _recip(x):
    # EUP approx reciprocal + one Newton step (~f32-exact, no per-pixel divide).
    y = pl.reciprocal(x, approx=True)
    return y * (2.0 - x * y)


def _rgb_to_gray(img):
    # img: (3, R, 128) -> (R, 128)
    return _GRAY_W[0] * img[0] + _GRAY_W[1] * img[1] + _GRAY_W[2] * img[2]


def _adjust_hue(img, hue_factor):
    # Mirrors torchvision._rgb2hsv / _hsv2rgb for float images.
    # img: (3, R, 128) -> (r, g, b) each (R, 128)
    r, g, b = img[0], img[1], img[2]
    maxc = jnp.maximum(jnp.maximum(r, g), b)
    minc = jnp.minimum(jnp.minimum(r, g), b)
    eqc = maxc == minc
    cr = maxc - minc
    ones = jnp.ones_like(maxc)

    s = cr * _recip(jnp.where(eqc, ones, maxc))
    inv_cr = _recip(jnp.where(eqc, ones, cr))
    rc = (maxc - r) * inv_cr
    gc = (maxc - g) * inv_cr
    bc = (maxc - b) * inv_cr

    hr = jnp.where(maxc == r, bc - gc, 0.0)
    hg = jnp.where((maxc == g) & (maxc != r), 2.0 + rc - bc, 0.0)
    hb = jnp.where((maxc != g) & (maxc != r), 4.0 + gc - rc, 0.0)
    # fused: _mod1(_mod1(h/6 + 1) + hue) == _mod1(h/6 + 1 + hue)  (arg >= 0)
    h = _mod1((hr + hg + hb) * (1.0 / 6.0) + 1.0 + hue_factor)

    # hsv -> rgb
    v = maxc
    h6 = h * 6.0
    i6f = jnp.floor(h6)              # sextant in {0..5}; compare as float
    f = h6 - i6f
    p = v * (1.0 - s)
    q = v * (1.0 - s * f)
    t = v * (1.0 - s * (1.0 - f))

    # one set of sextant masks shared by all three output channels
    masks = tuple(i6f == float(k) for k in range(5))

    def sel(vals):
        out = vals[5]
        for k in range(4, -1, -1):
            out = jnp.where(masks[k], vals[k], out)
        return out

    # clip: guarantees [0,1] even if approx recip made s marginally > 1
    r_o = jnp.clip(sel((v, q, p, p, t, v)), 0.0, 1.0)
    g_o = jnp.clip(sel((t, v, v, q, p, p)), 0.0, 1.0)
    b_o = jnp.clip(sel((p, p, t, v, v, q)), 0.0, 1.0)
    return r_o, g_o, b_o


def _color_jitter_kernel(flags_ref, factors_ref, order_ref, x_ref, o_ref,
                         *, inv_hw, imgs_per_block):
    blk = pl.program_id(0)
    for bimg in range(imgs_per_block):       # static unroll over images in block
        i = blk * imgs_per_block + bimg
        base = 4 * i
        apply_jitter = flags_ref[i] != 0

        @pl.when(jnp.logical_not(apply_jitter))
        def _passthrough():
            o_ref[bimg] = x_ref[bimg]

        @pl.when(apply_jitter)
        def _jitter():
            bfac = factors_ref[base + 0]
            cfac = factors_ref[base + 1]
            sfac = factors_ref[base + 2]
            hfac = factors_ref[base + 3]

            # 4 statically-unrolled steps; each dispatches exactly ONE transform
            # (pl.when on the SMEM op id).  The output block is the working
            # buffer; the first step reads the input block directly.
            for k in range(4):
                op = order_ref[base + k]
                src = x_ref if k == 0 else o_ref

                @pl.when(op == 0)       # brightness: blend(img, 0, bfac)
                def _():
                    o_ref[bimg] = jnp.clip(src[bimg] * bfac, 0.0, 1.0)

                @pl.when(op == 1)       # contrast: blend(img, mean(gray), cfac)
                def _():
                    img = src[bimg]
                    gmean = jnp.sum(_rgb_to_gray(img)) * inv_hw
                    o_ref[bimg] = jnp.clip(
                        cfac * img + (1.0 - cfac) * gmean, 0.0, 1.0)

                @pl.when(op == 2)       # saturation: blend(img, gray, sfac)
                def _():
                    img = src[bimg]
                    gray = _rgb_to_gray(img)
                    o_ref[bimg] = jnp.clip(
                        sfac * img + (1.0 - sfac) * gray[jnp.newaxis], 0.0, 1.0)

                @pl.when(op == 3)       # hue: write channels directly (no stack)
                def _():
                    r_o, g_o, b_o = _adjust_hue(src[bimg], hfac)
                    o_ref[bimg, 0] = r_o
                    o_ref[bimg, 1] = g_o
                    o_ref[bimg, 2] = b_o


def _pick_imgs_per_block(n, r):
    """Pack several small images per grid step (amortize ~0.35us step cost)."""
    per_img_bytes = 3 * r * _LANE * 4
    cap = max(1, min(4, (2 << 20) // per_img_bytes, n))
    if n >= 2:
        cap = min(cap, n // 2)   # keep >= 2 grid steps so v7x can shard the batch
    ipb = 1
    for d in range(1, max(cap, 1) + 1):
        if n % d == 0:
            ipb = d
    return ipb


def batchwise_img_color_jitter(x, flags, factors, order):
    """x: (N, 3, H, W) float32 in [0,1]; flags: (N,) int32 (1 => jitter);
    factors: (N, 4) f32 = (brightness, contrast, saturation, hue);
    order: (N, 4) int32 permutation of the 4 jitter ops."""
    N, C, H, W = x.shape
    assert C == 3, "ColorJitter expects RGB images"
    HW = H * W
    # Pad rows up to a multiple of 8 -> full (8,128) vregs, unmasked stores.
    R = pl.cdiv(pl.cdiv(HW, _LANE), _SUBLANE) * _SUBLANE
    pad = R * _LANE - HW

    x2 = x.reshape(N, C, HW)
    if pad:
        # Zero padding is safe: pad pixels stay exactly 0 through brightness /
        # saturation / hue, the (single) contrast op's mean uses sum()*1/HW,
        # and the pad region is sliced off again below.  Keep this invariant
        # if new ops are ever added before contrast.
        # TODO(synk): keep the padded (N,C,R,128) layout through the training
        # pipeline (and/or use bf16 I/O) to drop this extra HBM pad/slice pass.
        x2 = jnp.pad(x2, ((0, 0), (0, 0), (0, pad)))
    x2 = x2.reshape(N, C, R, _LANE)

    # 1-D SMEM prefetch tables (a 2-D (N,4) table pads to [ceil(N/8)*8, 128]).
    flags = flags.astype(jnp.int32)
    factors_flat = factors.astype(jnp.float32).reshape(-1)
    order_flat = order.astype(jnp.int32).reshape(-1)

    ipb = _pick_imgs_per_block(N, R)
    assert N % ipb == 0
    grid = (N // ipb,)

    kernel = functools.partial(_color_jitter_kernel, inv_hw=1.0 / HW,
                               imgs_per_block=ipb)

    # VMEM budget: double-buffered in+out blocks + ~16 (R,128) f32 hue temps.
    block_bytes = ipb * C * R * _LANE * 4
    vmem_bytes = 4 * block_bytes + 16 * R * _LANE * 4 + (2 << 20)
    vmem_bytes = int(min(max(vmem_bytes, 16 << 20), 64 << 20))
    # TODO(synk): for images >= ~384x384 tile the R axis with an inner
    # emit_pipeline loop (two-pass gray mean for the contrast step) instead of
    # holding whole images in a single block.

    out = pl.pallas_call(
        kernel,
        out_shape=jax.ShapeDtypeStruct((N, C, R, _LANE), x.dtype),
        grid_spec=pltpu.PrefetchScalarGridSpec(
            num_scalar_prefetch=3,
            grid=grid,
            in_specs=[pl.BlockSpec((ipb, C, R, _LANE),
                                   lambda i, *_: (i, 0, 0, 0))],
            out_specs=pl.BlockSpec((ipb, C, R, _LANE),
                                   lambda i, *_: (i, 0, 0, 0)),
        ),
        compiler_params=pltpu.CompilerParams(
            # Batch elements are independent -> shard across TCs on v7x.
            dimension_semantics=("parallel",),
            vmem_limit_bytes=vmem_bytes),
    )(flags, factors_flat, order_flat, x2)

    out = out.reshape(N, C, R * _LANE)
    if pad:
        out = out[:, :, :HW]
    return out.reshape(N, C, H, W)


if __name__ == "__main__":
    # Module hyperparameters (from __init__ defaults)
    brightness = contrast = saturation = hue = 0.3
    epsilon = 0.1

    N, C, H, W = 4, 3, 16, 16
    key = jax.random.PRNGKey(0)
    kx, kf, kb, kc, ks, kh, ko = jax.random.split(key, 7)

    x = jax.random.uniform(kx, (N, C, H, W), dtype=jnp.float32)

    # Per-sample host-side randomness (training-mode semantics):
    #   apply jitter iff rand > epsilon
    flags = (jax.random.uniform(kf, (N,)) > epsilon).astype(jnp.int32)
    bf = jax.random.uniform(kb, (N,), minval=1.0 - brightness, maxval=1.0 + brightness)
    cf = jax.random.uniform(kc, (N,), minval=1.0 - contrast, maxval=1.0 + contrast)
    sf = jax.random.uniform(ks, (N,), minval=1.0 - saturation, maxval=1.0 + saturation)
    hf = jax.random.uniform(kh, (N,), minval=-hue, maxval=hue)
    factors = jnp.stack([bf, cf, sf, hf], axis=-1).astype(jnp.float32)
    # random permutation of the 4 jitter ops per sample
    order = jnp.argsort(jax.random.uniform(ko, (N, 4)), axis=-1).astype(jnp.int32)

    out = batchwise_img_color_jitter(x, flags, factors, order)
    jax.block_until_ready(out)
    assert out.shape == x.shape and out.dtype == x.dtype
    assert bool(jnp.isfinite(out).all())
    assert bool((out >= 0.0).all() and (out <= 1.0).all())
    print("KERNEL_OK")
</pallas_src>

<mosaic_0001>
module attributes {stable_mosaic.version = 11 : i64} {
  func.func @_color_jitter_kernel(%arg0: i32, %arg1: memref<4xi32, #tpu.memory_space<smem>>, %arg2: memref<16xf32, #tpu.memory_space<smem>>, %arg3: memref<16xi32, #tpu.memory_space<smem>>, %arg4: memref<2x3x8x128xf32, #tpu.memory_space<vmem>>, %arg5: memref<2x3x8x128xf32, #tpu.memory_space<vmem>>) attributes {dimension_semantics = [#tpu.dimension_semantics<parallel>], iteration_bounds = array<i64: 2>, scalar_prefetch = 3 : i64, scratch_operands = 0 : i64, tpu.core_type = #tpu.core_type<tc>, window_params = [{transform_indices = @transform_0, window_bounds = array<i64: 2, 3, 8, 128>}, {transform_indices = @transform_1, window_bounds = array<i64: 2, 3, 8, 128>}]} {
    %c2_i32 = arith.constant 2 : i32
    %0 = arith.muli %arg0, %c2_i32 : i32
    %c0_i32 = arith.constant 0 : i32
    %1 = arith.addi %0, %c0_i32 : i32
    %c4_i32 = arith.constant 4 : i32
    %2 = arith.muli %c4_i32, %1 : i32
    %3 = arith.index_cast %1 : i32 to index
    %4 = memref.load %arg1[%3] : memref<4xi32, #tpu.memory_space<smem>>
    %c0_i32_0 = arith.constant 0 : i32
    %5 = arith.cmpi ne, %4, %c0_i32_0 : i32
    %true = arith.constant true
    %6 = arith.xori %5, %true : i1
    %7 = arith.extui %6 : i1 to i32
    %c0_i32_1 = arith.constant 0 : i32
    %8 = arith.cmpi ne, %7, %c0_i32_1 : i32
    scf.if %8 {
      %c0 = arith.constant 0 : index
      %c0_9 = arith.constant 0 : index
      %c0_10 = arith.constant 0 : index
      %c0_11 = arith.constant 0 : index
      %22 = vector.load %arg4[%c0, %c0_9, %c0_10, %c0_11] : memref<2x3x8x128xf32, #tpu.memory_space<vmem>>, vector<1x3x8x128xf32>
      %23 = vector.shape_cast %22 : vector<1x3x8x128xf32> to vector<3x8x128xf32>
      %c0_12 = arith.constant 0 : index
      %c0_13 = arith.constant 0 : index
      %c0_14 = arith.constant 0 : index
      %c0_15 = arith.constant 0 : index
      %24 = vector.load %arg5[%c0_12, %c0_13, %c0_14, %c0_15] : memref<2x3x8x128xf32, #tpu.memory_space<vmem>>, vector<1x3x8x128xf32>
      %25 = vector.shape_cast %24 : vector<1x3x8x128xf32> to vector<3x8x128xf32>
      %26 = vector.shape_cast %23 : vector<3x8x128xf32> to vector<1x3x8x128xf32>
      tpu.vector_store %arg5[%c0_12, %c0_13, %c0_14, %c0_15], %26 {strides = array<i32>} : memref<2x3x8x128xf32, #tpu.memory_space<vmem>>, vector<1x3x8x128xf32>,
    } else {
    }
    %9 = arith.extui %5 : i1 to i32
    %c0_i32_2 = arith.constant 0 : i32
    %10 = arith.cmpi ne, %9, %c0_i32_2 : i32
    scf.if %10 {
      %c0_i32_9 = arith.constant 0 : i32
      %22 = arith.addi %2, %c0_i32_9 : i32
      %23 = arith.index_cast %22 : i32 to index
      %24 = memref.load %arg2[%23] : memref<16xf32, #tpu.memory_space<smem>>
      %c1_i32_10 = arith.constant 1 : i32
      %25 = arith.addi %2, %c1_i32_10 : i32
      %26 = arith.index_cast %25 : i32 to index
      %27 = memref.load %arg2[%26] : memref<16xf32, #tpu.memory_space<smem>>
      %c2_i32_11 = arith.constant 2 : i32
      %28 = arith.addi %2, %c2_i32_11 : i32
      %29 = arith.index_cast %28 : i32 to index
      %30 = memref.load %arg2[%29] : memref<16xf32, #tpu.memory_space<smem>>
      %c3_i32 = arith.constant 3 : i32
      %31 = arith.addi %2, %c3_i32 : i32
      %32 = arith.index_cast %31 : i32 to index
      %33 = memref.load %arg2[%32] : memref<16xf32, #tpu.memory_space<smem>>
      %c0_i32_12 = arith.constant 0 : i32
      %34 = arith.addi %2, %c0_i32_12 : i32
      %35 = arith.index_cast %34 : i32 to index
      %36 = memref.load %arg3[%35] : memref<16xi32, #tpu.memory_space<smem>>
      %c0_i32_13 = arith.constant 0 : i32
      %37 = arith.cmpi eq, %36, %c0_i32_13 : i32
      %38 = arith.extui %37 : i1 to i32
      %c0_i32_14 = arith.constant 0 : i32
      %39 = arith.cmpi ne, %38, %c0_i32_14 : i32
      scf.if %39 {
        %c0 = arith.constant 0 : index
        %c0_48 = arith.constant 0 : index
        %c0_49 = arith.constant 0 : index
        %c0_50 = arith.constant 0 : index
        %94 = vector.load %arg4[%c0, %c0_48, %c0_49, %c0_50] : memref<2x3x8x128xf32, #tpu.memory_space<vmem>>, vector<1x3x8x128xf32>
        %95 = vector.shape_cast %94 : vector<1x3x8x128xf32> to vector<3x8x128xf32>
        %96 = vector.broadcast %24 : f32 to vector<3x8x128xf32>
        %97 = arith.mulf %95, %96 : vector<3x8x128xf32>
        %cst = arith.constant 0.000000e+00 : f32
        %cst_51 = arith.constant 1.000000e+00 : f32
        %98 = vector.broadcast %cst : f32 to vector<3x8x128xf32>
        %99 = arith.maximumf %98, %97 : vector<3x8x128xf32>
        %100 = vector.broadcast %cst_51 : f32 to vector<3x8x128xf32>
        %101 = arith.minimumf %100, %99 : vector<3x8x128xf32>
        %c0_52 = arith.constant 0 : index
        %c0_53 = arith.constant 0 : index
        %c0_54 = arith.constant 0 : index
        %c0_55 = arith.constant 0 : index
        %102 = vector.load %arg5[%c0_52, %c0_53, %c0_54, %c0_55] : memref<2x3x8x128xf32, #tpu.memory_space<vmem>>, vector<1x3x8x128xf32>
        %103 = vector.shape_cast %102 : vector<1x3x8x128xf32> to vector<3x8x128xf32>
        %104 = vector.shape_cast %101 : vector<3x8x128xf32> to vector<1x3x8x128xf32>
        tpu.vector_store %arg5[%c0_52, %c0_53, %c0_54, %c0_55], %104 {strides = array<i32>} : memref<2x3x8x128xf32, #tpu.memory_space<vmem>>, vector<1x3x8x128xf32>,
      } else {
      }
      %c1_i32_15 = arith.constant 1 : i32
      %40 = arith.cmpi eq, %36, %c1_i32_15 : i32
      %41 = arith.extui %40 : i1 to i32
      %c0_i32_16 = arith.constant 0 : i32
      %42 = arith.cmpi ne, %41, %c0_i32_16 : i32
      scf.if %42 {
        %c0 = arith.constant 0 : index
        %c0_48 = arith.constant 0 : index
        %c0_49 = arith.constant 0 : index
        %c0_50 = arith.constant 0 : index
        %94 = vector.load %arg4[%c0, %c0_48, %c0_49, %c0_50] : memref<2x3x8x128xf32, #tpu.memory_space<vmem>>, vector<1x3x8x128xf32>
        %95 = vector.shape_cast %94 : vector<1x3x8x128xf32> to vector<3x8x128xf32>
        %96 = vector.extract_strided_slice %95 {offsets = [0, 0, 0], sizes = [1, 8, 128], strides = [1, 1, 1]} : vector<3x8x128xf32> to vector<1x8x128xf32>
        %97 = vector.shape_cast %96 : vector<1x8x128xf32> to vector<8x128xf32>
        %cst = arith.constant 2.989000e-01 : f32
        %98 = vector.broadcast %cst : f32 to vector<8x128xf32>
        %99 = arith.mulf %98, %97 : vector<8x128xf32>
        %100 = vector.extract_strided_slice %95 {offsets = [1, 0, 0], sizes = [1, 8, 128], strides = [1, 1, 1]} : vector<3x8x128xf32> to vector<1x8x128xf32>
        %101 = vector.shape_cast %100 : vector<1x8x128xf32> to vector<8x128xf32>
        %cst_51 = arith.constant 5.870000e-01 : f32
        %102 = vector.broadcast %cst_51 : f32 to vector<8x128xf32>
        %103 = arith.mulf %102, %101 : vector<8x128xf32>
        %104 = arith.addf %99, %103 : vector<8x128xf32>
        %105 = vector.extract_strided_slice %95 {offsets = [2, 0, 0], sizes = [1, 8, 128], strides = [1, 1, 1]} : vector<3x8x128xf32> to vector<1x8x128xf32>
        %106 = vector.shape_cast %105 : vector<1x8x128xf32> to vector<8x128xf32>
        %cst_52 = arith.constant 1.140000e-01 : f32
        %107 = vector.broadcast %cst_52 : f32 to vector<8x128xf32>
        %108 = arith.mulf %107, %106 : vector<8x128xf32>
        %109 = arith.addf %104, %108 : vector<8x128xf32>
        %110 = vector.shape_cast %109 : vector<8x128xf32> to vector<1x8x128xf32>
        %cst_53 = arith.constant dense<0.000000e+00> : vector<1xf32>
        %111 = vector.multi_reduction <add>, %110, %cst_53 [1, 2] : vector<1x8x128xf32> to vector<1xf32>
        %112 = vector.shape_cast %111 : vector<1xf32> to vector<1x1x1xf32>
        %113 = vector.extract %112[0, 0, 0] : f32 from vector<1x1x1xf32>
        %cst_54 = arith.constant 3.906250e-03 : f32
        %114 = arith.mulf %113, %cst_54 : f32
        %115 = vector.broadcast %27 : f32 to vector<3x8x128xf32>
        %116 = arith.mulf %115, %95 : vector<3x8x128xf32>
        %cst_55 = arith.constant 1.000000e+00 : f32
        %117 = arith.subf %cst_55, %27 : f32
        %118 = arith.mulf %117, %114 : f32
        %119 = vector.broadcast %118 : f32 to vector<3x8x128xf32>
        %120 = arith.addf %116, %119 : vector<3x8x128xf32>
        %cst_56 = arith.constant 0.000000e+00 : f32
        %cst_57 = arith.constant 1.000000e+00 : f32
        %121 = vector.broadcast %cst_56 : f32 to vector<3x8x128xf32>
        %122 = arith.maximumf %121, %120 : vector<3x8x128xf32>
        %123 = vector.broadcast %cst_57 : f32 to vector<3x8x128xf32>
        %124 = arith.minimumf %123, %122 : vector<3x8x128xf32>
        %c0_58 = arith.constant 0 : index
        %c0_59 = arith.constant 0 : index
        %c0_60 = arith.constant 0 : index
        %c0_61 = arith.constant 0 : index
        %125 = vector.load %arg5[%c0_58, %c0_59, %c0_60, %c0_61] : memref<2x3x8x128xf32, #tpu.memory_space<vmem>>, vector<1x3x8x128xf32>
        %126 = vector.shape_cast %125 : vector<1x3x8x128xf32> to vector<3x8x128xf32>
        %127 = vector.shape_cast %124 : vector<3x8x128xf32> to vector<1x3x8x128xf32>
        tpu.vector_store %arg5[%c0_58, %c0_59, %c0_60, %c0_61], %127 {strides = array<i32>} : memref<2x3x8x128xf32, #tpu.memory_space<vmem>>, vector<1x3x8x128xf32>,
      } else {
      }
      %c2_i32_17 = arith.constant 2 : i32
      %43 = arith.cmpi eq, %36, %c2_i32_17 : i32
      %44 = arith.extui %43 : i1 to i32
      %c0_i32_18 = arith.constant 0 : i32
      %45 = arith.cmpi ne, %44, %c0_i32_18 : i32
      scf.if %45 {
        %c0 = arith.constant 0 : index
        %c0_48 = arith.constant 0 : index
        %c0_49 = arith.constant 0 : index
        %c0_50 = arith.constant 0 : index
        %94 = vector.load %arg4[%c0, %c0_48, %c0_49, %c0_50] : memref<2x3x8x128xf32, #tpu.memory_space<vmem>>, vector<1x3x8x128xf32>
        %95 = vector.shape_cast %94 : vector<1x3x8x128xf32> to vector<3x8x128xf32>
        %96 = vector.extract_strided_slice %95 {offsets = [0, 0, 0], sizes = [1, 8, 128], strides = [1, 1, 1]} : vector<3x8x128xf32> to vector<1x8x128xf32>
        %97 = vector.shape_cast %96 : vector<1x8x128xf32> to vector<8x128xf32>
        %cst = arith.constant 2.989000e-01 : f32
        %98 = vector.broadcast %cst : f32 to vector<8x128xf32>
        %99 = arith.mulf %98, %97 : vector<8x128xf32>
        %100 = vector.extract_strided_slice %95 {offsets = [1, 0, 0], sizes = [1, 8, 128], strides = [1, 1, 1]} : vector<3x8x128xf32> to vector<1x8x128xf32>
        %101 = vector.shape_cast %100 : vector<1x8x128xf32> to vector<8x128xf32>
        %cst_51 = arith.constant 5.870000e-01 : f32
        %102 = vector.broadcast %cst_51 : f32 to vector<8x128xf32>
        %103 = arith.mulf %102, %101 : vector<8x128xf32>
        %104 = arith.addf %99, %103 : vector<8x128xf32>
        %105 = vector.extract_strided_slice %95 {offsets = [2, 0, 0], sizes = [1, 8, 128], strides = [1, 1, 1]} : vector<3x8x128xf32> to vector<1x8x128xf32>
        %106 = vector.shape_cast %105 : vector<1x8x128xf32> to vector<8x128xf32>
        %cst_52 = arith.constant 1.140000e-01 : f32
        %107 = vector.broadcast %cst_52 : f32 to vector<8x128xf32>
        %108 = arith.mulf %107, %106 : vector<8x128xf32>
        %109 = arith.addf %104, %108 : vector<8x128xf32>
        %110 = vector.broadcast %30 : f32 to vector<3x8x128xf32>
        %111 = arith.mulf %110, %95 : vector<3x8x128xf32>
        %cst_53 = arith.constant 1.000000e+00 : f32
        %112 = arith.subf %cst_53, %30 : f32
        %113 = vector.shape_cast %109 : vector<8x128xf32> to vector<1x8x128xf32>
        %114 = vector.broadcast %112 : f32 to vector<1x8x128xf32>
        %115 = arith.mulf %114, %113 : vector<1x8x128xf32>
        %116 = vector.broadcast %115 : vector<1x8x128xf32> to vector<3x8x128xf32>
        %117 = arith.addf %111, %116 : vector<3x8x128xf32>
        %cst_54 = arith.constant 0.000000e+00 : f32
        %cst_55 = arith.constant 1.000000e+00 : f32
        %118 = vector.broadcast %cst_54 : f32 to vector<3x8x128xf32>
        %119 = arith.maximumf %118, %117 : vector<3x8x128xf32>
        %120 = vector.broadcast %cst_55 : f32 to vector<3x8x128xf32>
        %121 = arith.minimumf %120, %119 : vector<3x8x128xf32>
        %c0_56 = arith.constant 0 : index
        %c0_57 = arith.constant 0 : index
        %c0_58 = arith.constant 0 : index
        %c0_59 = arith.constant 0 : index
        %122 = vector.load %arg5[%c0_56, %c0_57, %c0_58, %c0_59] : memref<2x3x8x128xf32, #tpu.memory_space<vmem>>, vector<1x3x8x128xf32>
        %123 = vector.shape_cast %122 : vector<1x3x8x128xf32> to vector<3x8x128xf32>
        %124 = vector.shape_cast %121 : vector<3x8x128xf32> to vector<1x3x8x128xf32>
        tpu.vector_store %arg5[%c0_56, %c0_57, %c0_58, %c0_59], %124 {strides = array<i32>} : memref<2x3x8x128xf32, #tpu.memory_space<vmem>>, vector<1x3x8x128xf32>,
      } else {
      }
      %c3_i32_19 = arith.constant 3 : i32
      %46 = arith.cmpi eq, %36, %c3_i32_19 : i32
      %47 = arith.extui %46 : i1 to i32
      %c0_i32_20 = arith.constant 0 : i32
      %48 = arith.cmpi ne, %47, %c0_i32_20 : i32
      scf.if %48 {
        %c0 = arith.constant 0 : index
        %c0_48 = arith.constant 0 : index
        %c0_49 = arith.constant 0 : index
        %c0_50 = arith.constant 0 : index
        %94 = vector.load %arg4[%c0, %c0_48, %c0_49, %c0_50] : memref<2x3x8x128xf32, #tpu.memory_space<vmem>>, vector<1x3x8x128xf32>
        %95 = vector.shape_cast %94 : vector<1x3x8x128xf32> to vector<3x8x128xf32>
        %96 = vector.extract_strided_slice %95 {offsets = [0, 0, 0], sizes = [1, 8, 128], strides = [1, 1, 1]} : vector<3x8x128xf32> to vector<1x8x128xf32>
        %97 = vector.shape_cast %96 : vector<1x8x128xf32> to vector<8x128xf32>
        %98 = vector.extract_strided_slice %95 {offsets = [1, 0, 0], sizes = [1, 8, 128], strides = [1, 1, 1]} : vector<3x8x128xf32> to vector<1x8x128xf32>
        %99 = vector.shape_cast %98 : vector<1x8x128xf32> to vector<8x128xf32>
        %100 = vector.extract_strided_slice %95 {offsets = [2, 0, 0], sizes = [1, 8, 128], strides = [1, 1, 1]} : vector<3x8x128xf32> to vector<1x8x128xf32>
        %101 = vector.shape_cast %100 : vector<1x8x128xf32> to vector<8x128xf32>
        %102 = arith.maximumf %97, %99 : vector<8x128xf32>
        %103 = arith.maximumf %102, %101 : vector<8x128xf32>
        %104 = arith.minimumf %97, %99 : vector<8x128xf32>
        %105 = arith.minimumf %104, %101 : vector<8x128xf32>
        %106 = arith.cmpf oeq, %103, %105 : vector<8x128xf32>
        %107 = arith.subf %103, %105 : vector<8x128xf32>
        %cst = arith.constant 1.000000e+00 : f32
        %108 = vector.broadcast %cst : f32 to vector<8x128xf32>
        %109 = arith.select %106, %108, %103 : vector<8x128xi1>, vector<8x128xf32>
        %110 = tpu.reciprocal %109 {approx = true} : vector<8x128xf32> -> vector<8x128xf32>
        %111 = arith.mulf %109, %110 : vector<8x128xf32>
        %cst_51 = arith.constant 2.000000e+00 : f32
        %112 = vector.broadcast %cst_51 : f32 to vector<8x128xf32>
        %113 = arith.subf %112, %111 : vector<8x128xf32>
        %114 = arith.mulf %110, %113 : vector<8x128xf32>
        %115 = arith.mulf %107, %114 : vector<8x128xf32>
        %116 = arith.select %106, %108, %107 : vector<8x128xi1>, vector<8x128xf32>
        %117 = tpu.reciprocal %116 {approx = true} : vector<8x128xf32> -> vector<8x128xf32>
        %118 = arith.mulf %116, %117 : vector<8x128xf32>
        %cst_52 = arith.constant 2.000000e+00 : f32
        %119 = vector.broadcast %cst_52 : f32 to vector<8x128xf32>
        %120 = arith.subf %119, %118 : vector<8x128xf32>
        %121 = arith.mulf %117, %120 : vector<8x128xf32>
        %122 = arith.subf %103, %97 : vector<8x128xf32>
        %123 = arith.mulf %122, %121 : vector<8x128xf32>
        %124 = arith.subf %103, %99 : vector<8x128xf32>
        %125 = arith.mulf %124, %121 : vector<8x128xf32>
        %126 = arith.subf %103, %101 : vector<8x128xf32>
        %127 = arith.mulf %126, %121 : vector<8x128xf32>
        %128 = arith.cmpf oeq, %103, %97 : vector<8x128xf32>
        %129 = arith.subf %127, %125 : vector<8x128xf32>
        %cst_53 = arith.constant 0.000000e+00 : f32
        %130 = vector.broadcast %cst_53 : f32 to vector<8x128xf32>
        %131 = arith.select %128, %129, %130 : vector<8x128xi1>, vector<8x128xf32>
        %132 = arith.cmpf oeq, %103, %99 : vector<8x128xf32>
        %133 = arith.cmpf one, %103, %97 : vector<8x128xf32>
        %134 = arith.andi %132, %133 : vector<8x128xi1>
        %cst_54 = arith.constant 2.000000e+00 : f32
        %135 = vector.broadcast %cst_54 : f32 to vector<8x128xf32>
        %136 = arith.addf %135, %123 : vector<8x128xf32>
        %137 = arith.subf %136, %127 : vector<8x128xf32>
        %cst_55 = arith.constant 0.000000e+00 : f32
        %138 = vector.broadcast %cst_55 : f32 to vector<8x128xf32>
        %139 = arith.select %134, %137, %138 : vector<8x128xi1>, vector<8x128xf32>
        %140 = arith.cmpf one, %103, %99 : vector<8x128xf32>
        %141 = arith.cmpf one, %103, %97 : vector<8x128xf32>
        %142 = arith.andi %140, %141 : vector<8x128xi1>
        %cst_56 = arith.constant 4.000000e+00 : f32
        %143 = vector.broadcast %cst_56 : f32 to vector<8x128xf32>
        %144 = arith.addf %143, %125 : vector<8x128xf32>
        %145 = arith.subf %144, %123 : vector<8x128xf32>
        %cst_57 = arith.constant 0.000000e+00 : f32
        %146 = vector.broadcast %cst_57 : f32 to vector<8x128xf32>
        %147 = arith.select %142, %145, %146 : vector<8x128xi1>, vector<8x128xf32>
        %148 = arith.addf %131, %139 : vector<8x128xf32>
        %149 = arith.addf %148, %147 : vector<8x128xf32>
        %cst_58 = arith.constant 0.166666672 : f32
        %150 = vector.broadcast %cst_58 : f32 to vector<8x128xf32>
        %151 = arith.mulf %149, %150 : vector<8x128xf32>
        %cst_59 = arith.constant 1.000000e+00 : f32
        %152 = vector.broadcast %cst_59 : f32 to vector<8x128xf32>
        %153 = arith.addf %151, %152 : vector<8x128xf32>
        %154 = vector.broadcast %33 : f32 to vector<8x128xf32>
        %155 = arith.addf %153, %154 : vector<8x128xf32>
        %156 = math.floor %155 : vector<8x128xf32>
        %157 = arith.subf %155, %156 : vector<8x128xf32>
        %cst_60 = arith.constant 6.000000e+00 : f32
        %158 = vector.broadcast %cst_60 : f32 to vector<8x128xf32>
        %159 = arith.mulf %157, %158 : vector<8x128xf32>
        %160 = math.floor %159 : vector<8x128xf32>
        %161 = arith.subf %159, %160 : vector<8x128xf32>
        %cst_61 = arith.constant 1.000000e+00 : f32
        %162 = vector.broadcast %cst_61 : f32 to vector<8x128xf32>
        %163 = arith.subf %162, %115 : vector<8x128xf32>
        %164 = arith.mulf %103, %163 : vector<8x128xf32>
        %165 = arith.mulf %115, %161 : vector<8x128xf32>
        %cst_62 = arith.constant 1.000000e+00 : f32
        %166 = vector.broadcast %cst_62 : f32 to vector<8x128xf32>
        %167 = arith.subf %166, %165 : vector<8x128xf32>
        %168 = arith.mulf %103, %167 : vector<8x128xf32>
        %cst_63 = arith.constant 1.000000e+00 : f32
        %169 = vector.broadcast %cst_63 : f32 to vector<8x128xf32>
        %170 = arith.subf %169, %161 : vector<8x128xf32>
        %171 = arith.mulf %115, %170 : vector<8x128xf32>
        %cst_64 = arith.constant 1.000000e+00 : f32
        %172 = vector.broadcast %cst_64 : f32 to vector<8x128xf32>
        %173 = arith.subf %172, %171 : vector<8x128xf32>
        %174 = arith.mulf %103, %173 : vector<8x128xf32>
        %cst_65 = arith.constant 0.000000e+00 : f32
        %175 = vector.broadcast %cst_65 : f32 to vector<8x128xf32>
        %176 = arith.cmpf oeq, %160, %175 : vector<8x128xf32>
        %cst_66 = arith.constant 1.000000e+00 : f32
        %177 = vector.broadcast %cst_66 : f32 to vector<8x128xf32>
        %178 = arith.cmpf oeq, %160, %177 : vector<8x128xf32>
        %cst_67 = arith.constant 2.000000e+00 : f32
        %179 = vector.broadcast %cst_67 : f32 to vector<8x128xf32>
        %180 = arith.cmpf oeq, %160, %179 : vector<8x128xf32>
        %cst_68 = arith.constant 3.000000e+00 : f32
        %181 = vector.broadcast %cst_68 : f32 to vector<8x128xf32>
        %182 = arith.cmpf oeq, %160, %181 : vector<8x128xf32>
        %cst_69 = arith.constant 4.000000e+00 : f32
        %183 = vector.broadcast %cst_69 : f32 to vector<8x128xf32>
        %184 = arith.cmpf oeq, %160, %183 : vector<8x128xf32>
        %185 = arith.select %184, %174, %103 : vector<8x128xi1>, vector<8x128xf32>
        %186 = arith.select %182, %164, %185 : vector<8x128xi1>, vector<8x128xf32>
        %187 = arith.select %180, %164, %186 : vector<8x128xi1>, vector<8x128xf32>
        %188 = arith.select %178, %168, %187 : vector<8x128xi1>, vector<8x128xf32>
        %189 = arith.select %176, %103, %188 : vector<8x128xi1>, vector<8x128xf32>
        %cst_70 = arith.constant 0.000000e+00 : f32
        %cst_71 = arith.constant 1.000000e+00 : f32
        %190 = vector.broadcast %cst_70 : f32 to vector<8x128xf32>
        %191 = arith.maximumf %190, %189 : vector<8x128xf32>
        %192 = vector.broadcast %cst_71 : f32 to vector<8x128xf32>
        %193 = arith.minimumf %192, %191 : vector<8x128xf32>
        %194 = arith.select %184, %164, %164 : vector<8x128xi1>, vector<8x128xf32>
        %195 = arith.select %182, %168, %194 : vector<8x128xi1>, vector<8x128xf32>
        %196 = arith.select %180, %103, %195 : vector<8x128xi1>, vector<8x128xf32>
        %197 = arith.select %178, %103, %196 : vector<8x128xi1>, vector<8x128xf32>
        %198 = arith.select %176, %174, %197 : vector<8x128xi1>, vector<8x128xf32>
        %cst_72 = arith.constant 0.000000e+00 : f32
        %cst_73 = arith.constant 1.000000e+00 : f32
        %199 = vector.broadcast %cst_72 : f32 to vector<8x128xf32>
        %200 = arith.maximumf %199, %198 : vector<8x128xf32>
        %201 = vector.broadcast %cst_73 : f32 to vector<8x128xf32>
        %202 = arith.minimumf %201, %200 : vector<8x128xf32>
        %203 = arith.select %184, %103, %168 : vector<8x128xi1>, vector<8x128xf32>
        %204 = arith.select %182, %103, %203 : vector<8x128xi1>, vector<8x128xf32>
        %205 = arith.select %180, %174, %204 : vector<8x128xi1>, vector<8x128xf32>
        %206 = arith.select %178, %164, %205 : vector<8x128xi1>, vector<8x128xf32>
        %207 = arith.select %176, %164, %206 : vector<8x128xi1>, vector<8x128xf32>
        %cst_74 = arith.constant 0.000000e+00 : f32
        %cst_75 = arith.constant 1.000000e+00 : f32
        %208 = vector.broadcast %cst_74 : f32 to vector<8x128xf32>
        %209 = arith.maximumf %208, %207 : vector<8x128xf32>
        %210 = vector.broadcast %cst_75 : f32 to vector<8x128xf32>
        %211 = arith.minimumf %210, %209 : vector<8x128xf32>
        %c0_76 = arith.constant 0 : index
        %c0_77 = arith.constant 0 : index
        %c0_78 = arith.constant 0 : index
        %c0_79 = arith.constant 0 : index
        %212 = vector.load %arg5[%c0_76, %c0_77, %c0_78, %c0_79] : memref<2x3x8x128xf32, #tpu.memory_space<vmem>>, vector<1x1x8x128xf32>
        %213 = vector.shape_cast %212 : vector<1x1x8x128xf32> to vector<8x128xf32>
        %214 = vector.shape_cast %193 : vector<8x128xf32> to vector<1x1x8x128xf32>
        tpu.vector_store %arg5[%c0_76, %c0_77, %c0_78, %c0_79], %214 {strides = array<i32>} : memref<2x3x8x128xf32, #tpu.memory_space<vmem>>, vector<1x1x8x128xf32>,
        %c0_80 = arith.constant 0 : index
        %c1 = arith.constant 1 : index
        %c0_81 = arith.constant 0 : index
        %c0_82 = arith.constant 0 : index
        %215 = vector.load %arg5[%c0_80, %c1, %c0_81, %c0_82] : memref<2x3x8x128xf32, #tpu.memory_space<vmem>>, vector<1x1x8x128xf32>
        %216 = vector.shape_cast %215 : vector<1x1x8x128xf32> to vector<8x128xf32>
        %217 = vector.shape_cast %202 : vector<8x128xf32> to vector<1x1x8x128xf32>
        tpu.vector_store %arg5[%c0_80, %c1, %c0_81, %c0_82], %217 {strides = array<i32>} : memref<2x3x8x128xf32, #tpu.memory_space<vmem>>, vector<1x1x8x128xf32>,
        %c0_83 = arith.constant 0 : index
        %c2 = arith.constant 2 : index
        %c0_84 = arith.constant 0 : index
        %c0_85 = arith.constant 0 : index
        %218 = vector.load %arg5[%c0_83, %c2, %c0_84, %c0_85] : memref<2x3x8x128xf32, #tpu.memory_space<vmem>>, vector<1x1x8x128xf32>
        %219 = vector.shape_cast %218 : vector<1x1x8x128xf32> to vector<8x128xf32>
        %220 = vector.shape_cast %211 : vector<8x128xf32> to vector<1x1x8x128xf32>
        tpu.vector_store %arg5[%c0_83, %c2, %c0_84, %c0_85], %220 {strides = array<i32>} : memref<2x3x8x128xf32, #tpu.memory_space<vmem>>, vector<1x1x8x128xf32>,
      } else {
      }
      %c1_i32_21 = arith.constant 1 : i32
      %49 = arith.addi %2, %c1_i32_21 : i32
      %50 = arith.index_cast %49 : i32 to index
      %51 = memref.load %arg3[%50] : memref<16xi32, #tpu.memory_space<smem>>
      %c0_i32_22 = arith.constant 0 : i32
      %52 = arith.cmpi eq, %51, %c0_i32_22 : i32
      %53 = arith.extui %52 : i1 to i32
      %c0_i32_23 = arith.constant 0 : i32
      %54 = arith.cmpi ne, %53, %c0_i32_23 : i32
      scf.if %54 {
        %c0 = arith.constant 0 : index
        %c0_48 = arith.constant 0 : index
        %c0_49 = arith.constant 0 : index
        %c0_50 = arith.constant 0 : index
        %94 = vector.load %arg5[%c0, %c0_48, %c0_49, %c0_50] : memref<2x3x8x128xf32, #tpu.memory_space<vmem>>, vector<1x3x8x128xf32>
        %95 = vector.shape_cast %94 : vector<1x3x8x128xf32> to vector<3x8x128xf32>
        %96 = vector.broadcast %24 : f32 to vector<3x8x128xf32>
        %97 = arith.mulf %95, %96 : vector<3x8x128xf32>
        %cst = arith.constant 0.000000e+00 : f32
        %cst_51 = arith.constant 1.000000e+00 : f32
        %98 = vector.broadcast %cst : f32 to vector<3x8x128xf32>
        %99 = arith.maximumf %98, %97 : vector<3x8x128xf32>
        %100 = vector.broadcast %cst_51 : f32 to vector<3x8x128xf32>
        %101 = arith.minimumf %100, %99 : vector<3x8x128xf32>
        %c0_52 = arith.constant 0 : index
        %c0_53 = arith.constant 0 : index
        %c0_54 = arith.constant 0 : index
        %c0_55 = arith.constant 0 : index
        %102 = vector.load %arg5[%c0_52, %c0_53, %c0_54, %c0_55] : memref<2x3x8x128xf32, #tpu.memory_space<vmem>>, vector<1x3x8x128xf32>
        %103 = vector.shape_cast %102 : vector<1x3x8x128xf32> to vector<3x8x128xf32>
        %104 = vector.shape_cast %101 : vector<3x8x128xf32> to vector<1x3x8x128xf32>
        tpu.vector_store %arg5[%c0_52, %c0_53, %c0_54, %c0_55], %104 {strides = array<i32>} : memref<2x3x8x128xf32, #tpu.memory_space<vmem>>, vector<1x3x8x128xf32>,
      } else {
      }
      %c1_i32_24 = arith.constant 1 : i32
      %55 = arith.cmpi eq, %51, %c1_i32_24 : i32
      %56 = arith.extui %55 : i1 to i32
      %c0_i32_25 = arith.constant 0 : i32
      %57 = arith.cmpi ne, %56, %c0_i32_25 : i32
      scf.if %57 {
        %c0 = arith.constant 0 : index
        %c0_48 = arith.constant 0 : index
        %c0_49 = arith.constant 0 : index
        %c0_50 = arith.constant 0 : index
        %94 = vector.load %arg5[%c0, %c0_48, %c0_49, %c0_50] : memref<2x3x8x128xf32, #tpu.memory_space<vmem>>, vector<1x3x8x128xf32>
        %95 = vector.shape_cast %94 : vector<1x3x8x128xf32> to vector<3x8x128xf32>
        %96 = vector.extract_strided_slice %95 {offsets = [0, 0, 0], sizes = [1, 8, 128], strides = [1, 1, 1]} : vector<3x8x128xf32> to vector<1x8x128xf32>
        %97 = vector.shape_cast %96 : vector<1x8x128xf32> to vector<8x128xf32>
        %cst = arith.constant 2.989000e-01 : f32
        %98 = vector.broadcast %cst : f32 to vector<8x128xf32>
        %99 = arith.mulf %98, %97 : vector<8x128xf32>
        %100 = vector.extract_strided_slice %95 {offsets = [1, 0, 0], sizes = [1, 8, 128], strides = [1, 1, 1]} : vector<3x8x128xf32> to vector<1x8x128xf32>
        %101 = vector.shape_cast %100 : vector<1x8x128xf32> to vector<8x128xf32>
        %cst_51 = arith.constant 5.870000e-01 : f32
        %102 = vector.broadcast %cst_51 : f32 to vector<8x128xf32>
        %103 = arith.mulf %102, %101 : vector<8x128xf32>
        %104 = arith.addf %99, %103 : vector<8x128xf32>
        %105 = vector.extract_strided_slice %95 {offsets = [2, 0, 0], sizes = [1, 8, 128], strides = [1, 1, 1]} : vector<3x8x128xf32> to vector<1x8x128xf32>
        %106 = vector.shape_cast %105 : vector<1x8x128xf32> to vector<8x128xf32>
        %cst_52 = arith.constant 1.140000e-01 : f32
        %107 = vector.broadcast %cst_52 : f32 to vector<8x128xf32>
        %108 = arith.mulf %107, %106 : vector<8x128xf32>
        %109 = arith.addf %104, %108 : vector<8x128xf32>
        %110 = vector.shape_cast %109 : vector<8x128xf32> to vector<1x8x128xf32>
        %cst_53 = arith.constant dense<0.000000e+00> : vector<1xf32>
        %111 = vector.multi_reduction <add>, %110, %cst_53 [1, 2] : vector<1x8x128xf32> to vector<1xf32>
        %112 = vector.shape_cast %111 : vector<1xf32> to vector<1x1x1xf32>
        %113 = vector.extract %112[0, 0, 0] : f32 from vector<1x1x1xf32>
        %cst_54 = arith.constant 3.906250e-03 : f32
        %114 = arith.mulf %113, %cst_54 : f32
        %115 = vector.broadcast %27 : f32 to vector<3x8x128xf32>
        %116 = arith.mulf %115, %95 : vector<3x8x128xf32>
        %cst_55 = arith.constant 1.000000e+00 : f32
        %117 = arith.subf %cst_55, %27 : f32
        %118 = arith.mulf %117, %114 : f32
        %119 = vector.broadcast %118 : f32 to vector<3x8x128xf32>
        %120 = arith.addf %116, %119 : vector<3x8x128xf32>
        %cst_56 = arith.constant 0.000000e+00 : f32
        %cst_57 = arith.constant 1.000000e+00 : f32
        %121 = vector.broadcast %cst_56 : f32 to vector<3x8x128xf32>
        %122 = arith.maximumf %121, %120 : vector<3x8x128xf32>
        %123 = vector.broadcast %cst_57 : f32 to vector<3x8x128xf32>
        %124 = arith.minimumf %123, %122 : vector<3x8x128xf32>
        %c0_58 = arith.constant 0 : index
        %c0_59 = arith.constant 0 : index
        %c0_60 = arith.constant 0 : index
        %c0_61 = arith.constant 0 : index
        %125 = vector.load %arg5[%c0_58, %c0_59, %c0_60, %c0_61] : memref<2x3x8x128xf32, #tpu.memory_space<vmem>>, vector<1x3x8x128xf32>
        %126 = vector.shape_cast %125 : vector<1x3x8x128xf32> to vector<3x8x128xf32>
        %127 = vector.shape_cast %124 : vector<3x8x128xf32> to vector<1x3x8x128xf32>
        tpu.vector_store %arg5[%c0_58, %c0_59, %c0_60, %c0_61], %127 {strides = array<i32>} : memref<2x3x8x128xf32, #tpu.memory_space<vmem>>, vector<1x3x8x128xf32>,
      } else {
      }
      %c2_i32_26 = arith.constant 2 : i32
      %58 = arith.cmpi eq, %51, %c2_i32_26 : i32
      %59 = arith.extui %58 : i1 to i32
      %c0_i32_27 = arith.constant 0 : i32
      %60 = arith.cmpi ne, %59, %c0_i32_27 : i32
      scf.if %60 {
        %c0 = arith.constant 0 : index
        %c0_48 = arith.constant 0 : index
        %c0_49 = arith.constant 0 : index
        %c0_50 = arith.constant 0 : index
        %94 = vector.load %arg5[%c0, %c0_48, %c0_49, %c0_50] : memref<2x3x8x128xf32, #tpu.memory_space<vmem>>, vector<1x3x8x128xf32>
        %95 = vector.shape_cast %94 : vector<1x3x8x128xf32> to vector<3x8x128xf32>
        %96 = vector.extract_strided_slice %95 {offsets = [0, 0, 0], sizes = [1, 8, 128], strides = [1, 1, 1]} : vector<3x8x128xf32> to vector<1x8x128xf32>
        %97 = vector.shape_cast %96 : vector<1x8x128xf32> to vector<8x128xf32>
        %cst = arith.constant 2.989000e-01 : f32
        %98 = vector.broadcast %cst : f32 to vector<8x128xf32>
        %99 = arith.mulf %98, %97 : vector<8x128xf32>
        %100 = vector.extract_strided_slice %95 {offsets = [1, 0, 0], sizes = [1, 8, 128], strides = [1, 1, 1]} : vector<3x8x128xf32> to vector<1x8x128xf32>
        %101 = vector.shape_cast %100 : vector<1x8x128xf32> to vector<8x128xf32>
        %cst_51 = arith.constant 5.870000e-01 : f32
        %102 = vector.broadcast %cst_51 : f32 to vector<8x128xf32>
        %103 = arith.mulf %102, %101 : vector<8x128xf32>
        %104 = arith.addf %99, %103 : vector<8x128xf32>
        %105 = vector.extract_strided_slice %95 {offsets = [2, 0, 0], sizes = [1, 8, 128], strides = [1, 1, 1]} : vector<3x8x128xf32> to vector<1x8x128xf32>
        %106 = vector.shape_cast %105 : vector<1x8x128xf32> to vector<8x128xf32>
        %cst_52 = arith.constant 1.140000e-01 : f32
        %107 = vector.broadcast %cst_52 : f32 to vector<8x128xf32>
        %108 = arith.mulf %107, %106 : vector<8x128xf32>
        %109 = arith.addf %104, %108 : vector<8x128xf32>
        %110 = vector.broadcast %30 : f32 to vector<3x8x128xf32>
        %111 = arith.mulf %110, %95 : vector<3x8x128xf32>
        %cst_53 = arith.constant 1.000000e+00 : f32
        %112 = arith.subf %cst_53, %30 : f32
        %113 = vector.shape_cast %109 : vector<8x128xf32> to vector<1x8x128xf32>
        %114 = vector.broadcast %112 : f32 to vector<1x8x128xf32>
        %115 = arith.mulf %114, %113 : vector<1x8x128xf32>
        %116 = vector.broadcast %115 : vector<1x8x128xf32> to vector<3x8x128xf32>
        %117 = arith.addf %111, %116 : vector<3x8x128xf32>
        %cst_54 = arith.constant 0.000000e+00 : f32
        %cst_55 = arith.constant 1.000000e+00 : f32
        %118 = vector.broadcast %cst_54 : f32 to vector<3x8x128xf32>
        %119 = arith.maximumf %118, %117 : vector<3x8x128xf32>
        %120 = vector.broadcast %cst_55 : f32 to vector<3x8x128xf32>
        %121 = arith.minimumf %120, %119 : vector<3x8x128xf32>
        %c0_56 = arith.constant 0 : index
        %c0_57 = arith.constant 0 : index
        %c0_58 = arith.constant 0 : index
        %c0_59 = arith.constant 0 : index
        %122 = vector.load %arg5[%c0_56, %c0_57, %c0_58, %c0_59] : memref<2x3x8x128xf32, #tpu.memory_space<vmem>>, vector<1x3x8x128xf32>
        %123 = vector.shape_cast %122 : vector<1x3x8x128xf32> to vector<3x8x128xf32>
        %124 = vector.shape_cast %121 : vector<3x8x128xf32> to vector<1x3x8x128xf32>
        tpu.vector_store %arg5[%c0_56, %c0_57, %c0_58, %c0_59], %124 {strides = array<i32>} : memref<2x3x8x128xf32, #tpu.memory_space<vmem>>, vector<1x3x8x128xf32>,
      } else {
      }
      %c3_i32_28 = arith.constant 3 : i32
      %61 = arith.cmpi eq, %51, %c3_i32_28 : i32
      %62 = arith.extui %61 : i1 to i32
      %c0_i32_29 = arith.constant 0 : i32
      %63 = arith.cmpi ne, %62, %c0_i32_29 : i32
      scf.if %63 {
        %c0 = arith.constant 0 : index
        %c0_48 = arith.constant 0 : index
        %c0_49 = arith.constant 0 : index
        %c0_50 = arith.constant 0 : index
        %94 = vector.load %arg5[%c0, %c0_48, %c0_49, %c0_50] : memref<2x3x8x128xf32, #tpu.memory_space<vmem>>, vector<1x3x8x128xf32>
        %95 = vector.shape_cast %94 : vector<1x3x8x128xf32> to vector<3x8x128xf32>
        %96 = vector.extract_strided_slice %95 {offsets = [0, 0, 0], sizes = [1, 8, 128], strides = [1, 1, 1]} : vector<3x8x128xf32> to vector<1x8x128xf32>
        %97 = vector.shape_cast %96 : vector<1x8x128xf32> to vector<8x128xf32>
        %98 = vector.extract_strided_slice %95 {offsets = [1, 0, 0], sizes = [1, 8, 128], strides = [1, 1, 1]} : vector<3x8x128xf32> to vector<1x8x128xf32>
        %99 = vector.shape_cast %98 : vector<1x8x128xf32> to vector<8x128xf32>
        %100 = vector.extract_strided_slice %95 {offsets = [2, 0, 0], sizes = [1, 8, 128], strides = [1, 1, 1]} : vector<3x8x128xf32> to vector<1x8x128xf32>
        %101 = vector.shape_cast %100 : vector<1x8x128xf32> to vector<8x128xf32>
        %102 = arith.maximumf %97, %99 : vector<8x128xf32>
        %103 = arith.maximumf %102, %101 : vector<8x128xf32>
        %104 = arith.minimumf %97, %99 : vector<8x128xf32>
        %105 = arith.minimumf %104, %101 : vector<8x128xf32>
        %106 = arith.cmpf oeq, %103, %105 : vector<8x128xf32>
        %107 = arith.subf %103, %105 : vector<8x128xf32>
        %cst = arith.constant 1.000000e+00 : f32
        %108 = vector.broadcast %cst : f32 to vector<8x128xf32>
        %109 = arith.select %106, %108, %103 : vector<8x128xi1>, vector<8x128xf32>
        %110 = tpu.reciprocal %109 {approx = true} : vector<8x128xf32> -> vector<8x128xf32>
        %111 = arith.mulf %109, %110 : vector<8x128xf32>
        %cst_51 = arith.constant 2.000000e+00 : f32
        %112 = vector.broadcast %cst_51 : f32 to vector<8x128xf32>
        %113 = arith.subf %112, %111 : vector<8x128xf32>
        %114 = arith.mulf %110, %113 : vector<8x128xf32>
        %115 = arith.mulf %107, %114 : vector<8x128xf32>
        %116 = arith.select %106, %108, %107 : vector<8x128xi1>, vector<8x128xf32>
        %117 = tpu.reciprocal %116 {approx = true} : vector<8x128xf32> -> vector<8x128xf32>
        %118 = arith.mulf %116, %117 : vector<8x128xf32>
        %cst_52 = arith.constant 2.000000e+00 : f32
        %119 = vector.broadcast %cst_52 : f32 to vector<8x128xf32>
        %120 = arith.subf %119, %118 : vector<8x128xf32>
        %121 = arith.mulf %117, %120 : vector<8x128xf32>
        %122 = arith.subf %103, %97 : vector<8x128xf32>
        %123 = arith.mulf %122, %121 : vector<8x128xf32>
        %124 = arith.subf %103, %99 : vector<8x128xf32>
        %125 = arith.mulf %124, %121 : vector<8x128xf32>
        %126 = arith.subf %103, %101 : vector<8x128xf32>
        %127 = arith.mulf %126, %121 : vector<8x128xf32>
        %128 = arith.cmpf oeq, %103, %97 : vector<8x128xf32>
        %129 = arith.subf %127, %125 : vector<8x128xf32>
        %cst_53 = arith.constant 0.000000e+00 : f32
        %130 = vector.broadcast %cst_53 : f32 to vector<8x128xf32>
        %131 = arith.select %128, %129, %130 : vector<8x128xi1>, vector<8x128xf32>
        %132 = arith.cmpf oeq, %103, %99 : vector<8x128xf32>
        %133 = arith.cmpf one, %103, %97 : vector<8x128xf32>
        %134 = arith.andi %132, %133 : vector<8x128xi1>
        %cst_54 = arith.constant 2.000000e+00 : f32
        %135 = vector.broadcast %cst_54 : f32 to vector<8x128xf32>
        %136 = arith.addf %135, %123 : vector<8x128xf32>
        %137 = arith.subf %136, %127 : vector<8x128xf32>
        %cst_55 = arith.constant 0.000000e+00 : f32
        %138 = vector.broadcast %cst_55 : f32 to vector<8x128xf32>
        %139 = arith.select %134, %137, %138 : vector<8x128xi1>, vector<8x128xf32>
        %140 = arith.cmpf one, %103, %99 : vector<8x128xf32>
        %141 = arith.cmpf one, %103, %97 : vector<8x128xf32>
        %142 = arith.andi %140, %141 : vector<8x128xi1>
        %cst_56 = arith.constant 4.000000e+00 : f32
        %143 = vector.broadcast %cst_56 : f32 to vector<8x128xf32>
        %144 = arith.addf %143, %125 : vector<8x128xf32>
        %145 = arith.subf %144, %123 : vector<8x128xf32>
        %cst_57 = arith.constant 0.000000e+00 : f32
        %146 = vector.broadcast %cst_57 : f32 to vector<8x128xf32>
        %147 = arith.select %142, %145, %146 : vector<8x128xi1>, vector<8x128xf32>
        %148 = arith.addf %131, %139 : vector<8x128xf32>
        %149 = arith.addf %148, %147 : vector<8x128xf32>
        %cst_58 = arith.constant 0.166666672 : f32
        %150 = vector.broadcast %cst_58 : f32 to vector<8x128xf32>
        %151 = arith.mulf %149, %150 : vector<8x128xf32>
        %cst_59 = arith.constant 1.000000e+00 : f32
        %152 = vector.broadcast %cst_59 : f32 to vector<8x128xf32>
        %153 = arith.addf %151, %152 : vector<8x128xf32>
        %154 = vector.broadcast %33 : f32 to vector<8x128xf32>
        %155 = arith.addf %153, %154 : vector<8x128xf32>
        %156 = math.floor %155 : vector<8x128xf32>
        %157 = arith.subf %155, %156 : vector<8x128xf32>
        %cst_60 = arith.constant 6.000000e+00 : f32
        %158 = vector.broadcast %cst_60 : f32 to vector<8x128xf32>
        %159 = arith.mulf %157, %158 : vector<8x128xf32>
        %160 = math.floor %159 : vector<8x128xf32>
        %161 = arith.subf %159, %160 : vector<8x128xf32>
        %cst_61 = arith.constant 1.000000e+00 : f32
        %162 = vector.broadcast %cst_61 : f32 to vector<8x128xf32>
        %163 = arith.subf %162, %115 : vector<8x128xf32>
        %164 = arith.mulf %103, %163 : vector<8x128xf32>
        %165 = arith.mulf %115, %161 : vector<8x128xf32>
        %cst_62 = arith.constant 1.000000e+00 : f32
        %166 = vector.broadcast %cst_62 : f32 to vector<8x128xf32>
        %167 = arith.subf %166, %165 : vector<8x128xf32>
        %168 = arith.mulf %103, %167 : vector<8x128xf32>
        %cst_63 = arith.constant 1.000000e+00 : f32
        %169 = vector.broadcast %cst_63 : f32 to vector<8x128xf32>
        %170 = arith.subf %169, %161 : vector<8x128xf32>
        %171 = arith.mulf %115, %170 : vector<8x128xf32>
        %cst_64 = arith.constant 1.000000e+00 : f32
        %172 = vector.broadcast %cst_64 : f32 to vector<8x128xf32>
        %173 = arith.subf %172, %171 : vector<8x128xf32>
        %174 = arith.mulf %103, %173 : vector<8x128xf32>
        %cst_65 = arith.constant 0.000000e+00 : f32
        %175 = vector.broadcast %cst_65 : f32 to vector<8x128xf32>
        %176 = arith.cmpf oeq, %160, %175 : vector<8x128xf32>
        %cst_66 = arith.constant 1.000000e+00 : f32
        %177 = vector.broadcast %cst_66 : f32 to vector<8x128xf32>
        %178 = arith.cmpf oeq, %160, %177 : vector<8x128xf32>
        %cst_67 = arith.constant 2.000000e+00 : f32
        %179 = vector.broadcast %cst_67 : f32 to vector<8x128xf32>
        %180 = arith.cmpf oeq, %160, %179 : vector<8x128xf32>
        %cst_68 = arith.constant 3.000000e+00 : f32
        %181 = vector.broadcast %cst_68 : f32 to vector<8x128xf32>
        %182 = arith.cmpf oeq, %160, %181 : vector<8x128xf32>
        %cst_69 = arith.constant 4.000000e+00 : f32
        %183 = vector.broadcast %cst_69 : f32 to vector<8x128xf32>
        %184 = arith.cmpf oeq, %160, %183 : vector<8x128xf32>
        %185 = arith.select %184, %174, %103 : vector<8x128xi1>, vector<8x128xf32>
        %186 = arith.select %182, %164, %185 : vector<8x128xi1>, vector<8x128xf32>
        %187 = arith.select %180, %164, %186 : vector<8x128xi1>, vector<8x128xf32>
        %188 = arith.select %178, %168, %187 : vector<8x128xi1>, vector<8x128xf32>
        %189 = arith.select %176, %103, %188 : vector<8x128xi1>, vector<8x128xf32>
        %cst_70 = arith.constant 0.000000e+00 : f32
        %cst_71 = arith.constant 1.000000e+00 : f32
        %190 = vector.broadcast %cst_70 : f32 to vector<8x128xf32>
        %191 = arith.maximumf %190, %189 : vector<8x128xf32>
        %192 = vector.broadcast %cst_71 : f32 to vector<8x128xf32>
        %193 = arith.minimumf %192, %191 : vector<8x128xf32>
        %194 = arith.select %184, %164, %164 : vector<8x128xi1>, vector<8x128xf32>
        %195 = arith.select %182, %168, %194 : vector<8x128xi1>, vector<8x128xf32>
        %196 = arith.select %180, %103, %195 : vector<8x128xi1>, vector<8x128xf32>
        %197 = arith.select %178, %103, %196 : vector<8x128xi1>, vector<8x128xf32>
        %198 = arith.select %176, %174, %197 : vector<8x128xi1>, vector<8x128xf32>
        %cst_72 = arith.constant 0.000000e+00 : f32
        %cst_73 = arith.constant 1.000000e+00 : f32
        %199 = vector.broadcast %cst_72 : f32 to vector<8x128xf32>
        %200 = arith.maximumf %199, %198 : vector<8x128xf32>
        %201 = vector.broadcast %cst_73 : f32 to vector<8x128xf32>
        %202 = arith.minimumf %201, %200 : vector<8x128xf32>
        %203 = arith.select %184, %103, %168 : vector<8x128xi1>, vector<8x128xf32>
        %204 = arith.select %182, %103, %203 : vector<8x128xi1>, vector<8x128xf32>
        %205 = arith.select %180, %174, %204 : vector<8x128xi1>, vector<8x128xf32>
        %206 = arith.select %178, %164, %205 : vector<8x128xi1>, vector<8x128xf32>
        %207 = arith.select %176, %164, %206 : vector<8x128xi1>, vector<8x128xf32>
        %cst_74 = arith.constant 0.000000e+00 : f32
        %cst_75 = arith.constant 1.000000e+00 : f32
        %208 = vector.broadcast %cst_74 : f32 to vector<8x128xf32>
        %209 = arith.maximumf %208, %207 : vector<8x128xf32>
        %210 = vector.broadcast %cst_75 : f32 to vector<8x128xf32>
        %211 = arith.minimumf %210, %209 : vector<8x128xf32>
        %c0_76 = arith.constant 0 : index
        %c0_77 = arith.constant 0 : index
        %c0_78 = arith.constant 0 : index
        %c0_79 = arith.constant 0 : index
        %212 = vector.load %arg5[%c0_76, %c0_77, %c0_78, %c0_79] : memref<2x3x8x128xf32, #tpu.memory_space<vmem>>, vector<1x1x8x128xf32>
        %213 = vector.shape_cast %212 : vector<1x1x8x128xf32> to vector<8x128xf32>
        %214 = vector.shape_cast %193 : vector<8x128xf32> to vector<1x1x8x128xf32>
        tpu.vector_store %arg5[%c0_76, %c0_77, %c0_78, %c0_79], %214 {strides = array<i32>} : memref<2x3x8x128xf32, #tpu.memory_space<vmem>>, vector<1x1x8x128xf32>,
        %c0_80 = arith.constant 0 : index
        %c1 = arith.constant 1 : index
        %c0_81 = arith.constant 0 : index
        %c0_82 = arith.constant 0 : index
        %215 = vector.load %arg5[%c0_80, %c1, %c0_81, %c0_82] : memref<2x3x8x128xf32, #tpu.memory_space<vmem>>, vector<1x1x8x128xf32>
        %216 = vector.shape_cast %215 : vector<1x1x8x128xf32> to vector<8x128xf32>
        %217 = vector.shape_cast %202 : vector<8x128xf32> to vector<1x1x8x128xf32>
        tpu.vector_store %arg5[%c0_80, %c1, %c0_81, %c0_82], %217 {strides = array<i32>} : memref<2x3x8x128xf32, #tpu.memory_space<vmem>>, vector<1x1x8x128xf32>,
        %c0_83 = arith.constant 0 : index
        %c2 = arith.constant 2 : index
        %c0_84 = arith.constant 0 : index
        %c0_85 = arith.constant 0 : index
        %218 = vector.load %arg5[%c0_83, %c2, %c0_84, %c0_85] : memref<2x3x8x128xf32, #tpu.memory_space<vmem>>, vector<1x1x8x128xf32>
        %219 = vector.shape_cast %218 : vector<1x1x8x128xf32> to vector<8x128xf32>
        %220 = vector.shape_cast %211 : vector<8x128xf32> to vector<1x1x8x128xf32>
        tpu.vector_store %arg5[%c0_83, %c2, %c0_84, %c0_85], %220 {strides = array<i32>} : memref<2x3x8x128xf32, #tpu.memory_space<vmem>>, vector<1x1x8x128xf32>,
      } else {
      }
      %c2_i32_30 = arith.constant 2 : i32
      %64 = arith.addi %2, %c2_i32_30 : i32
      %65 = arith.index_cast %64 : i32 to index
      %66 = memref.load %arg3[%65] : memref<16xi32, #tpu.memory_space<smem>>
      %c0_i32_31 = arith.constant 0 : i32
      %67 = arith.cmpi eq, %66, %c0_i32_31 : i32
      %68 = arith.extui %67 : i1 to i32
      %c0_i32_32 = arith.constant 0 : i32
      %69 = arith.cmpi ne, %68, %c0_i32_32 : i32
      scf.if %69 {
        %c0 = arith.constant 0 : index
        %c0_48 = arith.constant 0 : index
        %c0_49 = arith.constant 0 : index
        %c0_50 = arith.constant 0 : index
        %94 = vector.load %arg5[%c0, %c0_48, %c0_49, %c0_50] : memref<2x3x8x128xf32, #tpu.memory_space<vmem>>, vector<1x3x8x128xf32>
        %95 = vector.shape_cast %94 : vector<1x3x8x128xf32> to vector<3x8x128xf32>
        %96 = vector.broadcast %24 : f32 to vector<3x8x128xf32>
        %97 = arith.mulf %95, %96 : vector<3x8x128xf32>
        %cst = arith.constant 0.000000e+00 : f32
        %cst_51 = arith.constant 1.000000e+00 : f32
        %98 = vector.broadcast %cst : f32 to vector<3x8x128xf32>
        %99 = arith.maximumf %98, %97 : vector<3x8x128xf32>
        %100 = vector.broadcast %cst_51 : f32 to vector<3x8x128xf32>
        %101 = arith.minimumf %100, %99 : vector<3x8x128xf32>
        %c0_52 = arith.constant 0 : index
        %c0_53 = arith.constant 0 : index
        %c0_54 = arith.constant 0 : index
        %c0_55 = arith.constant 0 : index
        %102 = vector.load %arg5[%c0_52, %c0_53, %c0_54, %c0_55] : memref<2x3x8x128xf32, #tpu.memory_space<vmem>>, vector<1x3x8x128xf32>
        %103 = vector.shape_cast %102 : vector<1x3x8x128xf32> to vector<3x8x128xf32>
        %104 = vector.shape_cast %101 : vector<3x8x128xf32> to vector<1x3x8x128xf32>
        tpu.vector_store %arg5[%c0_52, %c0_53, %c0_54, %c0_55], %104 {strides = array<i32>} : memref<2x3x8x128xf32, #tpu.memory_space<vmem>>, vector<1x3x8x128xf32>,
      } else {
      }
      %c1_i32_33 = arith.constant 1 : i32
      %70 = arith.cmpi eq, %66, %c1_i32_33 : i32
      %71 = arith.extui %70 : i1 to i32
      %c0_i32_34 = arith.constant 0 : i32
      %72 = arith.cmpi ne, %71, %c0_i32_34 : i32
      scf.if %72 {
        %c0 = arith.constant 0 : index
        %c0_48 = arith.constant 0 : index
        %c0_49 = arith.constant 0 : index
        %c0_50 = arith.constant 0 : index
        %94 = vector.load %arg5[%c0, %c0_48, %c0_49, %c0_50] : memref<2x3x8x128xf32, #tpu.memory_space<vmem>>, vector<1x3x8x128xf32>
        %95 = vector.shape_cast %94 : vector<1x3x8x128xf32> to vector<3x8x128xf32>
        %96 = vector.extract_strided_slice %95 {offsets = [0, 0, 0], sizes = [1, 8, 128], strides = [1, 1, 1]} : vector<3x8x128xf32> to vector<1x8x128xf32>
        %97 = vector.shape_cast %96 : vector<1x8x128xf32> to vector<8x128xf32>
        %cst = arith.constant 2.989000e-01 : f32
        %98 = vector.broadcast %cst : f32 to vector<8x128xf32>
        %99 = arith.mulf %98, %97 : vector<8x128xf32>
        %100 = vector.extract_strided_slice %95 {offsets = [1, 0, 0], sizes = [1, 8, 128], strides = [1, 1, 1]} : vector<3x8x128xf32> to vector<1x8x128xf32>
        %101 = vector.shape_cast %100 : vector<1x8x128xf32> to vector<8x128xf32>
        %cst_51 = arith.constant 5.870000e-01 : f32
        %102 = vector.broadcast %cst_51 : f32 to vector<8x128xf32>
        %103 = arith.mulf %102, %101 : vector<8x128xf32>
        %104 = arith.addf %99, %103 : vector<8x128xf32>
        %105 = vector.extract_strided_slice %95 {offsets = [2, 0, 0], sizes = [1, 8, 128], strides = [1, 1, 1]} : vector<3x8x128xf32> to vector<1x8x128xf32>
        %106 = vector.shape_cast %105 : vector<1x8x128xf32> to vector<8x128xf32>
        %cst_52 = arith.constant 1.140000e-01 : f32
        %107 = vector.broadcast %cst_52 : f32 to vector<8x128xf32>
        %108 = arith.mulf %107, %106 : vector<8x128xf32>
        %109 = arith.addf %104, %108 : vector<8x128xf32>
        %110 = vector.shape_cast %109 : vector<8x128xf32> to vector<1x8x128xf32>
        %cst_53 = arith.constant dense<0.000000e+00> : vector<1xf32>
        %111 = vector.multi_reduction <add>, %110, %cst_53 [1, 2] : vector<1x8x128xf32> to vector<1xf32>
        %112 = vector.shape_cast %111 : vector<1xf32> to vector<1x1x1xf32>
        %113 = vector.extract %112[0, 0, 0] : f32 from vector<1x1x1xf32>
        %cst_54 = arith.constant 3.906250e-03 : f32
        %114 = arith.mulf %113, %cst_54 : f32
        %115 = vector.broadcast %27 : f32 to vector<3x8x128xf32>
        %116 = arith.mulf %115, %95 : vector<3x8x128xf32>
        %cst_55 = arith.constant 1.000000e+00 : f32
        %117 = arith.subf %cst_55, %27 : f32
        %118 = arith.mulf %117, %114 : f32
        %119 = vector.broadcast %118 : f32 to vector<3x8x128xf32>
        %120 = arith.addf %116, %119 : vector<3x8x128xf32>
        %cst_56 = arith.constant 0.000000e+00 : f32
        %cst_57 = arith.constant 1.000000e+00 : f32
        %121 = vector.broadcast %cst_56 : f32 to vector<3x8x128xf32>
        %122 = arith.maximumf %121, %120 : vector<3x8x128xf32>
        %123 = vector.broadcast %cst_57 : f32 to vector<3x8x128xf32>
        %124 = arith.minimumf %123, %122 : vector<3x8x128xf32>
        %c0_58 = arith.constant 0 : index
        %c0_59 = arith.constant 0 : index
        %c0_60 = arith.constant 0 : index
        %c0_61 = arith.constant 0 : index
        %125 = vector.load %arg5[%c0_58, %c0_59, %c0_60, %c0_61] : memref<2x3x8x128xf32, #tpu.memory_space<vmem>>, vector<1x3x8x128xf32>
        %126 = vector.shape_cast %125 : vector<1x3x8x128xf32> to vector<3x8x128xf32>
        %127 = vector.shape_cast %124 : vector<3x8x128xf32> to vector<1x3x8x128xf32>
        tpu.vector_store %arg5[%c0_58, %c0_59, %c0_60, %c0_61], %127 {strides = array<i32>} : memref<2x3x8x128xf32, #tpu.memory_space<vmem>>, vector<1x3x8x128xf32>,
      } else {
      }
      %c2_i32_35 = arith.constant 2 : i32
      %73 = arith.cmpi eq, %66, %c2_i32_35 : i32
      %74 = arith.extui %73 : i1 to i32
      %c0_i32_36 = arith.constant 0 : i32
      %75 = arith.cmpi ne, %74, %c0_i32_36 : i32
      scf.if %75 {
        %c0 = arith.constant 0 : index
        %c0_48 = arith.constant 0 : index
        %c0_49 = arith.constant 0 : index
        %c0_50 = arith.constant 0 : index
        %94 = vector.load %arg5[%c0, %c0_48, %c0_49, %c0_50] : memref<2x3x8x128xf32, #tpu.memory_space<vmem>>, vector<1x3x8x128xf32>
        %95 = vector.shape_cast %94 : vector<1x3x8x128xf32> to vector<3x8x128xf32>
        %96 = vector.extract_strided_slice %95 {offsets = [0, 0, 0], sizes = [1, 8, 128], strides = [1, 1, 1]} : vector<3x8x128xf32> to vector<1x8x128xf32>
        %97 = vector.shape_cast %96 : vector<1x8x128xf32> to vector<8x128xf32>
        %cst = arith.constant 2.989000e-01 : f32
        %98 = vector.broadcast %cst : f32 to vector<8x128xf32>
        %99 = arith.mulf %98, %97 : vector<8x128xf32>
        %100 = vector.extract_strided_slice %95 {offsets = [1, 0, 0], sizes = [1, 8, 128], strides = [1, 1, 1]} : vector<3x8x128xf32> to vector<1x8x128xf32>
        %101 = vector.shape_cast %100 : vector<1x8x128xf32> to vector<8x128xf32>
        %cst_51 = arith.constant 5.870000e-01 : f32
        %102 = vector.broadcast %cst_51 : f32 to vector<8x128xf32>
        %103 = arith.mulf %102, %101 : vector<8x128xf32>
        %104 = arith.addf %99, %103 : vector<8x128xf32>
        %105 = vector.extract_strided_slice %95 {offsets = [2, 0, 0], sizes = [1, 8, 128], strides = [1, 1, 1]} : vector<3x8x128xf32> to vector<1x8x128xf32>
        %106 = vector.shape_cast %105 : vector<1x8x128xf32> to vector<8x128xf32>
        %cst_52 = arith.constant 1.140000e-01 : f32
        %107 = vector.broadcast %cst_52 : f32 to vector<8x128xf32>
        %108 = arith.mulf %107, %106 : vector<8x128xf32>
        %109 = arith.addf %104, %108 : vector<8x128xf32>
        %110 = vector.broadcast %30 : f32 to vector<3x8x128xf32>
        %111 = arith.mulf %110, %95 : vector<3x8x128xf32>
        %cst_53 = arith.constant 1.000000e+00 : f32
        %112 = arith.subf %cst_53, %30 : f32
        %113 = vector.shape_cast %109 : vector<8x128xf32> to vector<1x8x128xf32>
        %114 = vector.broadcast %112 : f32 to vector<1x8x128xf32>
        %115 = arith.mulf %114, %113 : vector<1x8x128xf32>
        %116 = vector.broadcast %115 : vector<1x8x128xf32> to vector<3x8x128xf32>
        %117 = arith.addf %111, %116 : vector<3x8x128xf32>
        %cst_54 = arith.constant 0.000000e+00 : f32
        %cst_55 = arith.constant 1.000000e+00 : f32
        %118 = vector.broadcast %cst_54 : f32 to vector<3x8x128xf32>
        %119 = arith.maximumf %118, %117 : vector<3x8x128xf32>
        %120 = vector.broadcast %cst_55 : f32 to vector<3x8x128xf32>
        %121 = arith.minimumf %120, %119 : vector<3x8x128xf32>
        %c0_56 = arith.constant 0 : index
        %c0_57 = arith.constant 0 : index
        %c0_58 = arith.constant 0 : index
        %c0_59 = arith.constant 0 : index
        %122 = vector.load %arg5[%c0_56, %c0_57, %c0_58, %c0_59] : memref<2x3x8x128xf32, #tpu.memory_space<vmem>>, vector<1x3x8x128xf32>
        %123 = vector.shape_cast %122 : vector<1x3x8x128xf32> to vector<3x8x128xf32>
        %124 = vector.shape_cast %121 : vector<3x8x128xf32> to vector<1x3x8x128xf32>
        tpu.vector_store %arg5[%c0_56, %c0_57, %c0_58, %c0_59], %124 {strides = array<i32>} : memref<2x3x8x128xf32, #tpu.memory_space<vmem>>, vector<1x3x8x128xf32>,
      } else {
      }
      %c3_i32_37 = arith.constant 3 : i32
      %76 = arith.cmpi eq, %66, %c3_i32_37 : i32
      %77 = arith.extui %76 : i1 to i32
      %c0_i32_38 = arith.constant 0 : i32
      %78 = arith.cmpi ne, %77, %c0_i32_38 : i32
      scf.if %78 {
        %c0 = arith.constant 0 : index
        %c0_48 = arith.constant 0 : index
        %c0_49 = arith.constant 0 : index
        %c0_50 = arith.constant 0 : index
        %94 = vector.load %arg5[%c0, %c0_48, %c0_49, %c0_50] : memref<2x3x8x128xf32, #tpu.memory_space<vmem>>, vector<1x3x8x128xf32>
        %95 = vector.shape_cast %94 : vector<1x3x8x128xf32> to vector<3x8x128xf32>
        %96 = vector.extract_strided_slice %95 {offsets = [0, 0, 0], sizes = [1, 8, 128], strides = [1, 1, 1]} : vector<3x8x128xf32> to vector<1x8x128xf32>
        %97 = vector.shape_cast %96 : vector<1x8x128xf32> to vector<8x128xf32>
        %98 = vector.extract_strided_slice %95 {offsets = [1, 0, 0], sizes = [1, 8, 128], strides = [1, 1, 1]} : vector<3x8x128xf32> to vector<1x8x128xf32>
        %99 = vector.shape_cast %98 : vector<1x8x128xf32> to vector<8x128xf32>
        %100 = vector.extract_strided_slice %95 {offsets = [2, 0, 0], sizes = [1, 8, 128], strides = [1, 1, 1]} : vector<3x8x128xf32> to vector<1x8x128xf32>
        %101 = vector.shape_cast %100 : vector<1x8x128xf32> to vector<8x128xf32>
        %102 = arith.maximumf %97, %99 : vector<8x128xf32>
        %103 = arith.maximumf %102, %101 : vector<8x128xf32>
        %104 = arith.minimumf %97, %99 : vector<8x128xf32>
        %105 = arith.minimumf %104, %101 : vector<8x128xf32>
        %106 = arith.cmpf oeq, %103, %105 : vector<8x128xf32>
        %107 = arith.subf %103, %105 : vector<8x128xf32>
        %cst = arith.constant 1.000000e+00 : f32
        %108 = vector.broadcast %cst : f32 to vector<8x128xf32>
        %109 = arith.select %106, %108, %103 : vector<8x128xi1>, vector<8x128xf32>
        %110 = tpu.reciprocal %109 {approx = true} : vector<8x128xf32> -> vector<8x128xf32>
        %111 = arith.mulf %109, %110 : vector<8x128xf32>
        %cst_51 = arith.constant 2.000000e+00 : f32
        %112 = vector.broadcast %cst_51 : f32 to vector<8x128xf32>
        %113 = arith.subf %112, %111 : vector<8x128xf32>
        %114 = arith.mulf %110, %113 : vector<8x128xf32>
        %115 = arith.mulf %107, %114 : vector<8x128xf32>
        %116 = arith.select %106, %108, %107 : vector<8x128xi1>, vector<8x128xf32>
        %117 = tpu.reciprocal %116 {approx = true} : vector<8x128xf32> -> vector<8x128xf32>
        %118 = arith.mulf %116, %117 : vector<8x128xf32>
        %cst_52 = arith.constant 2.000000e+00 : f32
        %119 = vector.broadcast %cst_52 : f32 to vector<8x128xf32>
        %120 = arith.subf %119, %118 : vector<8x128xf32>
        %121 = arith.mulf %117, %120 : vector<8x128xf32>
        %122 = arith.subf %103, %97 : vector<8x128xf32>
        %123 = arith.mulf %122, %121 : vector<8x128xf32>
        %124 = arith.subf %103, %99 : vector<8x128xf32>
        %125 = arith.mulf %124, %121 : vector<8x128xf32>
        %126 = arith.subf %103, %101 : vector<8x128xf32>
        %127 = arith.mulf %126, %121 : vector<8x128xf32>
        %128 = arith.cmpf oeq, %103, %97 : vector<8x128xf32>
        %129 = arith.subf %127, %125 : vector<8x128xf32>
        %cst_53 = arith.constant 0.000000e+00 : f32
        %130 = vector.broadcast %cst_53 : f32 to vector<8x128xf32>
        %131 = arith.select %128, %129, %130 : vector<8x128xi1>, vector<8x128xf32>
        %132 = arith.cmpf oeq, %103, %99 : vector<8x128xf32>
        %133 = arith.cmpf one, %103, %97 : vector<8x128xf32>
        %134 = arith.andi %132, %133 : vector<8x128xi1>
        %cst_54 = arith.constant 2.000000e+00 : f32
        %135 = vector.broadcast %cst_54 : f32 to vector<8x128xf32>
        %136 = arith.addf %135, %123 : vector<8x128xf32>
        %137 = arith.subf %136, %127 : vector<8x128xf32>
        %cst_55 = arith.constant 0.000000e+00 : f32
        %138 = vector.broadcast %cst_55 : f32 to vector<8x128xf32>
        %139 = arith.select %134, %137, %138 : vector<8x128xi1>, vector<8x128xf32>
        %140 = arith.cmpf one, %103, %99 : vector<8x128xf32>
        %141 = arith.cmpf one, %103, %97 : vector<8x128xf32>
        %142 = arith.andi %140, %141 : vector<8x128xi1>
        %cst_56 = arith.constant 4.000000e+00 : f32
        %143 = vector.broadcast %cst_56 : f32 to vector<8x128xf32>
        %144 = arith.addf %143, %125 : vector<8x128xf32>
        %145 = arith.subf %144, %123 : vector<8x128xf32>
        %cst_57 = arith.constant 0.000000e+00 : f32
        %146 = vector.broadcast %cst_57 : f32 to vector<8x128xf32>
        %147 = arith.select %142, %145, %146 : vector<8x128xi1>, vector<8x128xf32>
        %148 = arith.addf %131, %139 : vector<8x128xf32>
        %149 = arith.addf %148, %147 : vector<8x128xf32>
        %cst_58 = arith.constant 0.166666672 : f32
        %150 = vector.broadcast %cst_58 : f32 to vector<8x128xf32>
        %151 = arith.mulf %149, %150 : vector<8x128xf32>
        %cst_59 = arith.constant 1.000000e+00 : f32
        %152 = vector.broadcast %cst_59 : f32 to vector<8x128xf32>
        %153 = arith.addf %151, %152 : vector<8x128xf32>
        %154 = vector.broadcast %33 : f32 to vector<8x128xf32>
        %155 = arith.addf %153, %154 : vector<8x128xf32>
        %156 = math.floor %155 : vector<8x128xf32>
        %157 = arith.subf %155, %156 : vector<8x128xf32>
        %cst_60 = arith.constant 6.000000e+00 : f32
        %158 = vector.broadcast %cst_60 : f32 to vector<8x128xf32>
        %159 = arith.mulf %157, %158 : vector<8x128xf32>
        %160 = math.floor %159 : vector<8x128xf32>
        %161 = arith.subf %159, %160 : vector<8x128xf32>
        %cst_61 = arith.constant 1.000000e+00 : f32
        %162 = vector.broadcast %cst_61 : f32 to vector<8x128xf32>
        %163 = arith.subf %162, %115 : vector<8x128xf32>
        %164 = arith.mulf %103, %163 : vector<8x128xf32>
        %165 = arith.mulf %115, %161 : vector<8x128xf32>
        %cst_62 = arith.constant 1.000000e+00 : f32
        %166 = vector.broadcast %cst_62 : f32 to vector<8x128xf32>
        %167 = arith.subf %166, %165 : vector<8x128xf32>
        %168 = arith.mulf %103, %167 : vector<8x128xf32>
        %cst_63 = arith.constant 1.000000e+00 : f32
        %169 = vector.broadcast %cst_63 : f32 to vector<8x128xf32>
        %170 = arith.subf %169, %161 : vector<8x128xf32>
        %171 = arith.mulf %115, %170 : vector<8x128xf32>
        %cst_64 = arith.constant 1.000000e+00 : f32
        %172 = vector.broadcast %cst_64 : f32 to vector<8x128xf32>
        %173 = arith.subf %172, %171 : vector<8x128xf32>
        %174 = arith.mulf %103, %173 : vector<8x128xf32>
        %cst_65 = arith.constant 0.000000e+00 : f32
        %175 = vector.broadcast %cst_65 : f32 to vector<8x128xf32>
        %176 = arith.cmpf oeq, %160, %175 : vector<8x128xf32>
        %cst_66 = arith.constant 1.000000e+00 : f32
        %177 = vector.broadcast %cst_66 : f32 to vector<8x128xf32>
        %178 = arith.cmpf oeq, %160, %177 : vector<8x128xf32>
        %cst_67 = arith.constant 2.000000e+00 : f32
        %179 = vector.broadcast %cst_67 : f32 to vector<8x128xf32>
        %180 = arith.cmpf oeq, %160, %179 : vector<8x128xf32>
        %cst_68 = arith.constant 3.000000e+00 : f32
        %181 = vector.broadcast %cst_68 : f32 to vector<8x128xf32>
        %182 = arith.cmpf oeq, %160, %181 : vector<8x128xf32>
        %cst_69 = arith.constant 4.000000e+00 : f32
        %183 = vector.broadcast %cst_69 : f32 to vector<8x128xf32>
        %184 = arith.cmpf oeq, %160, %183 : vector<8x128xf32>
        %185 = arith.select %184, %174, %103 : vector<8x128xi1>, vector<8x128xf32>
        %186 = arith.select %182, %164, %185 : vector<8x128xi1>, vector<8x128xf32>
        %187 = arith.select %180, %164, %186 : vector<8x128xi1>, vector<8x128xf32>
        %188 = arith.select %178, %168, %187 : vector<8x128xi1>, vector<8x128xf32>
        %189 = arith.select %176, %103, %188 : vector<8x128xi1>, vector<8x128xf32>
        %cst_70 = arith.constant 0.000000e+00 : f32
        %cst_71 = arith.constant 1.000000e+00 : f32
        %190 = vector.broadcast %cst_70 : f32 to vector<8x128xf32>
        %191 = arith.maximumf %190, %189 : vector<8x128xf32>
        %192 = vector.broadcast %cst_71 : f32 to vector<8x128xf32>
        %193 = arith.minimumf %192, %191 : vector<8x128xf32>
        %194 = arith.select %184, %164, %164 : vector<8x128xi1>, vector<8x128xf32>
        %195 = arith.select %182, %168, %194 : vector<8x128xi1>, vector<8x128xf32>
        %196 = arith.select %180, %103, %195 : vector<8x128xi1>, vector<8x128xf32>
        %197 = arith.select %178, %103, %196 : vector<8x128xi1>, vector<8x128xf32>
        %198 = arith.select %176, %174, %197 : vector<8x128xi1>, vector<8x128xf32>
        %cst_72 = arith.constant 0.000000e+00 : f32
        %cst_73 = arith.constant 1.000000e+00 : f32
        %199 = vector.broadcast %cst_72 : f32 to vector<8x128xf32>
        %200 = arith.maximumf %199, %198 : vector<8x128xf32>
        %201 = vector.broadcast %cst_73 : f32 to vector<8x128xf32>
        %202 = arith.minimumf %201, %200 : vector<8x128xf32>
        %203 = arith.select %184, %103, %168 : vector<8x128xi1>, vector<8x128xf32>
        %204 = arith.select %182, %103, %203 : vector<8x128xi1>, vector<8x128xf32>
        %205 = arith.select %180, %174, %204 : vector<8x128xi1>, vector<8x128xf32>
        %206 = arith.select %178, %164, %205 : vector<8x128xi1>, vector<8x128xf32>
        %207 = arith.select %176, %164, %206 : vector<8x128xi1>, vector<8x128xf32>
        %cst_74 = arith.constant 0.000000e+00 : f32
        %cst_75 = arith.constant 1.000000e+00 : f32
        %208 = vector.broadcast %cst_74 : f32 to vector<8x128xf32>
        %209 = arith.maximumf %208, %207 : vector<8x128xf32>
        %210 = vector.broadcast %cst_75 : f32 to vector<8x128xf32>
        %211 = arith.minimumf %210, %209 : vector<8x128xf32>
        %c0_76 = arith.constant 0 : index
        %c0_77 = arith.constant 0 : index
        %c0_78 = arith.constant 0 : index
        %c0_79 = arith.constant 0 : index
        %212 = vector.load %arg5[%c0_76, %c0_77, %c0_78, %c0_79] : memref<2x3x8x128xf32, #tpu.memory_space<vmem>>, vector<1x1x8x128xf32>
        %213 = vector.shape_cast %212 : vector<1x1x8x128xf32> to vector<8x128xf32>
        %214 = vector.shape_cast %193 : vector<8x128xf32> to vector<1x1x8x128xf32>
        tpu.vector_store %arg5[%c0_76, %c0_77, %c0_78, %c0_79], %214 {strides = array<i32>} : memref<2x3x8x128xf32, #tpu.memory_space<vmem>>, vector<1x1x8x128xf32>,
        %c0_80 = arith.constant 0 : index
        %c1 = arith.constant 1 : index
        %c0_81 = arith.constant 0 : index
        %c0_82 = arith.constant 0 : index
        %215 = vector.load %arg5[%c0_80, %c1, %c0_81, %c0_82] : memref<2x3x8x128xf32, #tpu.memory_space<vmem>>, vector<1x1x8x128xf32>
        %216 = vector.shape_cast %215 : vector<1x1x8x128xf32> to vector<8x128xf32>
        %217 = vector.shape_cast %202 : vector<8x128xf32> to vector<1x1x8x128xf32>
        tpu.vector_store %arg5[%c0_80, %c1, %c0_81, %c0_82], %217 {strides = array<i32>} : memref<2x3x8x128xf32, #tpu.memory_space<vmem>>, vector<1x1x8x128xf32>,
        %c0_83 = arith.constant 0 : index
        %c2 = arith.constant 2 : index
        %c0_84 = arith.constant 0 : index
        %c0_85 = arith.constant 0 : index
        %218 = vector.load %arg5[%c0_83, %c2, %c0_84, %c0_85] : memref<2x3x8x128xf32, #tpu.memory_space<vmem>>, vector<1x1x8x128xf32>
        %219 = vector.shape_cast %218 : vector<1x1x8x128xf32> to vector<8x128xf32>
        %220 = vector.shape_cast %211 : vector<8x128xf32> to vector<1x1x8x128xf32>
        tpu.vector_store %arg5[%c0_83, %c2, %c0_84, %c0_85], %220 {strides = array<i32>} : memref<2x3x8x128xf32, #tpu.memory_space<vmem>>, vector<1x1x8x128xf32>,
      } else {
      }
      %c3_i32_39 = arith.constant 3 : i32
      %79 = arith.addi %2, %c3_i32_39 : i32
      %80 = arith.index_cast %79 : i32 to index
      %81 = memref.load %arg3[%80] : memref<16xi32, #tpu.memory_space<smem>>
      %c0_i32_40 = arith.constant 0 : i32
      %82 = arith.cmpi eq, %81, %c0_i32_40 : i32
      %83 = arith.extui %82 : i1 to i32
      %c0_i32_41 = arith.constant 0 : i32
      %84 = arith.cmpi ne, %83, %c0_i32_41 : i32
      scf.if %84 {
        %c0 = arith.constant 0 : index
        %c0_48 = arith.constant 0 : index
        %c0_49 = arith.constant 0 : index
        %c0_50 = arith.constant 0 : index
        %94 = vector.load %arg5[%c0, %c0_48, %c0_49, %c0_50] : memref<2x3x8x128xf32, #tpu.memory_space<vmem>>, vector<1x3x8x128xf32>
        %95 = vector.shape_cast %94 : vector<1x3x8x128xf32> to vector<3x8x128xf32>
        %96 = vector.broadcast %24 : f32 to vector<3x8x128xf32>
        %97 = arith.mulf %95, %96 : vector<3x8x128xf32>
        %cst = arith.constant 0.000000e+00 : f32
        %cst_51 = arith.constant 1.000000e+00 : f32
        %98 = vector.broadcast %cst : f32 to vector<3x8x128xf32>
        %99 = arith.maximumf %98, %97 : vector<3x8x128xf32>
        %100 = vector.broadcast %cst_51 : f32 to vector<3x8x128xf32>
        %101 = arith.minimumf %100, %99 : vector<3x8x128xf32>
        %c0_52 = arith.constant 0 : index
        %c0_53 = arith.constant 0 : index
        %c0_54 = arith.constant 0 : index
        %c0_55 = arith.constant 0 : index
        %102 = vector.load %arg5[%c0_52, %c0_53, %c0_54, %c0_55] : memref<2x3x8x128xf32, #tpu.memory_space<vmem>>, vector<1x3x8x128xf32>
        %103 = vector.shape_cast %102 : vector<1x3x8x128xf32> to vector<3x8x128xf32>
        %104 = vector.shape_cast %101 : vector<3x8x128xf32> to vector<1x3x8x128xf32>
        tpu.vector_store %arg5[%c0_52, %c0_53, %c0_54, %c0_55], %104 {strides = array<i32>} : memref<2x3x8x128xf32, #tpu.memory_space<vmem>>, vector<1x3x8x128xf32>,
      } else {
      }
      %c1_i32_42 = arith.constant 1 : i32
      %85 = arith.cmpi eq, %81, %c1_i32_42 : i32
      %86 = arith.extui %85 : i1 to i32
      %c0_i32_43 = arith.constant 0 : i32
      %87 = arith.cmpi ne, %86, %c0_i32_43 : i32
      scf.if %87 {
        %c0 = arith.constant 0 : index
        %c0_48 = arith.constant 0 : index
        %c0_49 = arith.constant 0 : index
        %c0_50 = arith.constant 0 : index
        %94 = vector.load %arg5[%c0, %c0_48, %c0_49, %c0_50] : memref<2x3x8x128xf32, #tpu.memory_space<vmem>>, vector<1x3x8x128xf32>
        %95 = vector.shape_cast %94 : vector<1x3x8x128xf32> to vector<3x8x128xf32>
        %96 = vector.extract_strided_slice %95 {offsets = [0, 0, 0], sizes = [1, 8, 128], strides = [1, 1, 1]} : vector<3x8x128xf32> to vector<1x8x128xf32>
        %97 = vector.shape_cast %96 : vector<1x8x128xf32> to vector<8x128xf32>
        %cst = arith.constant 2.989000e-01 : f32
        %98 = vector.broadcast %cst : f32 to vector<8x128xf32>
        %99 = arith.mulf %98, %97 : vector<8x128xf32>
        %100 = vector.extract_strided_slice %95 {offsets = [1, 0, 0], sizes = [1, 8, 128], strides = [1, 1, 1]} : vector<3x8x128xf32> to vector<1x8x128xf32>
        %101 = vector.shape_cast %100 : vector<1x8x128xf32> to vector<8x128xf32>
        %cst_51 = arith.constant 5.870000e-01 : f32
        %102 = vector.broadcast %cst_51 : f32 to vector<8x128xf32>
        %103 = arith.mulf %102, %101 : vector<8x128xf32>
        %104 = arith.addf %99, %103 : vector<8x128xf32>
        %105 = vector.extract_strided_slice %95 {offsets = [2, 0, 0], sizes = [1, 8, 128], strides = [1, 1, 1]} : vector<3x8x128xf32> to vector<1x8x128xf32>
        %106 = vector.shape_cast %105 : vector<1x8x128xf32> to vector<8x128xf32>
        %cst_52 = arith.constant 1.140000e-01 : f32
        %107 = vector.broadcast %cst_52 : f32 to vector<8x128xf32>
        %108 = arith.mulf %107, %106 : vector<8x128xf32>
        %109 = arith.addf %104, %108 : vector<8x128xf32>
        %110 = vector.shape_cast %109 : vector<8x128xf32> to vector<1x8x128xf32>
        %cst_53 = arith.constant dense<0.000000e+00> : vector<1xf32>
        %111 = vector.multi_reduction <add>, %110, %cst_53 [1, 2] : vector<1x8x128xf32> to vector<1xf32>
        %112 = vector.shape_cast %111 : vector<1xf32> to vector<1x1x1xf32>
        %113 = vector.extract %112[0, 0, 0] : f32 from vector<1x1x1xf32>
        %cst_54 = arith.constant 3.906250e-03 : f32
        %114 = arith.mulf %113, %cst_54 : f32
        %115 = vector.broadcast %27 : f32 to vector<3x8x128xf32>
        %116 = arith.mulf %115, %95 : vector<3x8x128xf32>
        %cst_55 = arith.constant 1.000000e+00 : f32
        %117 = arith.subf %cst_55, %27 : f32
        %118 = arith.mulf %117, %114 : f32
        %119 = vector.broadcast %118 : f32 to vector<3x8x128xf32>
        %120 = arith.addf %116, %119 : vector<3x8x128xf32>
        %cst_56 = arith.constant 0.000000e+00 : f32
        %cst_57 = arith.constant 1.000000e+00 : f32
        %121 = vector.broadcast %cst_56 : f32 to vector<3x8x128xf32>
        %122 = arith.maximumf %121, %120 : vector<3x8x128xf32>
        %123 = vector.broadcast %cst_57 : f32 to vector<3x8x128xf32>
        %124 = arith.minimumf %123, %122 : vector<3x8x128xf32>
        %c0_58 = arith.constant 0 : index
        %c0_59 = arith.constant 0 : index
        %c0_60 = arith.constant 0 : index
        %c0_61 = arith.constant 0 : index
        %125 = vector.load %arg5[%c0_58, %c0_59, %c0_60, %c0_61] : memref<2x3x8x128xf32, #tpu.memory_space<vmem>>, vector<1x3x8x128xf32>
        %126 = vector.shape_cast %125 : vector<1x3x8x128xf32> to vector<3x8x128xf32>
        %127 = vector.shape_cast %124 : vector<3x8x128xf32> to vector<1x3x8x128xf32>
        tpu.vector_store %arg5[%c0_58, %c0_59, %c0_60, %c0_61], %127 {strides = array<i32>} : memref<2x3x8x128xf32, #tpu.memory_space<vmem>>, vector<1x3x8x128xf32>,
      } else {
      }
      %c2_i32_44 = arith.constant 2 : i32
      %88 = arith.cmpi eq, %81, %c2_i32_44 : i32
      %89 = arith.extui %88 : i1 to i32
      %c0_i32_45 = arith.constant 0 : i32
      %90 = arith.cmpi ne, %89, %c0_i32_45 : i32
      scf.if %90 {
        %c0 = arith.constant 0 : index
        %c0_48 = arith.constant 0 : index
        %c0_49 = arith.constant 0 : index
        %c0_50 = arith.constant 0 : index
        %94 = vector.load %arg5[%c0, %c0_48, %c0_49, %c0_50] : memref<2x3x8x128xf32, #tpu.memory_space<vmem>>, vector<1x3x8x128xf32>
        %95 = vector.shape_cast %94 : vector<1x3x8x128xf32> to vector<3x8x128xf32>
        %96 = vector.extract_strided_slice %95 {offsets = [0, 0, 0], sizes = [1, 8, 128], strides = [1, 1, 1]} : vector<3x8x128xf32> to vector<1x8x128xf32>
        %97 = vector.shape_cast %96 : vector<1x8x128xf32> to vector<8x128xf32>
        %cst = arith.constant 2.989000e-01 : f32
        %98 = vector.broadcast %cst : f32 to vector<8x128xf32>
        %99 = arith.mulf %98, %97 : vector<8x128xf32>
        %100 = vector.extract_strided_slice %95 {offsets = [1, 0, 0], sizes = [1, 8, 128], strides = [1, 1, 1]} : vector<3x8x128xf32> to vector<1x8x128xf32>
        %101 = vector.shape_cast %100 : vector<1x8x128xf32> to vector<8x128xf32>
        %cst_51 = arith.constant 5.870000e-01 : f32
        %102 = vector.broadcast %cst_51 : f32 to vector<8x128xf32>
        %103 = arith.mulf %102, %101 : vector<8x128xf32>
        %104 = arith.addf %99, %103 : vector<8x128xf32>
        %105 = vector.extract_strided_slice %95 {offsets = [2, 0, 0], sizes = [1, 8, 128], strides = [1, 1, 1]} : vector<3x8x128xf32> to vector<1x8x128xf32>
        %106 = vector.shape_cast %105 : vector<1x8x128xf32> to vector<8x128xf32>
        %cst_52 = arith.constant 1.140000e-01 : f32
        %107 = vector.broadcast %cst_52 : f32 to vector<8x128xf32>
        %108 = arith.mulf %107, %106 : vector<8x128xf32>
        %109 = arith.addf %104, %108 : vector<8x128xf32>
        %110 = vector.broadcast %30 : f32 to vector<3x8x128xf32>
        %111 = arith.mulf %110, %95 : vector<3x8x128xf32>
        %cst_53 = arith.constant 1.000000e+00 : f32
        %112 = arith.subf %cst_53, %30 : f32
        %113 = vector.shape_cast %109 : vector<8x128xf32> to vector<1x8x128xf32>
        %114 = vector.broadcast %112 : f32 to vector<1x8x128xf32>
        %115 = arith.mulf %114, %113 : vector<1x8x128xf32>
        %116 = vector.broadcast %115 : vector<1x8x128xf32> to vector<3x8x128xf32>
        %117 = arith.addf %111, %116 : vector<3x8x128xf32>
        %cst_54 = arith.constant 0.000000e+00 : f32
        %cst_55 = arith.constant 1.000000e+00 : f32
        %118 = vector.broadcast %cst_54 : f32 to vector<3x8x128xf32>
        %119 = arith.maximumf %118, %117 : vector<3x8x128xf32>
        %120 = vector.broadcast %cst_55 : f32 to vector<3x8x128xf32>
        %121 = arith.minimumf %120, %119 : vector<3x8x128xf32>
        %c0_56 = arith.constant 0 : index
        %c0_57 = arith.constant 0 : index
        %c0_58 = arith.constant 0 : index
        %c0_59 = arith.constant 0 : index
        %122 = vector.load %arg5[%c0_56, %c0_57, %c0_58, %c0_59] : memref<2x3x8x128xf32, #tpu.memory_space<vmem>>, vector<1x3x8x128xf32>
        %123 = vector.shape_cast %122 : vector<1x3x8x128xf32> to vector<3x8x128xf32>
        %124 = vector.shape_cast %121 : vector<3x8x128xf32> to vector<1x3x8x128xf32>
        tpu.vector_store %arg5[%c0_56, %c0_57, %c0_58, %c0_59], %124 {strides = array<i32>} : memref<2x3x8x128xf32, #tpu.memory_space<vmem>>, vector<1x3x8x128xf32>,
      } else {
      }
      %c3_i32_46 = arith.constant 3 : i32
      %91 = arith.cmpi eq, %81, %c3_i32_46 : i32
      %92 = arith.extui %91 : i1 to i32
      %c0_i32_47 = arith.constant 0 : i32
      %93 = arith.cmpi ne, %92, %c0_i32_47 : i32
      scf.if %93 {
        %c0 = arith.constant 0 : index
        %c0_48 = arith.constant 0 : index
        %c0_49 = arith.constant 0 : index
        %c0_50 = arith.constant 0 : index
        %94 = vector.load %arg5[%c0, %c0_48, %c0_49, %c0_50] : memref<2x3x8x128xf32, #tpu.memory_space<vmem>>, vector<1x3x8x128xf32>
        %95 = vector.shape_cast %94 : vector<1x3x8x128xf32> to vector<3x8x128xf32>
        %96 = vector.extract_strided_slice %95 {offsets = [0, 0, 0], sizes = [1, 8, 128], strides = [1, 1, 1]} : vector<3x8x128xf32> to vector<1x8x128xf32>
        %97 = vector.shape_cast %96 : vector<1x8x128xf32> to vector<8x128xf32>
        %98 = vector.extract_strided_slice %95 {offsets = [1, 0, 0], sizes = [1, 8, 128], strides = [1, 1, 1]} : vector<3x8x128xf32> to vector<1x8x128xf32>
        %99 = vector.shape_cast %98 : vector<1x8x128xf32> to vector<8x128xf32>
        %100 = vector.extract_strided_slice %95 {offsets = [2, 0, 0], sizes = [1, 8, 128], strides = [1, 1, 1]} : vector<3x8x128xf32> to vector<1x8x128xf32>
        %101 = vector.shape_cast %100 : vector<1x8x128xf32> to vector<8x128xf32>
        %102 = arith.maximumf %97, %99 : vector<8x128xf32>
        %103 = arith.maximumf %102, %101 : vector<8x128xf32>
        %104 = arith.minimumf %97, %99 : vector<8x128xf32>
        %105 = arith.minimumf %104, %101 : vector<8x128xf32>
        %106 = arith.cmpf oeq, %103, %105 : vector<8x128xf32>
        %107 = arith.subf %103, %105 : vector<8x128xf32>
        %cst = arith.constant 1.000000e+00 : f32
        %108 = vector.broadcast %cst : f32 to vector<8x128xf32>
        %109 = arith.select %106, %108, %103 : vector<8x128xi1>, vector<8x128xf32>
        %110 = tpu.reciprocal %109 {approx = true} : vector<8x128xf32> -> vector<8x128xf32>
        %111 = arith.mulf %109, %110 : vector<8x128xf32>
        %cst_51 = arith.constant 2.000000e+00 : f32
        %112 = vector.broadcast %cst_51 : f32 to vector<8x128xf32>
        %113 = arith.subf %112, %111 : vector<8x128xf32>
        %114 = arith.mulf %110, %113 : vector<8x128xf32>
        %115 = arith.mulf %107, %114 : vector<8x128xf32>
        %116 = arith.select %106, %108, %107 : vector<8x128xi1>, vector<8x128xf32>
        %117 = tpu.reciprocal %116 {approx = true} : vector<8x128xf32> -> vector<8x128xf32>
        %118 = arith.mulf %116, %117 : vector<8x128xf32>
        %cst_52 = arith.constant 2.000000e+00 : f32
        %119 = vector.broadcast %cst_52 : f32 to vector<8x128xf32>
        %120 = arith.subf %119, %118 : vector<8x128xf32>
        %121 = arith.mulf %117, %120 : vector<8x128xf32>
        %122 = arith.subf %103, %97 : vector<8x128xf32>
        %123 = arith.mulf %122, %121 : vector<8x128xf32>
        %124 = arith.subf %103, %99 : vector<8x128xf32>
        %125 = arith.mulf %124, %121 : vector<8x128xf32>
        %126 = arith.subf %103, %101 : vector<8x128xf32>
        %127 = arith.mulf %126, %121 : vector<8x128xf32>
        %128 = arith.cmpf oeq, %103, %97 : vector<8x128xf32>
        %129 = arith.subf %127, %125 : vector<8x128xf32>
        %cst_53 = arith.constant 0.000000e+00 : f32
        %130 = vector.broadcast %cst_53 : f32 to vector<8x128xf32>
        %131 = arith.select %128, %129, %130 : vector<8x128xi1>, vector<8x128xf32>
        %132 = arith.cmpf oeq, %103, %99 : vector<8x128xf32>
        %133 = arith.cmpf one, %103, %97 : vector<8x128xf32>
        %134 = arith.andi %132, %133 : vector<8x128xi1>
        %cst_54 = arith.constant 2.000000e+00 : f32
        %135 = vector.broadcast %cst_54 : f32 to vector<8x128xf32>
        %136 = arith.addf %135, %123 : vector<8x128xf32>
        %137 = arith.subf %136, %127 : vector<8x128xf32>
        %cst_55 = arith.constant 0.000000e+00 : f32
        %138 = vector.broadcast %cst_55 : f32 to vector<8x128xf32>
        %139 = arith.select %134, %137, %138 : vector<8x128xi1>, vector<8x128xf32>
        %140 = arith.cmpf one, %103, %99 : vector<8x128xf32>
        %141 = arith.cmpf one, %103, %97 : vector<8x128xf32>
        %142 = arith.andi %140, %141 : vector<8x128xi1>
        %cst_56 = arith.constant 4.000000e+00 : f32
        %143 = vector.broadcast %cst_56 : f32 to vector<8x128xf32>
        %144 = arith.addf %143, %125 : vector<8x128xf32>
        %145 = arith.subf %144, %123 : vector<8x128xf32>
        %cst_57 = arith.constant 0.000000e+00 : f32
        %146 = vector.broadcast %cst_57 : f32 to vector<8x128xf32>
        %147 = arith.select %142, %145, %146 : vector<8x128xi1>, vector<8x128xf32>
        %148 = arith.addf %131, %139 : vector<8x128xf32>
        %149 = arith.addf %148, %147 : vector<8x128xf32>
        %cst_58 = arith.constant 0.166666672 : f32
        %150 = vector.broadcast %cst_58 : f32 to vector<8x128xf32>
        %151 = arith.mulf %149, %150 : vector<8x128xf32>
        %cst_59 = arith.constant 1.000000e+00 : f32
        %152 = vector.broadcast %cst_59 : f32 to vector<8x128xf32>
        %153 = arith.addf %151, %152 : vector<8x128xf32>
        %154 = vector.broadcast %33 : f32 to vector<8x128xf32>
        %155 = arith.addf %153, %154 : vector<8x128xf32>
        %156 = math.floor %155 : vector<8x128xf32>
        %157 = arith.subf %155, %156 : vector<8x128xf32>
        %cst_60 = arith.constant 6.000000e+00 : f32
        %158 = vector.broadcast %cst_60 : f32 to vector<8x128xf32>
        %159 = arith.mulf %157, %158 : vector<8x128xf32>
        %160 = math.floor %159 : vector<8x128xf32>
        %161 = arith.subf %159, %160 : vector<8x128xf32>
        %cst_61 = arith.constant 1.000000e+00 : f32
        %162 = vector.broadcast %cst_61 : f32 to vector<8x128xf32>
        %163 = arith.subf %162, %115 : vector<8x128xf32>
        %164 = arith.mulf %103, %163 : vector<8x128xf32>
        %165 = arith.mulf %115, %161 : vector<8x128xf32>
        %cst_62 = arith.constant 1.000000e+00 : f32
        %166 = vector.broadcast %cst_62 : f32 to vector<8x128xf32>
        %167 = arith.subf %166, %165 : vector<8x128xf32>
        %168 = arith.mulf %103, %167 : vector<8x128xf32>
        %cst_63 = arith.constant 1.000000e+00 : f32
        %169 = vector.broadcast %cst_63 : f32 to vector<8x128xf32>
        %170 = arith.subf %169, %161 : vector<8x128xf32>
        %171 = arith.mulf %115, %170 : vector<8x128xf32>
        %cst_64 = arith.constant 1.000000e+00 : f32
        %172 = vector.broadcast %cst_64 : f32 to vector<8x128xf32>
        %173 = arith.subf %172, %171 : vector<8x128xf32>
        %174 = arith.mulf %103, %173 : vector<8x128xf32>
        %cst_65 = arith.constant 0.000000e+00 : f32
        %175 = vector.broadcast %cst_65 : f32 to vector<8x128xf32>
        %176 = arith.cmpf oeq, %160, %175 : vector<8x128xf32>
        %cst_66 = arith.constant 1.000000e+00 : f32
        %177 = vector.broadcast %cst_66 : f32 to vector<8x128xf32>
        %178 = arith.cmpf oeq, %160, %177 : vector<8x128xf32>
        %cst_67 = arith.constant 2.000000e+00 : f32
        %179 = vector.broadcast %cst_67 : f32 to vector<8x128xf32>
        %180 = arith.cmpf oeq, %160, %179 : vector<8x128xf32>
        %cst_68 = arith.constant 3.000000e+00 : f32
        %181 = vector.broadcast %cst_68 : f32 to vector<8x128xf32>
        %182 = arith.cmpf oeq, %160, %181 : vector<8x128xf32>
        %cst_69 = arith.constant 4.000000e+00 : f32
        %183 = vector.broadcast %cst_69 : f32 to vector<8x128xf32>
        %184 = arith.cmpf oeq, %160, %183 : vector<8x128xf32>
        %185 = arith.select %184, %174, %103 : vector<8x128xi1>, vector<8x128xf32>
        %186 = arith.select %182, %164, %185 : vector<8x128xi1>, vector<8x128xf32>
        %187 = arith.select %180, %164, %186 : vector<8x128xi1>, vector<8x128xf32>
        %188 = arith.select %178, %168, %187 : vector<8x128xi1>, vector<8x128xf32>
        %189 = arith.select %176, %103, %188 : vector<8x128xi1>, vector<8x128xf32>
        %cst_70 = arith.constant 0.000000e+00 : f32
        %cst_71 = arith.constant 1.000000e+00 : f32
        %190 = vector.broadcast %cst_70 : f32 to vector<8x128xf32>
        %191 = arith.maximumf %190, %189 : vector<8x128xf32>
        %192 = vector.broadcast %cst_71 : f32 to vector<8x128xf32>
        %193 = arith.minimumf %192, %191 : vector<8x128xf32>
        %194 = arith.select %184, %164, %164 : vector<8x128xi1>, vector<8x128xf32>
        %195 = arith.select %182, %168, %194 : vector<8x128xi1>, vector<8x128xf32>
        %196 = arith.select %180, %103, %195 : vector<8x128xi1>, vector<8x128xf32>
        %197 = arith.select %178, %103, %196 : vector<8x128xi1>, vector<8x128xf32>
        %198 = arith.select %176, %174, %197 : vector<8x128xi1>, vector<8x128xf32>
        %cst_72 = arith.constant 0.000000e+00 : f32
        %cst_73 = arith.constant 1.000000e+00 : f32
        %199 = vector.broadcast %cst_72 : f32 to vector<8x128xf32>
        %200 = arith.maximumf %199, %198 : vector<8x128xf32>
        %201 = vector.broadcast %cst_73 : f32 to vector<8x128xf32>
        %202 = arith.minimumf %201, %200 : vector<8x128xf32>
        %203 = arith.select %184, %103, %168 : vector<8x128xi1>, vector<8x128xf32>
        %204 = arith.select %182, %103, %203 : vector<8x128xi1>, vector<8x128xf32>
        %205 = arith.select %180, %174, %204 : vector<8x128xi1>, vector<8x128xf32>
        %206 = arith.select %178, %164, %205 : vector<8x128xi1>, vector<8x128xf32>
        %207 = arith.select %176, %164, %206 : vector<8x128xi1>, vector<8x128xf32>
        %cst_74 = arith.constant 0.000000e+00 : f32
        %cst_75 = arith.constant 1.000000e+00 : f32
        %208 = vector.broadcast %cst_74 : f32 to vector<8x128xf32>
        %209 = arith.maximumf %208, %207 : vector<8x128xf32>
        %210 = vector.broadcast %cst_75 : f32 to vector<8x128xf32>
        %211 = arith.minimumf %210, %209 : vector<8x128xf32>
        %c0_76 = arith.constant 0 : index
        %c0_77 = arith.constant 0 : index
        %c0_78 = arith.constant 0 : index
        %c0_79 = arith.constant 0 : index
        %212 = vector.load %arg5[%c0_76, %c0_77, %c0_78, %c0_79] : memref<2x3x8x128xf32, #tpu.memory_space<vmem>>, vector<1x1x8x128xf32>
        %213 = vector.shape_cast %212 : vector<1x1x8x128xf32> to vector<8x128xf32>
        %214 = vector.shape_cast %193 : vector<8x128xf32> to vector<1x1x8x128xf32>
        tpu.vector_store %arg5[%c0_76, %c0_77, %c0_78, %c0_79], %214 {strides = array<i32>} : memref<2x3x8x128xf32, #tpu.memory_space<vmem>>, vector<1x1x8x128xf32>,
        %c0_80 = arith.constant 0 : index
        %c1 = arith.constant 1 : index
        %c0_81 = arith.constant 0 : index
        %c0_82 = arith.constant 0 : index
        %215 = vector.load %arg5[%c0_80, %c1, %c0_81, %c0_82] : memref<2x3x8x128xf32, #tpu.memory_space<vmem>>, vector<1x1x8x128xf32>
        %216 = vector.shape_cast %215 : vector<1x1x8x128xf32> to vector<8x128xf32>
        %217 = vector.shape_cast %202 : vector<8x128xf32> to vector<1x1x8x128xf32>
        tpu.vector_store %arg5[%c0_80, %c1, %c0_81, %c0_82], %217 {strides = array<i32>} : memref<2x3x8x128xf32, #tpu.memory_space<vmem>>, vector<1x1x8x128xf32>,
        %c0_83 = arith.constant 0 : index
        %c2 = arith.constant 2 : index
        %c0_84 = arith.constant 0 : index
        %c0_85 = arith.constant 0 : index
        %218 = vector.load %arg5[%c0_83, %c2, %c0_84, %c0_85] : memref<2x3x8x128xf32, #tpu.memory_space<vmem>>, vector<1x1x8x128xf32>
        %219 = vector.shape_cast %218 : vector<1x1x8x128xf32> to vector<8x128xf32>
        %220 = vector.shape_cast %211 : vector<8x128xf32> to vector<1x1x8x128xf32>
        tpu.vector_store %arg5[%c0_83, %c2, %c0_84, %c0_85], %220 {strides = array<i32>} : memref<2x3x8x128xf32, #tpu.memory_space<vmem>>, vector<1x1x8x128xf32>,
      } else {
      }
    } else {
    }
    %c2_i32_3 = arith.constant 2 : i32
    %11 = arith.muli %arg0, %c2_i32_3 : i32
    %c1_i32 = arith.constant 1 : i32
    %12 = arith.addi %11, %c1_i32 : i32
    %c4_i32_4 = arith.constant 4 : i32
    %13 = arith.muli %c4_i32_4, %12 : i32
    %14 = arith.index_cast %12 : i32 to index
    %15 = memref.load %arg1[%14] : memref<4xi32, #tpu.memory_space<smem>>
    %c0_i32_5 = arith.constant 0 : i32
    %16 = arith.cmpi ne, %15, %c0_i32_5 : i32
    %true_6 = arith.constant true
    %17 = arith.xori %16, %true_6 : i1
    %18 = arith.extui %17 : i1 to i32
    %c0_i32_7 = arith.constant 0 : i32
    %19 = arith.cmpi ne, %18, %c0_i32_7 : i32
    scf.if %19 {
      %c1 = arith.constant 1 : index
      %c0 = arith.constant 0 : index
      %c0_9 = arith.constant 0 : index
      %c0_10 = arith.constant 0 : index
      %22 = vector.load %arg4[%c1, %c0, %c0_9, %c0_10] : memref<2x3x8x128xf32, #tpu.memory_space<vmem>>, vector<1x3x8x128xf32>
      %23 = vector.shape_cast %22 : vector<1x3x8x128xf32> to vector<3x8x128xf32>
      %c1_11 = arith.constant 1 : index
      %c0_12 = arith.constant 0 : index
      %c0_13 = arith.constant 0 : index
      %c0_14 = arith.constant 0 : index
      %24 = vector.load %arg5[%c1_11, %c0_12, %c0_13, %c0_14] : memref<2x3x8x128xf32, #tpu.memory_space<vmem>>, vector<1x3x8x128xf32>
      %25 = vector.shape_cast %24 : vector<1x3x8x128xf32> to vector<3x8x128xf32>
      %26 = vector.shape_cast %23 : vector<3x8x128xf32> to vector<1x3x8x128xf32>
      tpu.vector_store %arg5[%c1_11, %c0_12, %c0_13, %c0_14], %26 {strides = array<i32>} : memref<2x3x8x128xf32, #tpu.memory_space<vmem>>, vector<1x3x8x128xf32>,
    } else {
    }
    %20 = arith.extui %16 : i1 to i32
    %c0_i32_8 = arith.constant 0 : i32
    %21 = arith.cmpi ne, %20, %c0_i32_8 : i32
    scf.if %21 {
      %c0_i32_9 = arith.constant 0 : i32
      %22 = arith.addi %13, %c0_i32_9 : i32
      %23 = arith.index_cast %22 : i32 to index
      %24 = memref.load %arg2[%23] : memref<16xf32, #tpu.memory_space<smem>>
      %c1_i32_10 = arith.constant 1 : i32
      %25 = arith.addi %13, %c1_i32_10 : i32
      %26 = arith.index_cast %25 : i32 to index
      %27 = memref.load %arg2[%26] : memref<16xf32, #tpu.memory_space<smem>>
      %c2_i32_11 = arith.constant 2 : i32
      %28 = arith.addi %13, %c2_i32_11 : i32
      %29 = arith.index_cast %28 : i32 to index
      %30 = memref.load %arg2[%29] : memref<16xf32, #tpu.memory_space<smem>>
      %c3_i32 = arith.constant 3 : i32
      %31 = arith.addi %13, %c3_i32 : i32
      %32 = arith.index_cast %31 : i32 to index
      %33 = memref.load %arg2[%32] : memref<16xf32, #tpu.memory_space<smem>>
      %c0_i32_12 = arith.constant 0 : i32
      %34 = arith.addi %13, %c0_i32_12 : i32
      %35 = arith.index_cast %34 : i32 to index
      %36 = memref.load %arg3[%35] : memref<16xi32, #tpu.memory_space<smem>>
      %c0_i32_13 = arith.constant 0 : i32
      %37 = arith.cmpi eq, %36, %c0_i32_13 : i32
      %38 = arith.extui %37 : i1 to i32
      %c0_i32_14 = arith.constant 0 : i32
      %39 = arith.cmpi ne, %38, %c0_i32_14 : i32
      scf.if %39 {
        %c1 = arith.constant 1 : index
        %c0 = arith.constant 0 : index
        %c0_48 = arith.constant 0 : index
        %c0_49 = arith.constant 0 : index
        %94 = vector.load %arg4[%c1, %c0, %c0_48, %c0_49] : memref<2x3x8x128xf32, #tpu.memory_space<vmem>>, vector<1x3x8x128xf32>
        %95 = vector.shape_cast %94 : vector<1x3x8x128xf32> to vector<3x8x128xf32>
        %96 = vector.broadcast %24 : f32 to vector<3x8x128xf32>
        %97 = arith.mulf %95, %96 : vector<3x8x128xf32>
        %cst = arith.constant 0.000000e+00 : f32
        %cst_50 = arith.constant 1.000000e+00 : f32
        %98 = vector.broadcast %cst : f32 to vector<3x8x128xf32>
        %99 = arith.maximumf %98, %97 : vector<3x8x128xf32>
        %100 = vector.broadcast %cst_50 : f32 to vector<3x8x128xf32>
        %101 = arith.minimumf %100, %99 : vector<3x8x128xf32>
        %c1_51 = arith.constant 1 : index
        %c0_52 = arith.constant 0 : index
        %c0_53 = arith.constant 0 : index
        %c0_54 = arith.constant 0 : index
        %102 = vector.load %arg5[%c1_51, %c0_52, %c0_53, %c0_54] : memref<2x3x8x128xf32, #tpu.memory_space<vmem>>, vector<1x3x8x128xf32>
        %103 = vector.shape_cast %102 : vector<1x3x8x128xf32> to vector<3x8x128xf32>
        %104 = vector.shape_cast %101 : vector<3x8x128xf32> to vector<1x3x8x128xf32>
        tpu.vector_store %arg5[%c1_51, %c0_52, %c0_53, %c0_54], %104 {strides = array<i32>} : memref<2x3x8x128xf32, #tpu.memory_space<vmem>>, vector<1x3x8x128xf32>,
      } else {
      }
      %c1_i32_15 = arith.constant 1 : i32
      %40 = arith.cmpi eq, %36, %c1_i32_15 : i32
      %41 = arith.extui %40 : i1 to i32
      %c0_i32_16 = arith.constant 0 : i32
      %42 = arith.cmpi ne, %41, %c0_i32_16 : i32
      scf.if %42 {
        %c1 = arith.constant 1 : index
        %c0 = arith.constant 0 : index
        %c0_48 = arith.constant 0 : index
        %c0_49 = arith.constant 0 : index
        %94 = vector.load %arg4[%c1, %c0, %c0_48, %c0_49] : memref<2x3x8x128xf32, #tpu.memory_space<vmem>>, vector<1x3x8x128xf32>
        %95 = vector.shape_cast %94 : vector<1x3x8x128xf32> to vector<3x8x128xf32>
        %96 = vector.extract_strided_slice %95 {offsets = [0, 0, 0], sizes = [1, 8, 128], strides = [1, 1, 1]} : vector<3x8x128xf32> to vector<1x8x128xf32>
        %97 = vector.shape_cast %96 : vector<1x8x128xf32> to vector<8x128xf32>
        %cst = arith.constant 2.989000e-01 : f32
        %98 = vector.broadcast %cst : f32 to vector<8x128xf32>
        %99 = arith.mulf %98, %97 : vector<8x128xf32>
        %100 = vector.extract_strided_slice %95 {offsets = [1, 0, 0], sizes = [1, 8, 128], strides = [1, 1, 1]} : vector<3x8x128xf32> to vector<1x8x128xf32>
        %101 = vector.shape_cast %100 : vector<1x8x128xf32> to vector<8x128xf32>
        %cst_50 = arith.constant 5.870000e-01 : f32
        %102 = vector.broadcast %cst_50 : f32 to vector<8x128xf32>
        %103 = arith.mulf %102, %101 : vector<8x128xf32>
        %104 = arith.addf %99, %103 : vector<8x128xf32>
        %105 = vector.extract_strided_slice %95 {offsets = [2, 0, 0], sizes = [1, 8, 128], strides = [1, 1, 1]} : vector<3x8x128xf32> to vector<1x8x128xf32>
        %106 = vector.shape_cast %105 : vector<1x8x128xf32> to vector<8x128xf32>
        %cst_51 = arith.constant 1.140000e-01 : f32
        %107 = vector.broadcast %cst_51 : f32 to vector<8x128xf32>
        %108 = arith.mulf %107, %106 : vector<8x128xf32>
        %109 = arith.addf %104, %108 : vector<8x128xf32>
        %110 = vector.shape_cast %109 : vector<8x128xf32> to vector<1x8x128xf32>
        %cst_52 = arith.constant dense<0.000000e+00> : vector<1xf32>
        %111 = vector.multi_reduction <add>, %110, %cst_52 [1, 2] : vector<1x8x128xf32> to vector<1xf32>
        %112 = vector.shape_cast %111 : vector<1xf32> to vector<1x1x1xf32>
        %113 = vector.extract %112[0, 0, 0] : f32 from vector<1x1x1xf32>
        %cst_53 = arith.constant 3.906250e-03 : f32
        %114 = arith.mulf %113, %cst_53 : f32
        %115 = vector.broadcast %27 : f32 to vector<3x8x128xf32>
        %116 = arith.mulf %115, %95 : vector<3x8x128xf32>
        %cst_54 = arith.constant 1.000000e+00 : f32
        %117 = arith.subf %cst_54, %27 : f32
        %118 = arith.mulf %117, %114 : f32
        %119 = vector.broadcast %118 : f32 to vector<3x8x128xf32>
        %120 = arith.addf %116, %119 : vector<3x8x128xf32>
        %cst_55 = arith.constant 0.000000e+00 : f32
        %cst_56 = arith.constant 1.000000e+00 : f32
        %121 = vector.broadcast %cst_55 : f32 to vector<3x8x128xf32>
        %122 = arith.maximumf %121, %120 : vector<3x8x128xf32>
        %123 = vector.broadcast %cst_56 : f32 to vector<3x8x128xf32>
        %124 = arith.minimumf %123, %122 : vector<3x8x128xf32>
        %c1_57 = arith.constant 1 : index
        %c0_58 = arith.constant 0 : index
        %c0_59 = arith.constant 0 : index
        %c0_60 = arith.constant 0 : index
        %125 = vector.load %arg5[%c1_57, %c0_58, %c0_59, %c0_60] : memref<2x3x8x128xf32, #tpu.memory_space<vmem>>, vector<1x3x8x128xf32>
        %126 = vector.shape_cast %125 : vector<1x3x8x128xf32> to vector<3x8x128xf32>
        %127 = vector.shape_cast %124 : vector<3x8x128xf32> to vector<1x3x8x128xf32>
        tpu.vector_store %arg5[%c1_57, %c0_58, %c0_59, %c0_60], %127 {strides = array<i32>} : memref<2x3x8x128xf32, #tpu.memory_space<vmem>>, vector<1x3x8x128xf32>,
      } else {
      }
      %c2_i32_17 = arith.constant 2 : i32
      %43 = arith.cmpi eq, %36, %c2_i32_17 : i32
      %44 = arith.extui %43 : i1 to i32
      %c0_i32_18 = arith.constant 0 : i32
      %45 = arith.cmpi ne, %44, %c0_i32_18 : i32
      scf.if %45 {
        %c1 = arith.constant 1 : index
        %c0 = arith.constant 0 : index
        %c0_48 = arith.constant 0 : index
        %c0_49 = arith.constant 0 : index
        %94 = vector.load %arg4[%c1, %c0, %c0_48, %c0_49] : memref<2x3x8x128xf32, #tpu.memory_space<vmem>>, vector<1x3x8x128xf32>
        %95 = vector.shape_cast %94 : vector<1x3x8x128xf32> to vector<3x8x128xf32>
        %96 = vector.extract_strided_slice %95 {offsets = [0, 0, 0], sizes = [1, 8, 128], strides = [1, 1, 1]} : vector<3x8x128xf32> to vector<1x8x128xf32>
        %97 = vector.shape_cast %96 : vector<1x8x128xf32> to vector<8x128xf32>
        %cst = arith.constant 2.989000e-01 : f32
        %98 = vector.broadcast %cst : f32 to vector<8x128xf32>
        %99 = arith.mulf %98, %97 : vector<8x128xf32>
        %100 = vector.extract_strided_slice %95 {offsets = [1, 0, 0], sizes = [1, 8, 128], strides = [1, 1, 1]} : vector<3x8x128xf32> to vector<1x8x128xf32>
        %101 = vector.shape_cast %100 : vector<1x8x128xf32> to vector<8x128xf32>
        %cst_50 = arith.constant 5.870000e-01 : f32
        %102 = vector.broadcast %cst_50 : f32 to vector<8x128xf32>
        %103 = arith.mulf %102, %101 : vector<8x128xf32>
        %104 = arith.addf %99, %103 : vector<8x128xf32>
        %105 = vector.extract_strided_slice %95 {offsets = [2, 0, 0], sizes = [1, 8, 128], strides = [1, 1, 1]} : vector<3x8x128xf32> to vector<1x8x128xf32>
        %106 = vector.shape_cast %105 : vector<1x8x128xf32> to vector<8x128xf32>
        %cst_51 = arith.constant 1.140000e-01 : f32
        %107 = vector.broadcast %cst_51 : f32 to vector<8x128xf32>
        %108 = arith.mulf %107, %106 : vector<8x128xf32>
        %109 = arith.addf %104, %108 : vector<8x128xf32>
        %110 = vector.broadcast %30 : f32 to vector<3x8x128xf32>
        %111 = arith.mulf %110, %95 : vector<3x8x128xf32>
        %cst_52 = arith.constant 1.000000e+00 : f32
        %112 = arith.subf %cst_52, %30 : f32
        %113 = vector.shape_cast %109 : vector<8x128xf32> to vector<1x8x128xf32>
        %114 = vector.broadcast %112 : f32 to vector<1x8x128xf32>
        %115 = arith.mulf %114, %113 : vector<1x8x128xf32>
        %116 = vector.broadcast %115 : vector<1x8x128xf32> to vector<3x8x128xf32>
        %117 = arith.addf %111, %116 : vector<3x8x128xf32>
        %cst_53 = arith.constant 0.000000e+00 : f32
        %cst_54 = arith.constant 1.000000e+00 : f32
        %118 = vector.broadcast %cst_53 : f32 to vector<3x8x128xf32>
        %119 = arith.maximumf %118, %117 : vector<3x8x128xf32>
        %120 = vector.broadcast %cst_54 : f32 to vector<3x8x128xf32>
        %121 = arith.minimumf %120, %119 : vector<3x8x128xf32>
        %c1_55 = arith.constant 1 : index
        %c0_56 = arith.constant 0 : index
        %c0_57 = arith.constant 0 : index
        %c0_58 = arith.constant 0 : index
        %122 = vector.load %arg5[%c1_55, %c0_56, %c0_57, %c0_58] : memref<2x3x8x128xf32, #tpu.memory_space<vmem>>, vector<1x3x8x128xf32>
        %123 = vector.shape_cast %122 : vector<1x3x8x128xf32> to vector<3x8x128xf32>
        %124 = vector.shape_cast %121 : vector<3x8x128xf32> to vector<1x3x8x128xf32>
        tpu.vector_store %arg5[%c1_55, %c0_56, %c0_57, %c0_58], %124 {strides = array<i32>} : memref<2x3x8x128xf32, #tpu.memory_space<vmem>>, vector<1x3x8x128xf32>,
      } else {
      }
      %c3_i32_19 = arith.constant 3 : i32
      %46 = arith.cmpi eq, %36, %c3_i32_19 : i32
      %47 = arith.extui %46 : i1 to i32
      %c0_i32_20 = arith.constant 0 : i32
      %48 = arith.cmpi ne, %47, %c0_i32_20 : i32
      scf.if %48 {
        %c1 = arith.constant 1 : index
        %c0 = arith.constant 0 : index
        %c0_48 = arith.constant 0 : index
        %c0_49 = arith.constant 0 : index
        %94 = vector.load %arg4[%c1, %c0, %c0_48, %c0_49] : memref<2x3x8x128xf32, #tpu.memory_space<vmem>>, vector<1x3x8x128xf32>
        %95 = vector.shape_cast %94 : vector<1x3x8x128xf32> to vector<3x8x128xf32>
        %96 = vector.extract_strided_slice %95 {offsets = [0, 0, 0], sizes = [1, 8, 128], strides = [1, 1, 1]} : vector<3x8x128xf32> to vector<1x8x128xf32>
        %97 = vector.shape_cast %96 : vector<1x8x128xf32> to vector<8x128xf32>
        %98 = vector.extract_strided_slice %95 {offsets = [1, 0, 0], sizes = [1, 8, 128], strides = [1, 1, 1]} : vector<3x8x128xf32> to vector<1x8x128xf32>
        %99 = vector.shape_cast %98 : vector<1x8x128xf32> to vector<8x128xf32>
        %100 = vector.extract_strided_slice %95 {offsets = [2, 0, 0], sizes = [1, 8, 128], strides = [1, 1, 1]} : vector<3x8x128xf32> to vector<1x8x128xf32>
        %101 = vector.shape_cast %100 : vector<1x8x128xf32> to vector<8x128xf32>
        %102 = arith.maximumf %97, %99 : vector<8x128xf32>
        %103 = arith.maximumf %102, %101 : vector<8x128xf32>
        %104 = arith.minimumf %97, %99 : vector<8x128xf32>
        %105 = arith.minimumf %104, %101 : vector<8x128xf32>
        %106 = arith.cmpf oeq, %103, %105 : vector<8x128xf32>
        %107 = arith.subf %103, %105 : vector<8x128xf32>
        %cst = arith.constant 1.000000e+00 : f32
        %108 = vector.broadcast %cst : f32 to vector<8x128xf32>
        %109 = arith.select %106, %108, %103 : vector<8x128xi1>, vector<8x128xf32>
        %110 = tpu.reciprocal %109 {approx = true} : vector<8x128xf32> -> vector<8x128xf32>
        %111 = arith.mulf %109, %110 : vector<8x128xf32>
        %cst_50 = arith.constant 2.000000e+00 : f32
        %112 = vector.broadcast %cst_50 : f32 to vector<8x128xf32>
        %113 = arith.subf %112, %111 : vector<8x128xf32>
        %114 = arith.mulf %110, %113 : vector<8x128xf32>
        %115 = arith.mulf %107, %114 : vector<8x128xf32>
        %116 = arith.select %106, %108, %107 : vector<8x128xi1>, vector<8x128xf32>
        %117 = tpu.reciprocal %116 {approx = true} : vector<8x128xf32> -> vector<8x128xf32>
        %118 = arith.mulf %116, %117 : vector<8x128xf32>
        %cst_51 = arith.constant 2.000000e+00 : f32
        %119 = vector.broadcast %cst_51 : f32 to vector<8x128xf32>
        %120 = arith.subf %119, %118 : vector<8x128xf32>
        %121 = arith.mulf %117, %120 : vector<8x128xf32>
        %122 = arith.subf %103, %97 : vector<8x128xf32>
        %123 = arith.mulf %122, %121 : vector<8x128xf32>
        %124 = arith.subf %103, %99 : vector<8x128xf32>
        %125 = arith.mulf %124, %121 : vector<8x128xf32>
        %126 = arith.subf %103, %101 : vector<8x128xf32>
        %127 = arith.mulf %126, %121 : vector<8x128xf32>
        %128 = arith.cmpf oeq, %103, %97 : vector<8x128xf32>
        %129 = arith.subf %127, %125 : vector<8x128xf32>
        %cst_52 = arith.constant 0.000000e+00 : f32
        %130 = vector.broadcast %cst_52 : f32 to vector<8x128xf32>
        %131 = arith.select %128, %129, %130 : vector<8x128xi1>, vector<8x128xf32>
        %132 = arith.cmpf oeq, %103, %99 : vector<8x128xf32>
        %133 = arith.cmpf one, %103, %97 : vector<8x128xf32>
        %134 = arith.andi %132, %133 : vector<8x128xi1>
        %cst_53 = arith.constant 2.000000e+00 : f32
        %135 = vector.broadcast %cst_53 : f32 to vector<8x128xf32>
        %136 = arith.addf %135, %123 : vector<8x128xf32>
        %137 = arith.subf %136, %127 : vector<8x128xf32>
        %cst_54 = arith.constant 0.000000e+00 : f32
        %138 = vector.broadcast %cst_54 : f32 to vector<8x128xf32>
        %139 = arith.select %134, %137, %138 : vector<8x128xi1>, vector<8x128xf32>
        %140 = arith.cmpf one, %103, %99 : vector<8x128xf32>
        %141 = arith.cmpf one, %103, %97 : vector<8x128xf32>
        %142 = arith.andi %140, %141 : vector<8x128xi1>
        %cst_55 = arith.constant 4.000000e+00 : f32
        %143 = vector.broadcast %cst_55 : f32 to vector<8x128xf32>
        %144 = arith.addf %143, %125 : vector<8x128xf32>
        %145 = arith.subf %144, %123 : vector<8x128xf32>
        %cst_56 = arith.constant 0.000000e+00 : f32
        %146 = vector.broadcast %cst_56 : f32 to vector<8x128xf32>
        %147 = arith.select %142, %145, %146 : vector<8x128xi1>, vector<8x128xf32>
        %148 = arith.addf %131, %139 : vector<8x128xf32>
        %149 = arith.addf %148, %147 : vector<8x128xf32>
        %cst_57 = arith.constant 0.166666672 : f32
        %150 = vector.broadcast %cst_57 : f32 to vector<8x128xf32>
        %151 = arith.mulf %149, %150 : vector<8x128xf32>
        %cst_58 = arith.constant 1.000000e+00 : f32
        %152 = vector.broadcast %cst_58 : f32 to vector<8x128xf32>
        %153 = arith.addf %151, %152 : vector<8x128xf32>
        %154 = vector.broadcast %33 : f32 to vector<8x128xf32>
        %155 = arith.addf %153, %154 : vector<8x128xf32>
        %156 = math.floor %155 : vector<8x128xf32>
        %157 = arith.subf %155, %156 : vector<8x128xf32>
        %cst_59 = arith.constant 6.000000e+00 : f32
        %158 = vector.broadcast %cst_59 : f32 to vector<8x128xf32>
        %159 = arith.mulf %157, %158 : vector<8x128xf32>
        %160 = math.floor %159 : vector<8x128xf32>
        %161 = arith.subf %159, %160 : vector<8x128xf32>
        %cst_60 = arith.constant 1.000000e+00 : f32
        %162 = vector.broadcast %cst_60 : f32 to vector<8x128xf32>
        %163 = arith.subf %162, %115 : vector<8x128xf32>
        %164 = arith.mulf %103, %163 : vector<8x128xf32>
        %165 = arith.mulf %115, %161 : vector<8x128xf32>
        %cst_61 = arith.constant 1.000000e+00 : f32
        %166 = vector.broadcast %cst_61 : f32 to vector<8x128xf32>
        %167 = arith.subf %166, %165 : vector<8x128xf32>
        %168 = arith.mulf %103, %167 : vector<8x128xf32>
        %cst_62 = arith.constant 1.000000e+00 : f32
        %169 = vector.broadcast %cst_62 : f32 to vector<8x128xf32>
        %170 = arith.subf %169, %161 : vector<8x128xf32>
        %171 = arith.mulf %115, %170 : vector<8x128xf32>
        %cst_63 = arith.constant 1.000000e+00 : f32
        %172 = vector.broadcast %cst_63 : f32 to vector<8x128xf32>
        %173 = arith.subf %172, %171 : vector<8x128xf32>
        %174 = arith.mulf %103, %173 : vector<8x128xf32>
        %cst_64 = arith.constant 0.000000e+00 : f32
        %175 = vector.broadcast %cst_64 : f32 to vector<8x128xf32>
        %176 = arith.cmpf oeq, %160, %175 : vector<8x128xf32>
        %cst_65 = arith.constant 1.000000e+00 : f32
        %177 = vector.broadcast %cst_65 : f32 to vector<8x128xf32>
        %178 = arith.cmpf oeq, %160, %177 : vector<8x128xf32>
        %cst_66 = arith.constant 2.000000e+00 : f32
        %179 = vector.broadcast %cst_66 : f32 to vector<8x128xf32>
        %180 = arith.cmpf oeq, %160, %179 : vector<8x128xf32>
        %cst_67 = arith.constant 3.000000e+00 : f32
        %181 = vector.broadcast %cst_67 : f32 to vector<8x128xf32>
        %182 = arith.cmpf oeq, %160, %181 : vector<8x128xf32>
        %cst_68 = arith.constant 4.000000e+00 : f32
        %183 = vector.broadcast %cst_68 : f32 to vector<8x128xf32>
        %184 = arith.cmpf oeq, %160, %183 : vector<8x128xf32>
        %185 = arith.select %184, %174, %103 : vector<8x128xi1>, vector<8x128xf32>
        %186 = arith.select %182, %164, %185 : vector<8x128xi1>, vector<8x128xf32>
        %187 = arith.select %180, %164, %186 : vector<8x128xi1>, vector<8x128xf32>
        %188 = arith.select %178, %168, %187 : vector<8x128xi1>, vector<8x128xf32>
        %189 = arith.select %176, %103, %188 : vector<8x128xi1>, vector<8x128xf32>
        %cst_69 = arith.constant 0.000000e+00 : f32
        %cst_70 = arith.constant 1.000000e+00 : f32
        %190 = vector.broadcast %cst_69 : f32 to vector<8x128xf32>
        %191 = arith.maximumf %190, %189 : vector<8x128xf32>
        %192 = vector.broadcast %cst_70 : f32 to vector<8x128xf32>
        %193 = arith.minimumf %192, %191 : vector<8x128xf32>
        %194 = arith.select %184, %164, %164 : vector<8x128xi1>, vector<8x128xf32>
        %195 = arith.select %182, %168, %194 : vector<8x128xi1>, vector<8x128xf32>
        %196 = arith.select %180, %103, %195 : vector<8x128xi1>, vector<8x128xf32>
        %197 = arith.select %178, %103, %196 : vector<8x128xi1>, vector<8x128xf32>
        %198 = arith.select %176, %174, %197 : vector<8x128xi1>, vector<8x128xf32>
        %cst_71 = arith.constant 0.000000e+00 : f32
        %cst_72 = arith.constant 1.000000e+00 : f32
        %199 = vector.broadcast %cst_71 : f32 to vector<8x128xf32>
        %200 = arith.maximumf %199, %198 : vector<8x128xf32>
        %201 = vector.broadcast %cst_72 : f32 to vector<8x128xf32>
        %202 = arith.minimumf %201, %200 : vector<8x128xf32>
        %203 = arith.select %184, %103, %168 : vector<8x128xi1>, vector<8x128xf32>
        %204 = arith.select %182, %103, %203 : vector<8x128xi1>, vector<8x128xf32>
        %205 = arith.select %180, %174, %204 : vector<8x128xi1>, vector<8x128xf32>
        %206 = arith.select %178, %164, %205 : vector<8x128xi1>, vector<8x128xf32>
        %207 = arith.select %176, %164, %206 : vector<8x128xi1>, vector<8x128xf32>
        %cst_73 = arith.constant 0.000000e+00 : f32
        %cst_74 = arith.constant 1.000000e+00 : f32
        %208 = vector.broadcast %cst_73 : f32 to vector<8x128xf32>
        %209 = arith.maximumf %208, %207 : vector<8x128xf32>
        %210 = vector.broadcast %cst_74 : f32 to vector<8x128xf32>
        %211 = arith.minimumf %210, %209 : vector<8x128xf32>
        %c1_75 = arith.constant 1 : index
        %c0_76 = arith.constant 0 : index
        %c0_77 = arith.constant 0 : index
        %c0_78 = arith.constant 0 : index
        %212 = vector.load %arg5[%c1_75, %c0_76, %c0_77, %c0_78] : memref<2x3x8x128xf32, #tpu.memory_space<vmem>>, vector<1x1x8x128xf32>
        %213 = vector.shape_cast %212 : vector<1x1x8x128xf32> to vector<8x128xf32>
        %214 = vector.shape_cast %193 : vector<8x128xf32> to vector<1x1x8x128xf32>
        tpu.vector_store %arg5[%c1_75, %c0_76, %c0_77, %c0_78], %214 {strides = array<i32>} : memref<2x3x8x128xf32, #tpu.memory_space<vmem>>, vector<1x1x8x128xf32>,
        %c1_79 = arith.constant 1 : index
        %c1_80 = arith.constant 1 : index
        %c0_81 = arith.constant 0 : index
        %c0_82 = arith.constant 0 : index
        %215 = vector.load %arg5[%c1_79, %c1_80, %c0_81, %c0_82] : memref<2x3x8x128xf32, #tpu.memory_space<vmem>>, vector<1x1x8x128xf32>
        %216 = vector.shape_cast %215 : vector<1x1x8x128xf32> to vector<8x128xf32>
        %217 = vector.shape_cast %202 : vector<8x128xf32> to vector<1x1x8x128xf32>
        tpu.vector_store %arg5[%c1_79, %c1_80, %c0_81, %c0_82], %217 {strides = array<i32>} : memref<2x3x8x128xf32, #tpu.memory_space<vmem>>, vector<1x1x8x128xf32>,
        %c1_83 = arith.constant 1 : index
        %c2 = arith.constant 2 : index
        %c0_84 = arith.constant 0 : index
        %c0_85 = arith.constant 0 : index
        %218 = vector.load %arg5[%c1_83, %c2, %c0_84, %c0_85] : memref<2x3x8x128xf32, #tpu.memory_space<vmem>>, vector<1x1x8x128xf32>
        %219 = vector.shape_cast %218 : vector<1x1x8x128xf32> to vector<8x128xf32>
        %220 = vector.shape_cast %211 : vector<8x128xf32> to vector<1x1x8x128xf32>
        tpu.vector_store %arg5[%c1_83, %c2, %c0_84, %c0_85], %220 {strides = array<i32>} : memref<2x3x8x128xf32, #tpu.memory_space<vmem>>, vector<1x1x8x128xf32>,
      } else {
      }
      %c1_i32_21 = arith.constant 1 : i32
      %49 = arith.addi %13, %c1_i32_21 : i32
      %50 = arith.index_cast %49 : i32 to index
      %51 = memref.load %arg3[%50] : memref<16xi32, #tpu.memory_space<smem>>
      %c0_i32_22 = arith.constant 0 : i32
      %52 = arith.cmpi eq, %51, %c0_i32_22 : i32
      %53 = arith.extui %52 : i1 to i32
      %c0_i32_23 = arith.constant 0 : i32
      %54 = arith.cmpi ne, %53, %c0_i32_23 : i32
      scf.if %54 {
        %c1 = arith.constant 1 : index
        %c0 = arith.constant 0 : index
        %c0_48 = arith.constant 0 : index
        %c0_49 = arith.constant 0 : index
        %94 = vector.load %arg5[%c1, %c0, %c0_48, %c0_49] : memref<2x3x8x128xf32, #tpu.memory_space<vmem>>, vector<1x3x8x128xf32>
        %95 = vector.shape_cast %94 : vector<1x3x8x128xf32> to vector<3x8x128xf32>
        %96 = vector.broadcast %24 : f32 to vector<3x8x128xf32>
        %97 = arith.mulf %95, %96 : vector<3x8x128xf32>
        %cst = arith.constant 0.000000e+00 : f32
        %cst_50 = arith.constant 1.000000e+00 : f32
        %98 = vector.broadcast %cst : f32 to vector<3x8x128xf32>
        %99 = arith.maximumf %98, %97 : vector<3x8x128xf32>
        %100 = vector.broadcast %cst_50 : f32 to vector<3x8x128xf32>
        %101 = arith.minimumf %100, %99 : vector<3x8x128xf32>
        %c1_51 = arith.constant 1 : index
        %c0_52 = arith.constant 0 : index
        %c0_53 = arith.constant 0 : index
        %c0_54 = arith.constant 0 : index
        %102 = vector.load %arg5[%c1_51, %c0_52, %c0_53, %c0_54] : memref<2x3x8x128xf32, #tpu.memory_space<vmem>>, vector<1x3x8x128xf32>
        %103 = vector.shape_cast %102 : vector<1x3x8x128xf32> to vector<3x8x128xf32>
        %104 = vector.shape_cast %101 : vector<3x8x128xf32> to vector<1x3x8x128xf32>
        tpu.vector_store %arg5[%c1_51, %c0_52, %c0_53, %c0_54], %104 {strides = array<i32>} : memref<2x3x8x128xf32, #tpu.memory_space<vmem>>, vector<1x3x8x128xf32>,
      } else {
      }
      %c1_i32_24 = arith.constant 1 : i32
      %55 = arith.cmpi eq, %51, %c1_i32_24 : i32
      %56 = arith.extui %55 : i1 to i32
      %c0_i32_25 = arith.constant 0 : i32
      %57 = arith.cmpi ne, %56, %c0_i32_25 : i32
      scf.if %57 {
        %c1 = arith.constant 1 : index
        %c0 = arith.constant 0 : index
        %c0_48 = arith.constant 0 : index
        %c0_49 = arith.constant 0 : index
        %94 = vector.load %arg5[%c1, %c0, %c0_48, %c0_49] : memref<2x3x8x128xf32, #tpu.memory_space<vmem>>, vector<1x3x8x128xf32>
        %95 = vector.shape_cast %94 : vector<1x3x8x128xf32> to vector<3x8x128xf32>
        %96 = vector.extract_strided_slice %95 {offsets = [0, 0, 0], sizes = [1, 8, 128], strides = [1, 1, 1]} : vector<3x8x128xf32> to vector<1x8x128xf32>
        %97 = vector.shape_cast %96 : vector<1x8x128xf32> to vector<8x128xf32>
        %cst = arith.constant 2.989000e-01 : f32
        %98 = vector.broadcast %cst : f32 to vector<8x128xf32>
        %99 = arith.mulf %98, %97 : vector<8x128xf32>
        %100 = vector.extract_strided_slice %95 {offsets = [1, 0, 0], sizes = [1, 8, 128], strides = [1, 1, 1]} : vector<3x8x128xf32> to vector<1x8x128xf32>
        %101 = vector.shape_cast %100 : vector<1x8x128xf32> to vector<8x128xf32>
        %cst_50 = arith.constant 5.870000e-01 : f32
        %102 = vector.broadcast %cst_50 : f32 to vector<8x128xf32>
        %103 = arith.mulf %102, %101 : vector<8x128xf32>
        %104 = arith.addf %99, %103 : vector<8x128xf32>
        %105 = vector.extract_strided_slice %95 {offsets = [2, 0, 0], sizes = [1, 8, 128], strides = [1, 1, 1]} : vector<3x8x128xf32> to vector<1x8x128xf32>
        %106 = vector.shape_cast %105 : vector<1x8x128xf32> to vector<8x128xf32>
        %cst_51 = arith.constant 1.140000e-01 : f32
        %107 = vector.broadcast %cst_51 : f32 to vector<8x128xf32>
        %108 = arith.mulf %107, %106 : vector<8x128xf32>
        %109 = arith.addf %104, %108 : vector<8x128xf32>
        %110 = vector.shape_cast %109 : vector<8x128xf32> to vector<1x8x128xf32>
        %cst_52 = arith.constant dense<0.000000e+00> : vector<1xf32>
        %111 = vector.multi_reduction <add>, %110, %cst_52 [1, 2] : vector<1x8x128xf32> to vector<1xf32>
        %112 = vector.shape_cast %111 : vector<1xf32> to vector<1x1x1xf32>
        %113 = vector.extract %112[0, 0, 0] : f32 from vector<1x1x1xf32>
        %cst_53 = arith.constant 3.906250e-03 : f32
        %114 = arith.mulf %113, %cst_53 : f32
        %115 = vector.broadcast %27 : f32 to vector<3x8x128xf32>
        %116 = arith.mulf %115, %95 : vector<3x8x128xf32>
        %cst_54 = arith.constant 1.000000e+00 : f32
        %117 = arith.subf %cst_54, %27 : f32
        %118 = arith.mulf %117, %114 : f32
        %119 = vector.broadcast %118 : f32 to vector<3x8x128xf32>
        %120 = arith.addf %116, %119 : vector<3x8x128xf32>
        %cst_55 = arith.constant 0.000000e+00 : f32
        %cst_56 = arith.constant 1.000000e+00 : f32
        %121 = vector.broadcast %cst_55 : f32 to vector<3x8x128xf32>
        %122 = arith.maximumf %121, %120 : vector<3x8x128xf32>
        %123 = vector.broadcast %cst_56 : f32 to vector<3x8x128xf32>
        %124 = arith.minimumf %123, %122 : vector<3x8x128xf32>
        %c1_57 = arith.constant 1 : index
        %c0_58 = arith.constant 0 : index
        %c0_59 = arith.constant 0 : index
        %c0_60 = arith.constant 0 : index
        %125 = vector.load %arg5[%c1_57, %c0_58, %c0_59, %c0_60] : memref<2x3x8x128xf32, #tpu.memory_space<vmem>>, vector<1x3x8x128xf32>
        %126 = vector.shape_cast %125 : vector<1x3x8x128xf32> to vector<3x8x128xf32>
        %127 = vector.shape_cast %124 : vector<3x8x128xf32> to vector<1x3x8x128xf32>
        tpu.vector_store %arg5[%c1_57, %c0_58, %c0_59, %c0_60], %127 {strides = array<i32>} : memref<2x3x8x128xf32, #tpu.memory_space<vmem>>, vector<1x3x8x128xf32>,
      } else {
      }
      %c2_i32_26 = arith.constant 2 : i32
      %58 = arith.cmpi eq, %51, %c2_i32_26 : i32
      %59 = arith.extui %58 : i1 to i32
      %c0_i32_27 = arith.constant 0 : i32
      %60 = arith.cmpi ne, %59, %c0_i32_27 : i32
      scf.if %60 {
        %c1 = arith.constant 1 : index
        %c0 = arith.constant 0 : index
        %c0_48 = arith.constant 0 : index
        %c0_49 = arith.constant 0 : index
        %94 = vector.load %arg5[%c1, %c0, %c0_48, %c0_49] : memref<2x3x8x128xf32, #tpu.memory_space<vmem>>, vector<1x3x8x128xf32>
        %95 = vector.shape_cast %94 : vector<1x3x8x128xf32> to vector<3x8x128xf32>
        %96 = vector.extract_strided_slice %95 {offsets = [0, 0, 0], sizes = [1, 8, 128], strides = [1, 1, 1]} : vector<3x8x128xf32> to vector<1x8x128xf32>
        %97 = vector.shape_cast %96 : vector<1x8x128xf32> to vector<8x128xf32>
        %cst = arith.constant 2.989000e-01 : f32
        %98 = vector.broadcast %cst : f32 to vector<8x128xf32>
        %99 = arith.mulf %98, %97 : vector<8x128xf32>
        %100 = vector.extract_strided_slice %95 {offsets = [1, 0, 0], sizes = [1, 8, 128], strides = [1, 1, 1]} : vector<3x8x128xf32> to vector<1x8x128xf32>
        %101 = vector.shape_cast %100 : vector<1x8x128xf32> to vector<8x128xf32>
        %cst_50 = arith.constant 5.870000e-01 : f32
        %102 = vector.broadcast %cst_50 : f32 to vector<8x128xf32>
        %103 = arith.mulf %102, %101 : vector<8x128xf32>
        %104 = arith.addf %99, %103 : vector<8x128xf32>
        %105 = vector.extract_strided_slice %95 {offsets = [2, 0, 0], sizes = [1, 8, 128], strides = [1, 1, 1]} : vector<3x8x128xf32> to vector<1x8x128xf32>
        %106 = vector.shape_cast %105 : vector<1x8x128xf32> to vector<8x128xf32>
        %cst_51 = arith.constant 1.140000e-01 : f32
        %107 = vector.broadcast %cst_51 : f32 to vector<8x128xf32>
        %108 = arith.mulf %107, %106 : vector<8x128xf32>
        %109 = arith.addf %104, %108 : vector<8x128xf32>
        %110 = vector.broadcast %30 : f32 to vector<3x8x128xf32>
        %111 = arith.mulf %110, %95 : vector<3x8x128xf32>
        %cst_52 = arith.constant 1.000000e+00 : f32
        %112 = arith.subf %cst_52, %30 : f32
        %113 = vector.shape_cast %109 : vector<8x128xf32> to vector<1x8x128xf32>
        %114 = vector.broadcast %112 : f32 to vector<1x8x128xf32>
        %115 = arith.mulf %114, %113 : vector<1x8x128xf32>
        %116 = vector.broadcast %115 : vector<1x8x128xf32> to vector<3x8x128xf32>
        %117 = arith.addf %111, %116 : vector<3x8x128xf32>
        %cst_53 = arith.constant 0.000000e+00 : f32
        %cst_54 = arith.constant 1.000000e+00 : f32
        %118 = vector.broadcast %cst_53 : f32 to vector<3x8x128xf32>
        %119 = arith.maximumf %118, %117 : vector<3x8x128xf32>
        %120 = vector.broadcast %cst_54 : f32 to vector<3x8x128xf32>
        %121 = arith.minimumf %120, %119 : vector<3x8x128xf32>
        %c1_55 = arith.constant 1 : index
        %c0_56 = arith.constant 0 : index
        %c0_57 = arith.constant 0 : index
        %c0_58 = arith.constant 0 : index
        %122 = vector.load %arg5[%c1_55, %c0_56, %c0_57, %c0_58] : memref<2x3x8x128xf32, #tpu.memory_space<vmem>>, vector<1x3x8x128xf32>
        %123 = vector.shape_cast %122 : vector<1x3x8x128xf32> to vector<3x8x128xf32>
        %124 = vector.shape_cast %121 : vector<3x8x128xf32> to vector<1x3x8x128xf32>
        tpu.vector_store %arg5[%c1_55, %c0_56, %c0_57, %c0_58], %124 {strides = array<i32>} : memref<2x3x8x128xf32, #tpu.memory_space<vmem>>, vector<1x3x8x128xf32>,
      } else {
      }
      %c3_i32_28 = arith.constant 3 : i32
      %61 = arith.cmpi eq, %51, %c3_i32_28 : i32
      %62 = arith.extui %61 : i1 to i32
      %c0_i32_29 = arith.constant 0 : i32
      %63 = arith.cmpi ne, %62, %c0_i32_29 : i32
      scf.if %63 {
        %c1 = arith.constant 1 : index
        %c0 = arith.constant 0 : index
        %c0_48 = arith.constant 0 : index
        %c0_49 = arith.constant 0 : index
        %94 = vector.load %arg5[%c1, %c0, %c0_48, %c0_49] : memref<2x3x8x128xf32, #tpu.memory_space<vmem>>, vector<1x3x8x128xf32>
        %95 = vector.shape_cast %94 : vector<1x3x8x128xf32> to vector<3x8x128xf32>
        %96 = vector.extract_strided_slice %95 {offsets = [0, 0, 0], sizes = [1, 8, 128], strides = [1, 1, 1]} : vector<3x8x128xf32> to vector<1x8x128xf32>
        %97 = vector.shape_cast %96 : vector<1x8x128xf32> to vector<8x128xf32>
        %98 = vector.extract_strided_slice %95 {offsets = [1, 0, 0], sizes = [1, 8, 128], strides = [1, 1, 1]} : vector<3x8x128xf32> to vector<1x8x128xf32>
        %99 = vector.shape_cast %98 : vector<1x8x128xf32> to vector<8x128xf32>
        %100 = vector.extract_strided_slice %95 {offsets = [2, 0, 0], sizes = [1, 8, 128], strides = [1, 1, 1]} : vector<3x8x128xf32> to vector<1x8x128xf32>
        %101 = vector.shape_cast %100 : vector<1x8x128xf32> to vector<8x128xf32>
        %102 = arith.maximumf %97, %99 : vector<8x128xf32>
        %103 = arith.maximumf %102, %101 : vector<8x128xf32>
        %104 = arith.minimumf %97, %99 : vector<8x128xf32>
        %105 = arith.minimumf %104, %101 : vector<8x128xf32>
        %106 = arith.cmpf oeq, %103, %105 : vector<8x128xf32>
        %107 = arith.subf %103, %105 : vector<8x128xf32>
        %cst = arith.constant 1.000000e+00 : f32
        %108 = vector.broadcast %cst : f32 to vector<8x128xf32>
        %109 = arith.select %106, %108, %103 : vector<8x128xi1>, vector<8x128xf32>
        %110 = tpu.reciprocal %109 {approx = true} : vector<8x128xf32> -> vector<8x128xf32>
        %111 = arith.mulf %109, %110 : vector<8x128xf32>
        %cst_50 = arith.constant 2.000000e+00 : f32
        %112 = vector.broadcast %cst_50 : f32 to vector<8x128xf32>
        %113 = arith.subf %112, %111 : vector<8x128xf32>
        %114 = arith.mulf %110, %113 : vector<8x128xf32>
        %115 = arith.mulf %107, %114 : vector<8x128xf32>
        %116 = arith.select %106, %108, %107 : vector<8x128xi1>, vector<8x128xf32>
        %117 = tpu.reciprocal %116 {approx = true} : vector<8x128xf32> -> vector<8x128xf32>
        %118 = arith.mulf %116, %117 : vector<8x128xf32>
        %cst_51 = arith.constant 2.000000e+00 : f32
        %119 = vector.broadcast %cst_51 : f32 to vector<8x128xf32>
        %120 = arith.subf %119, %118 : vector<8x128xf32>
        %121 = arith.mulf %117, %120 : vector<8x128xf32>
        %122 = arith.subf %103, %97 : vector<8x128xf32>
        %123 = arith.mulf %122, %121 : vector<8x128xf32>
        %124 = arith.subf %103, %99 : vector<8x128xf32>
        %125 = arith.mulf %124, %121 : vector<8x128xf32>
        %126 = arith.subf %103, %101 : vector<8x128xf32>
        %127 = arith.mulf %126, %121 : vector<8x128xf32>
        %128 = arith.cmpf oeq, %103, %97 : vector<8x128xf32>
        %129 = arith.subf %127, %125 : vector<8x128xf32>
        %cst_52 = arith.constant 0.000000e+00 : f32
        %130 = vector.broadcast %cst_52 : f32 to vector<8x128xf32>
        %131 = arith.select %128, %129, %130 : vector<8x128xi1>, vector<8x128xf32>
        %132 = arith.cmpf oeq, %103, %99 : vector<8x128xf32>
        %133 = arith.cmpf one, %103, %97 : vector<8x128xf32>
        %134 = arith.andi %132, %133 : vector<8x128xi1>
        %cst_53 = arith.constant 2.000000e+00 : f32
        %135 = vector.broadcast %cst_53 : f32 to vector<8x128xf32>
        %136 = arith.addf %135, %123 : vector<8x128xf32>
        %137 = arith.subf %136, %127 : vector<8x128xf32>
        %cst_54 = arith.constant 0.000000e+00 : f32
        %138 = vector.broadcast %cst_54 : f32 to vector<8x128xf32>
        %139 = arith.select %134, %137, %138 : vector<8x128xi1>, vector<8x128xf32>
        %140 = arith.cmpf one, %103, %99 : vector<8x128xf32>
        %141 = arith.cmpf one, %103, %97 : vector<8x128xf32>
        %142 = arith.andi %140, %141 : vector<8x128xi1>
        %cst_55 = arith.constant 4.000000e+00 : f32
        %143 = vector.broadcast %cst_55 : f32 to vector<8x128xf32>
        %144 = arith.addf %143, %125 : vector<8x128xf32>
        %145 = arith.subf %144, %123 : vector<8x128xf32>
        %cst_56 = arith.constant 0.000000e+00 : f32
        %146 = vector.broadcast %cst_56 : f32 to vector<8x128xf32>
        %147 = arith.select %142, %145, %146 : vector<8x128xi1>, vector<8x128xf32>
        %148 = arith.addf %131, %139 : vector<8x128xf32>
        %149 = arith.addf %148, %147 : vector<8x128xf32>
        %cst_57 = arith.constant 0.166666672 : f32
        %150 = vector.broadcast %cst_57 : f32 to vector<8x128xf32>
        %151 = arith.mulf %149, %150 : vector<8x128xf32>
        %cst_58 = arith.constant 1.000000e+00 : f32
        %152 = vector.broadcast %cst_58 : f32 to vector<8x128xf32>
        %153 = arith.addf %151, %152 : vector<8x128xf32>
        %154 = vector.broadcast %33 : f32 to vector<8x128xf32>
        %155 = arith.addf %153, %154 : vector<8x128xf32>
        %156 = math.floor %155 : vector<8x128xf32>
        %157 = arith.subf %155, %156 : vector<8x128xf32>
        %cst_59 = arith.constant 6.000000e+00 : f32
        %158 = vector.broadcast %cst_59 : f32 to vector<8x128xf32>
        %159 = arith.mulf %157, %158 : vector<8x128xf32>
        %160 = math.floor %159 : vector<8x128xf32>
        %161 = arith.subf %159, %160 : vector<8x128xf32>
        %cst_60 = arith.constant 1.000000e+00 : f32
        %162 = vector.broadcast %cst_60 : f32 to vector<8x128xf32>
        %163 = arith.subf %162, %115 : vector<8x128xf32>
        %164 = arith.mulf %103, %163 : vector<8x128xf32>
        %165 = arith.mulf %115, %161 : vector<8x128xf32>
        %cst_61 = arith.constant 1.000000e+00 : f32
        %166 = vector.broadcast %cst_61 : f32 to vector<8x128xf32>
        %167 = arith.subf %166, %165 : vector<8x128xf32>
        %168 = arith.mulf %103, %167 : vector<8x128xf32>
        %cst_62 = arith.constant 1.000000e+00 : f32
        %169 = vector.broadcast %cst_62 : f32 to vector<8x128xf32>
        %170 = arith.subf %169, %161 : vector<8x128xf32>
        %171 = arith.mulf %115, %170 : vector<8x128xf32>
        %cst_63 = arith.constant 1.000000e+00 : f32
        %172 = vector.broadcast %cst_63 : f32 to vector<8x128xf32>
        %173 = arith.subf %172, %171 : vector<8x128xf32>
        %174 = arith.mulf %103, %173 : vector<8x128xf32>
        %cst_64 = arith.constant 0.000000e+00 : f32
        %175 = vector.broadcast %cst_64 : f32 to vector<8x128xf32>
        %176 = arith.cmpf oeq, %160, %175 : vector<8x128xf32>
        %cst_65 = arith.constant 1.000000e+00 : f32
        %177 = vector.broadcast %cst_65 : f32 to vector<8x128xf32>
        %178 = arith.cmpf oeq, %160, %177 : vector<8x128xf32>
        %cst_66 = arith.constant 2.000000e+00 : f32
        %179 = vector.broadcast %cst_66 : f32 to vector<8x128xf32>
        %180 = arith.cmpf oeq, %160, %179 : vector<8x128xf32>
        %cst_67 = arith.constant 3.000000e+00 : f32
        %181 = vector.broadcast %cst_67 : f32 to vector<8x128xf32>
        %182 = arith.cmpf oeq, %160, %181 : vector<8x128xf32>
        %cst_68 = arith.constant 4.000000e+00 : f32
        %183 = vector.broadcast %cst_68 : f32 to vector<8x128xf32>
        %184 = arith.cmpf oeq, %160, %183 : vector<8x128xf32>
        %185 = arith.select %184, %174, %103 : vector<8x128xi1>, vector<8x128xf32>
        %186 = arith.select %182, %164, %185 : vector<8x128xi1>, vector<8x128xf32>
        %187 = arith.select %180, %164, %186 : vector<8x128xi1>, vector<8x128xf32>
        %188 = arith.select %178, %168, %187 : vector<8x128xi1>, vector<8x128xf32>
        %189 = arith.select %176, %103, %188 : vector<8x128xi1>, vector<8x128xf32>
        %cst_69 = arith.constant 0.000000e+00 : f32
        %cst_70 = arith.constant 1.000000e+00 : f32
        %190 = vector.broadcast %cst_69 : f32 to vector<8x128xf32>
        %191 = arith.maximumf %190, %189 : vector<8x128xf32>
        %192 = vector.broadcast %cst_70 : f32 to vector<8x128xf32>
        %193 = arith.minimumf %192, %191 : vector<8x128xf32>
        %194 = arith.select %184, %164, %164 : vector<8x128xi1>, vector<8x128xf32>
        %195 = arith.select %182, %168, %194 : vector<8x128xi1>, vector<8x128xf32>
        %196 = arith.select %180, %103, %195 : vector<8x128xi1>, vector<8x128xf32>
        %197 = arith.select %178, %103, %196 : vector<8x128xi1>, vector<8x128xf32>
        %198 = arith.select %176, %174, %197 : vector<8x128xi1>, vector<8x128xf32>
        %cst_71 = arith.constant 0.000000e+00 : f32
        %cst_72 = arith.constant 1.000000e+00 : f32
        %199 = vector.broadcast %cst_71 : f32 to vector<8x128xf32>
        %200 = arith.maximumf %199, %198 : vector<8x128xf32>
        %201 = vector.broadcast %cst_72 : f32 to vector<8x128xf32>
        %202 = arith.minimumf %201, %200 : vector<8x128xf32>
        %203 = arith.select %184, %103, %168 : vector<8x128xi1>, vector<8x128xf32>
        %204 = arith.select %182, %103, %203 : vector<8x128xi1>, vector<8x128xf32>
        %205 = arith.select %180, %174, %204 : vector<8x128xi1>, vector<8x128xf32>
        %206 = arith.select %178, %164, %205 : vector<8x128xi1>, vector<8x128xf32>
        %207 = arith.select %176, %164, %206 : vector<8x128xi1>, vector<8x128xf32>
        %cst_73 = arith.constant 0.000000e+00 : f32
        %cst_74 = arith.constant 1.000000e+00 : f32
        %208 = vector.broadcast %cst_73 : f32 to vector<8x128xf32>
        %209 = arith.maximumf %208, %207 : vector<8x128xf32>
        %210 = vector.broadcast %cst_74 : f32 to vector<8x128xf32>
        %211 = arith.minimumf %210, %209 : vector<8x128xf32>
        %c1_75 = arith.constant 1 : index
        %c0_76 = arith.constant 0 : index
        %c0_77 = arith.constant 0 : index
        %c0_78 = arith.constant 0 : index
        %212 = vector.load %arg5[%c1_75, %c0_76, %c0_77, %c0_78] : memref<2x3x8x128xf32, #tpu.memory_space<vmem>>, vector<1x1x8x128xf32>
        %213 = vector.shape_cast %212 : vector<1x1x8x128xf32> to vector<8x128xf32>
        %214 = vector.shape_cast %193 : vector<8x128xf32> to vector<1x1x8x128xf32>
        tpu.vector_store %arg5[%c1_75, %c0_76, %c0_77, %c0_78], %214 {strides = array<i32>} : memref<2x3x8x128xf32, #tpu.memory_space<vmem>>, vector<1x1x8x128xf32>,
        %c1_79 = arith.constant 1 : index
        %c1_80 = arith.constant 1 : index
        %c0_81 = arith.constant 0 : index
        %c0_82 = arith.constant 0 : index
        %215 = vector.load %arg5[%c1_79, %c1_80, %c0_81, %c0_82] : memref<2x3x8x128xf32, #tpu.memory_space<vmem>>, vector<1x1x8x128xf32>
        %216 = vector.shape_cast %215 : vector<1x1x8x128xf32> to vector<8x128xf32>
        %217 = vector.shape_cast %202 : vector<8x128xf32> to vector<1x1x8x128xf32>
        tpu.vector_store %arg5[%c1_79, %c1_80, %c0_81, %c0_82], %217 {strides = array<i32>} : memref<2x3x8x128xf32, #tpu.memory_space<vmem>>, vector<1x1x8x128xf32>,
        %c1_83 = arith.constant 1 : index
        %c2 = arith.constant 2 : index
        %c0_84 = arith.constant 0 : index
        %c0_85 = arith.constant 0 : index
        %218 = vector.load %arg5[%c1_83, %c2, %c0_84, %c0_85] : memref<2x3x8x128xf32, #tpu.memory_space<vmem>>, vector<1x1x8x128xf32>
        %219 = vector.shape_cast %218 : vector<1x1x8x128xf32> to vector<8x128xf32>
        %220 = vector.shape_cast %211 : vector<8x128xf32> to vector<1x1x8x128xf32>
        tpu.vector_store %arg5[%c1_83, %c2, %c0_84, %c0_85], %220 {strides = array<i32>} : memref<2x3x8x128xf32, #tpu.memory_space<vmem>>, vector<1x1x8x128xf32>,
      } else {
      }
      %c2_i32_30 = arith.constant 2 : i32
      %64 = arith.addi %13, %c2_i32_30 : i32
      %65 = arith.index_cast %64 : i32 to index
      %66 = memref.load %arg3[%65] : memref<16xi32, #tpu.memory_space<smem>>
      %c0_i32_31 = arith.constant 0 : i32
      %67 = arith.cmpi eq, %66, %c0_i32_31 : i32
      %68 = arith.extui %67 : i1 to i32
      %c0_i32_32 = arith.constant 0 : i32
      %69 = arith.cmpi ne, %68, %c0_i32_32 : i32
      scf.if %69 {
        %c1 = arith.constant 1 : index
        %c0 = arith.constant 0 : index
        %c0_48 = arith.constant 0 : index
        %c0_49 = arith.constant 0 : index
        %94 = vector.load %arg5[%c1, %c0, %c0_48, %c0_49] : memref<2x3x8x128xf32, #tpu.memory_space<vmem>>, vector<1x3x8x128xf32>
        %95 = vector.shape_cast %94 : vector<1x3x8x128xf32> to vector<3x8x128xf32>
        %96 = vector.broadcast %24 : f32 to vector<3x8x128xf32>
        %97 = arith.mulf %95, %96 : vector<3x8x128xf32>
        %cst = arith.constant 0.000000e+00 : f32
        %cst_50 = arith.constant 1.000000e+00 : f32
        %98 = vector.broadcast %cst : f32 to vector<3x8x128xf32>
        %99 = arith.maximumf %98, %97 : vector<3x8x128xf32>
        %100 = vector.broadcast %cst_50 : f32 to vector<3x8x128xf32>
        %101 = arith.minimumf %100, %99 : vector<3x8x128xf32>
        %c1_51 = arith.constant 1 : index
        %c0_52 = arith.constant 0 : index
        %c0_53 = arith.constant 0 : index
        %c0_54 = arith.constant 0 : index
        %102 = vector.load %arg5[%c1_51, %c0_52, %c0_53, %c0_54] : memref<2x3x8x128xf32, #tpu.memory_space<vmem>>, vector<1x3x8x128xf32>
        %103 = vector.shape_cast %102 : vector<1x3x8x128xf32> to vector<3x8x128xf32>
        %104 = vector.shape_cast %101 : vector<3x8x128xf32> to vector<1x3x8x128xf32>
        tpu.vector_store %arg5[%c1_51, %c0_52, %c0_53, %c0_54], %104 {strides = array<i32>} : memref<2x3x8x128xf32, #tpu.memory_space<vmem>>, vector<1x3x8x128xf32>,
      } else {
      }
      %c1_i32_33 = arith.constant 1 : i32
      %70 = arith.cmpi eq, %66, %c1_i32_33 : i32
      %71 = arith.extui %70 : i1 to i32
      %c0_i32_34 = arith.constant 0 : i32
      %72 = arith.cmpi ne, %71, %c0_i32_34 : i32
      scf.if %72 {
        %c1 = arith.constant 1 : index
        %c0 = arith.constant 0 : index
        %c0_48 = arith.constant 0 : index
        %c0_49 = arith.constant 0 : index
        %94 = vector.load %arg5[%c1, %c0, %c0_48, %c0_49] : memref<2x3x8x128xf32, #tpu.memory_space<vmem>>, vector<1x3x8x128xf32>
        %95 = vector.shape_cast %94 : vector<1x3x8x128xf32> to vector<3x8x128xf32>
        %96 = vector.extract_strided_slice %95 {offsets = [0, 0, 0], sizes = [1, 8, 128], strides = [1, 1, 1]} : vector<3x8x128xf32> to vector<1x8x128xf32>
        %97 = vector.shape_cast %96 : vector<1x8x128xf32> to vector<8x128xf32>
        %cst = arith.constant 2.989000e-01 : f32
        %98 = vector.broadcast %cst : f32 to vector<8x128xf32>
        %99 = arith.mulf %98, %97 : vector<8x128xf32>
        %100 = vector.extract_strided_slice %95 {offsets = [1, 0, 0], sizes = [1, 8, 128], strides = [1, 1, 1]} : vector<3x8x128xf32> to vector<1x8x128xf32>
        %101 = vector.shape_cast %100 : vector<1x8x128xf32> to vector<8x128xf32>
        %cst_50 = arith.constant 5.870000e-01 : f32
        %102 = vector.broadcast %cst_50 : f32 to vector<8x128xf32>
        %103 = arith.mulf %102, %101 : vector<8x128xf32>
        %104 = arith.addf %99, %103 : vector<8x128xf32>
        %105 = vector.extract_strided_slice %95 {offsets = [2, 0, 0], sizes = [1, 8, 128], strides = [1, 1, 1]} : vector<3x8x128xf32> to vector<1x8x128xf32>
        %106 = vector.shape_cast %105 : vector<1x8x128xf32> to vector<8x128xf32>
        %cst_51 = arith.constant 1.140000e-01 : f32
        %107 = vector.broadcast %cst_51 : f32 to vector<8x128xf32>
        %108 = arith.mulf %107, %106 : vector<8x128xf32>
        %109 = arith.addf %104, %108 : vector<8x128xf32>
        %110 = vector.shape_cast %109 : vector<8x128xf32> to vector<1x8x128xf32>
        %cst_52 = arith.constant dense<0.000000e+00> : vector<1xf32>
        %111 = vector.multi_reduction <add>, %110, %cst_52 [1, 2] : vector<1x8x128xf32> to vector<1xf32>
        %112 = vector.shape_cast %111 : vector<1xf32> to vector<1x1x1xf32>
        %113 = vector.extract %112[0, 0, 0] : f32 from vector<1x1x1xf32>
        %cst_53 = arith.constant 3.906250e-03 : f32
        %114 = arith.mulf %113, %cst_53 : f32
        %115 = vector.broadcast %27 : f32 to vector<3x8x128xf32>
        %116 = arith.mulf %115, %95 : vector<3x8x128xf32>
        %cst_54 = arith.constant 1.000000e+00 : f32
        %117 = arith.subf %cst_54, %27 : f32
        %118 = arith.mulf %117, %114 : f32
        %119 = vector.broadcast %118 : f32 to vector<3x8x128xf32>
        %120 = arith.addf %116, %119 : vector<3x8x128xf32>
        %cst_55 = arith.constant 0.000000e+00 : f32
        %cst_56 = arith.constant 1.000000e+00 : f32
        %121 = vector.broadcast %cst_55 : f32 to vector<3x8x128xf32>
        %122 = arith.maximumf %121, %120 : vector<3x8x128xf32>
        %123 = vector.broadcast %cst_56 : f32 to vector<3x8x128xf32>
        %124 = arith.minimumf %123, %122 : vector<3x8x128xf32>
        %c1_57 = arith.constant 1 : index
        %c0_58 = arith.constant 0 : index
        %c0_59 = arith.constant 0 : index
        %c0_60 = arith.constant 0 : index
        %125 = vector.load %arg5[%c1_57, %c0_58, %c0_59, %c0_60] : memref<2x3x8x128xf32, #tpu.memory_space<vmem>>, vector<1x3x8x128xf32>
        %126 = vector.shape_cast %125 : vector<1x3x8x128xf32> to vector<3x8x128xf32>
        %127 = vector.shape_cast %124 : vector<3x8x128xf32> to vector<1x3x8x128xf32>
        tpu.vector_store %arg5[%c1_57, %c0_58, %c0_59, %c0_60], %127 {strides = array<i32>} : memref<2x3x8x128xf32, #tpu.memory_space<vmem>>, vector<1x3x8x128xf32>,
      } else {
      }
      %c2_i32_35 = arith.constant 2 : i32
      %73 = arith.cmpi eq, %66, %c2_i32_35 : i32
      %74 = arith.extui %73 : i1 to i32
      %c0_i32_36 = arith.constant 0 : i32
      %75 = arith.cmpi ne, %74, %c0_i32_36 : i32
      scf.if %75 {
        %c1 = arith.constant 1 : index
        %c0 = arith.constant 0 : index
        %c0_48 = arith.constant 0 : index
        %c0_49 = arith.constant 0 : index
        %94 = vector.load %arg5[%c1, %c0, %c0_48, %c0_49] : memref<2x3x8x128xf32, #tpu.memory_space<vmem>>, vector<1x3x8x128xf32>
        %95 = vector.shape_cast %94 : vector<1x3x8x128xf32> to vector<3x8x128xf32>
        %96 = vector.extract_strided_slice %95 {offsets = [0, 0, 0], sizes = [1, 8, 128], strides = [1, 1, 1]} : vector<3x8x128xf32> to vector<1x8x128xf32>
        %97 = vector.shape_cast %96 : vector<1x8x128xf32> to vector<8x128xf32>
        %cst = arith.constant 2.989000e-01 : f32
        %98 = vector.broadcast %cst : f32 to vector<8x128xf32>
        %99 = arith.mulf %98, %97 : vector<8x128xf32>
        %100 = vector.extract_strided_slice %95 {offsets = [1, 0, 0], sizes = [1, 8, 128], strides = [1, 1, 1]} : vector<3x8x128xf32> to vector<1x8x128xf32>
        %101 = vector.shape_cast %100 : vector<1x8x128xf32> to vector<8x128xf32>
        %cst_50 = arith.constant 5.870000e-01 : f32
        %102 = vector.broadcast %cst_50 : f32 to vector<8x128xf32>
        %103 = arith.mulf %102, %101 : vector<8x128xf32>
        %104 = arith.addf %99, %103 : vector<8x128xf32>
        %105 = vector.extract_strided_slice %95 {offsets = [2, 0, 0], sizes = [1, 8, 128], strides = [1, 1, 1]} : vector<3x8x128xf32> to vector<1x8x128xf32>
        %106 = vector.shape_cast %105 : vector<1x8x128xf32> to vector<8x128xf32>
        %cst_51 = arith.constant 1.140000e-01 : f32
        %107 = vector.broadcast %cst_51 : f32 to vector<8x128xf32>
        %108 = arith.mulf %107, %106 : vector<8x128xf32>
        %109 = arith.addf %104, %108 : vector<8x128xf32>
        %110 = vector.broadcast %30 : f32 to vector<3x8x128xf32>
        %111 = arith.mulf %110, %95 : vector<3x8x128xf32>
        %cst_52 = arith.constant 1.000000e+00 : f32
        %112 = arith.subf %cst_52, %30 : f32
        %113 = vector.shape_cast %109 : vector<8x128xf32> to vector<1x8x128xf32>
        %114 = vector.broadcast %112 : f32 to vector<1x8x128xf32>
        %115 = arith.mulf %114, %113 : vector<1x8x128xf32>
        %116 = vector.broadcast %115 : vector<1x8x128xf32> to vector<3x8x128xf32>
        %117 = arith.addf %111, %116 : vector<3x8x128xf32>
        %cst_53 = arith.constant 0.000000e+00 : f32
        %cst_54 = arith.constant 1.000000e+00 : f32
        %118 = vector.broadcast %cst_53 : f32 to vector<3x8x128xf32>
        %119 = arith.maximumf %118, %117 : vector<3x8x128xf32>
        %120 = vector.broadcast %cst_54 : f32 to vector<3x8x128xf32>
        %121 = arith.minimumf %120, %119 : vector<3x8x128xf32>
        %c1_55 = arith.constant 1 : index
        %c0_56 = arith.constant 0 : index
        %c0_57 = arith.constant 0 : index
        %c0_58 = arith.constant 0 : index
        %122 = vector.load %arg5[%c1_55, %c0_56, %c0_57, %c0_58] : memref<2x3x8x128xf32, #tpu.memory_space<vmem>>, vector<1x3x8x128xf32>
        %123 = vector.shape_cast %122 : vector<1x3x8x128xf32> to vector<3x8x128xf32>
        %124 = vector.shape_cast %121 : vector<3x8x128xf32> to vector<1x3x8x128xf32>
        tpu.vector_store %arg5[%c1_55, %c0_56, %c0_57, %c0_58], %124 {strides = array<i32>} : memref<2x3x8x128xf32, #tpu.memory_space<vmem>>, vector<1x3x8x128xf32>,
      } else {
      }
      %c3_i32_37 = arith.constant 3 : i32
      %76 = arith.cmpi eq, %66, %c3_i32_37 : i32
      %77 = arith.extui %76 : i1 to i32
      %c0_i32_38 = arith.constant 0 : i32
      %78 = arith.cmpi ne, %77, %c0_i32_38 : i32
      scf.if %78 {
        %c1 = arith.constant 1 : index
        %c0 = arith.constant 0 : index
        %c0_48 = arith.constant 0 : index
        %c0_49 = arith.constant 0 : index
        %94 = vector.load %arg5[%c1, %c0, %c0_48, %c0_49] : memref<2x3x8x128xf32, #tpu.memory_space<vmem>>, vector<1x3x8x128xf32>
        %95 = vector.shape_cast %94 : vector<1x3x8x128xf32> to vector<3x8x128xf32>
        %96 = vector.extract_strided_slice %95 {offsets = [0, 0, 0], sizes = [1, 8, 128], strides = [1, 1, 1]} : vector<3x8x128xf32> to vector<1x8x128xf32>
        %97 = vector.shape_cast %96 : vector<1x8x128xf32> to vector<8x128xf32>
        %98 = vector.extract_strided_slice %95 {offsets = [1, 0, 0], sizes = [1, 8, 128], strides = [1, 1, 1]} : vector<3x8x128xf32> to vector<1x8x128xf32>
        %99 = vector.shape_cast %98 : vector<1x8x128xf32> to vector<8x128xf32>
        %100 = vector.extract_strided_slice %95 {offsets = [2, 0, 0], sizes = [1, 8, 128], strides = [1, 1, 1]} : vector<3x8x128xf32> to vector<1x8x128xf32>
        %101 = vector.shape_cast %100 : vector<1x8x128xf32> to vector<8x128xf32>
        %102 = arith.maximumf %97, %99 : vector<8x128xf32>
        %103 = arith.maximumf %102, %101 : vector<8x128xf32>
        %104 = arith.minimumf %97, %99 : vector<8x128xf32>
        %105 = arith.minimumf %104, %101 : vector<8x128xf32>
        %106 = arith.cmpf oeq, %103, %105 : vector<8x128xf32>
        %107 = arith.subf %103, %105 : vector<8x128xf32>
        %cst = arith.constant 1.000000e+00 : f32
        %108 = vector.broadcast %cst : f32 to vector<8x128xf32>
        %109 = arith.select %106, %108, %103 : vector<8x128xi1>, vector<8x128xf32>
        %110 = tpu.reciprocal %109 {approx = true} : vector<8x128xf32> -> vector<8x128xf32>
        %111 = arith.mulf %109, %110 : vector<8x128xf32>
        %cst_50 = arith.constant 2.000000e+00 : f32
        %112 = vector.broadcast %cst_50 : f32 to vector<8x128xf32>
        %113 = arith.subf %112, %111 : vector<8x128xf32>
        %114 = arith.mulf %110, %113 : vector<8x128xf32>
        %115 = arith.mulf %107, %114 : vector<8x128xf32>
        %116 = arith.select %106, %108, %107 : vector<8x128xi1>, vector<8x128xf32>
        %117 = tpu.reciprocal %116 {approx = true} : vector<8x128xf32> -> vector<8x128xf32>
        %118 = arith.mulf %116, %117 : vector<8x128xf32>
        %cst_51 = arith.constant 2.000000e+00 : f32
        %119 = vector.broadcast %cst_51 : f32 to vector<8x128xf32>
        %120 = arith.subf %119, %118 : vector<8x128xf32>
        %121 = arith.mulf %117, %120 : vector<8x128xf32>
        %122 = arith.subf %103, %97 : vector<8x128xf32>
        %123 = arith.mulf %122, %121 : vector<8x128xf32>
        %124 = arith.subf %103, %99 : vector<8x128xf32>
        %125 = arith.mulf %124, %121 : vector<8x128xf32>
        %126 = arith.subf %103, %101 : vector<8x128xf32>
        %127 = arith.mulf %126, %121 : vector<8x128xf32>
        %128 = arith.cmpf oeq, %103, %97 : vector<8x128xf32>
        %129 = arith.subf %127, %125 : vector<8x128xf32>
        %cst_52 = arith.constant 0.000000e+00 : f32
        %130 = vector.broadcast %cst_52 : f32 to vector<8x128xf32>
        %131 = arith.select %128, %129, %130 : vector<8x128xi1>, vector<8x128xf32>
        %132 = arith.cmpf oeq, %103, %99 : vector<8x128xf32>
        %133 = arith.cmpf one, %103, %97 : vector<8x128xf32>
        %134 = arith.andi %132, %133 : vector<8x128xi1>
        %cst_53 = arith.constant 2.000000e+00 : f32
        %135 = vector.broadcast %cst_53 : f32 to vector<8x128xf32>
        %136 = arith.addf %135, %123 : vector<8x128xf32>
        %137 = arith.subf %136, %127 : vector<8x128xf32>
        %cst_54 = arith.constant 0.000000e+00 : f32
        %138 = vector.broadcast %cst_54 : f32 to vector<8x128xf32>
        %139 = arith.select %134, %137, %138 : vector<8x128xi1>, vector<8x128xf32>
        %140 = arith.cmpf one, %103, %99 : vector<8x128xf32>
        %141 = arith.cmpf one, %103, %97 : vector<8x128xf32>
        %142 = arith.andi %140, %141 : vector<8x128xi1>
        %cst_55 = arith.constant 4.000000e+00 : f32
        %143 = vector.broadcast %cst_55 : f32 to vector<8x128xf32>
        %144 = arith.addf %143, %125 : vector<8x128xf32>
        %145 = arith.subf %144, %123 : vector<8x128xf32>
        %cst_56 = arith.constant 0.000000e+00 : f32
        %146 = vector.broadcast %cst_56 : f32 to vector<8x128xf32>
        %147 = arith.select %142, %145, %146 : vector<8x128xi1>, vector<8x128xf32>
        %148 = arith.addf %131, %139 : vector<8x128xf32>
        %149 = arith.addf %148, %147 : vector<8x128xf32>
        %cst_57 = arith.constant 0.166666672 : f32
        %150 = vector.broadcast %cst_57 : f32 to vector<8x128xf32>
        %151 = arith.mulf %149, %150 : vector<8x128xf32>
        %cst_58 = arith.constant 1.000000e+00 : f32
        %152 = vector.broadcast %cst_58 : f32 to vector<8x128xf32>
        %153 = arith.addf %151, %152 : vector<8x128xf32>
        %154 = vector.broadcast %33 : f32 to vector<8x128xf32>
        %155 = arith.addf %153, %154 : vector<8x128xf32>
        %156 = math.floor %155 : vector<8x128xf32>
        %157 = arith.subf %155, %156 : vector<8x128xf32>
        %cst_59 = arith.constant 6.000000e+00 : f32
        %158 = vector.broadcast %cst_59 : f32 to vector<8x128xf32>
        %159 = arith.mulf %157, %158 : vector<8x128xf32>
        %160 = math.floor %159 : vector<8x128xf32>
        %161 = arith.subf %159, %160 : vector<8x128xf32>
        %cst_60 = arith.constant 1.000000e+00 : f32
        %162 = vector.broadcast %cst_60 : f32 to vector<8x128xf32>
        %163 = arith.subf %162, %115 : vector<8x128xf32>
        %164 = arith.mulf %103, %163 : vector<8x128xf32>
        %165 = arith.mulf %115, %161 : vector<8x128xf32>
        %cst_61 = arith.constant 1.000000e+00 : f32
        %166 = vector.broadcast %cst_61 : f32 to vector<8x128xf32>
        %167 = arith.subf %166, %165 : vector<8x128xf32>
        %168 = arith.mulf %103, %167 : vector<8x128xf32>
        %cst_62 = arith.constant 1.000000e+00 : f32
        %169 = vector.broadcast %cst_62 : f32 to vector<8x128xf32>
        %170 = arith.subf %169, %161 : vector<8x128xf32>
        %171 = arith.mulf %115, %170 : vector<8x128xf32>
        %cst_63 = arith.constant 1.000000e+00 : f32
        %172 = vector.broadcast %cst_63 : f32 to vector<8x128xf32>
        %173 = arith.subf %172, %171 : vector<8x128xf32>
        %174 = arith.mulf %103, %173 : vector<8x128xf32>
        %cst_64 = arith.constant 0.000000e+00 : f32
        %175 = vector.broadcast %cst_64 : f32 to vector<8x128xf32>
        %176 = arith.cmpf oeq, %160, %175 : vector<8x128xf32>
        %cst_65 = arith.constant 1.000000e+00 : f32
        %177 = vector.broadcast %cst_65 : f32 to vector<8x128xf32>
        %178 = arith.cmpf oeq, %160, %177 : vector<8x128xf32>
        %cst_66 = arith.constant 2.000000e+00 : f32
        %179 = vector.broadcast %cst_66 : f32 to vector<8x128xf32>
        %180 = arith.cmpf oeq, %160, %179 : vector<8x128xf32>
        %cst_67 = arith.constant 3.000000e+00 : f32
        %181 = vector.broadcast %cst_67 : f32 to vector<8x128xf32>
        %182 = arith.cmpf oeq, %160, %181 : vector<8x128xf32>
        %cst_68 = arith.constant 4.000000e+00 : f32
        %183 = vector.broadcast %cst_68 : f32 to vector<8x128xf32>
        %184 = arith.cmpf oeq, %160, %183 : vector<8x128xf32>
        %185 = arith.select %184, %174, %103 : vector<8x128xi1>, vector<8x128xf32>
        %186 = arith.select %182, %164, %185 : vector<8x128xi1>, vector<8x128xf32>
        %187 = arith.select %180, %164, %186 : vector<8x128xi1>, vector<8x128xf32>
        %188 = arith.select %178, %168, %187 : vector<8x128xi1>, vector<8x128xf32>
        %189 = arith.select %176, %103, %188 : vector<8x128xi1>, vector<8x128xf32>
        %cst_69 = arith.constant 0.000000e+00 : f32
        %cst_70 = arith.constant 1.000000e+00 : f32
        %190 = vector.broadcast %cst_69 : f32 to vector<8x128xf32>
        %191 = arith.maximumf %190, %189 : vector<8x128xf32>
        %192 = vector.broadcast %cst_70 : f32 to vector<8x128xf32>
        %193 = arith.minimumf %192, %191 : vector<8x128xf32>
        %194 = arith.select %184, %164, %164 : vector<8x128xi1>, vector<8x128xf32>
        %195 = arith.select %182, %168, %194 : vector<8x128xi1>, vector<8x128xf32>
        %196 = arith.select %180, %103, %195 : vector<8x128xi1>, vector<8x128xf32>
        %197 = arith.select %178, %103, %196 : vector<8x128xi1>, vector<8x128xf32>
        %198 = arith.select %176, %174, %197 : vector<8x128xi1>, vector<8x128xf32>
        %cst_71 = arith.constant 0.000000e+00 : f32
        %cst_72 = arith.constant 1.000000e+00 : f32
        %199 = vector.broadcast %cst_71 : f32 to vector<8x128xf32>
        %200 = arith.maximumf %199, %198 : vector<8x128xf32>
        %201 = vector.broadcast %cst_72 : f32 to vector<8x128xf32>
        %202 = arith.minimumf %201, %200 : vector<8x128xf32>
        %203 = arith.select %184, %103, %168 : vector<8x128xi1>, vector<8x128xf32>
        %204 = arith.select %182, %103, %203 : vector<8x128xi1>, vector<8x128xf32>
        %205 = arith.select %180, %174, %204 : vector<8x128xi1>, vector<8x128xf32>
        %206 = arith.select %178, %164, %205 : vector<8x128xi1>, vector<8x128xf32>
        %207 = arith.select %176, %164, %206 : vector<8x128xi1>, vector<8x128xf32>
        %cst_73 = arith.constant 0.000000e+00 : f32
        %cst_74 = arith.constant 1.000000e+00 : f32
        %208 = vector.broadcast %cst_73 : f32 to vector<8x128xf32>
        %209 = arith.maximumf %208, %207 : vector<8x128xf32>
        %210 = vector.broadcast %cst_74 : f32 to vector<8x128xf32>
        %211 = arith.minimumf %210, %209 : vector<8x128xf32>
        %c1_75 = arith.constant 1 : index
        %c0_76 = arith.constant 0 : index
        %c0_77 = arith.constant 0 : index
        %c0_78 = arith.constant 0 : index
        %212 = vector.load %arg5[%c1_75, %c0_76, %c0_77, %c0_78] : memref<2x3x8x128xf32, #tpu.memory_space<vmem>>, vector<1x1x8x128xf32>
        %213 = vector.shape_cast %212 : vector<1x1x8x128xf32> to vector<8x128xf32>
        %214 = vector.shape_cast %193 : vector<8x128xf32> to vector<1x1x8x128xf32>
        tpu.vector_store %arg5[%c1_75, %c0_76, %c0_77, %c0_78], %214 {strides = array<i32>} : memref<2x3x8x128xf32, #tpu.memory_space<vmem>>, vector<1x1x8x128xf32>,
        %c1_79 = arith.constant 1 : index
        %c1_80 = arith.constant 1 : index
        %c0_81 = arith.constant 0 : index
        %c0_82 = arith.constant 0 : index
        %215 = vector.load %arg5[%c1_79, %c1_80, %c0_81, %c0_82] : memref<2x3x8x128xf32, #tpu.memory_space<vmem>>, vector<1x1x8x128xf32>
        %216 = vector.shape_cast %215 : vector<1x1x8x128xf32> to vector<8x128xf32>
        %217 = vector.shape_cast %202 : vector<8x128xf32> to vector<1x1x8x128xf32>
        tpu.vector_store %arg5[%c1_79, %c1_80, %c0_81, %c0_82], %217 {strides = array<i32>} : memref<2x3x8x128xf32, #tpu.memory_space<vmem>>, vector<1x1x8x128xf32>,
        %c1_83 = arith.constant 1 : index
        %c2 = arith.constant 2 : index
        %c0_84 = arith.constant 0 : index
        %c0_85 = arith.constant 0 : index
        %218 = vector.load %arg5[%c1_83, %c2, %c0_84, %c0_85] : memref<2x3x8x128xf32, #tpu.memory_space<vmem>>, vector<1x1x8x128xf32>
        %219 = vector.shape_cast %218 : vector<1x1x8x128xf32> to vector<8x128xf32>
        %220 = vector.shape_cast %211 : vector<8x128xf32> to vector<1x1x8x128xf32>
        tpu.vector_store %arg5[%c1_83, %c2, %c0_84, %c0_85], %220 {strides = array<i32>} : memref<2x3x8x128xf32, #tpu.memory_space<vmem>>, vector<1x1x8x128xf32>,
      } else {
      }
      %c3_i32_39 = arith.constant 3 : i32
      %79 = arith.addi %13, %c3_i32_39 : i32
      %80 = arith.index_cast %79 : i32 to index
      %81 = memref.load %arg3[%80] : memref<16xi32, #tpu.memory_space<smem>>
      %c0_i32_40 = arith.constant 0 : i32
      %82 = arith.cmpi eq, %81, %c0_i32_40 : i32
      %83 = arith.extui %82 : i1 to i32
      %c0_i32_41 = arith.constant 0 : i32
      %84 = arith.cmpi ne, %83, %c0_i32_41 : i32
      scf.if %84 {
        %c1 = arith.constant 1 : index
        %c0 = arith.constant 0 : index
        %c0_48 = arith.constant 0 : index
        %c0_49 = arith.constant 0 : index
        %94 = vector.load %arg5[%c1, %c0, %c0_48, %c0_49] : memref<2x3x8x128xf32, #tpu.memory_space<vmem>>, vector<1x3x8x128xf32>
        %95 = vector.shape_cast %94 : vector<1x3x8x128xf32> to vector<3x8x128xf32>
        %96 = vector.broadcast %24 : f32 to vector<3x8x128xf32>
        %97 = arith.mulf %95, %96 : vector<3x8x128xf32>
        %cst = arith.constant 0.000000e+00 : f32
        %cst_50 = arith.constant 1.000000e+00 : f32
        %98 = vector.broadcast %cst : f32 to vector<3x8x128xf32>
        %99 = arith.maximumf %98, %97 : vector<3x8x128xf32>
        %100 = vector.broadcast %cst_50 : f32 to vector<3x8x128xf32>
        %101 = arith.minimumf %100, %99 : vector<3x8x128xf32>
        %c1_51 = arith.constant 1 : index
        %c0_52 = arith.constant 0 : index
        %c0_53 = arith.constant 0 : index
        %c0_54 = arith.constant 0 : index
        %102 = vector.load %arg5[%c1_51, %c0_52, %c0_53, %c0_54] : memref<2x3x8x128xf32, #tpu.memory_space<vmem>>, vector<1x3x8x128xf32>
        %103 = vector.shape_cast %102 : vector<1x3x8x128xf32> to vector<3x8x128xf32>
        %104 = vector.shape_cast %101 : vector<3x8x128xf32> to vector<1x3x8x128xf32>
        tpu.vector_store %arg5[%c1_51, %c0_52, %c0_53, %c0_54], %104 {strides = array<i32>} : memref<2x3x8x128xf32, #tpu.memory_space<vmem>>, vector<1x3x8x128xf32>,
      } else {
      }
      %c1_i32_42 = arith.constant 1 : i32
      %85 = arith.cmpi eq, %81, %c1_i32_42 : i32
      %86 = arith.extui %85 : i1 to i32
      %c0_i32_43 = arith.constant 0 : i32
      %87 = arith.cmpi ne, %86, %c0_i32_43 : i32
      scf.if %87 {
        %c1 = arith.constant 1 : index
        %c0 = arith.constant 0 : index
        %c0_48 = arith.constant 0 : index
        %c0_49 = arith.constant 0 : index
        %94 = vector.load %arg5[%c1, %c0, %c0_48, %c0_49] : memref<2x3x8x128xf32, #tpu.memory_space<vmem>>, vector<1x3x8x128xf32>
        %95 = vector.shape_cast %94 : vector<1x3x8x128xf32> to vector<3x8x128xf32>
        %96 = vector.extract_strided_slice %95 {offsets = [0, 0, 0], sizes = [1, 8, 128], strides = [1, 1, 1]} : vector<3x8x128xf32> to vector<1x8x128xf32>
        %97 = vector.shape_cast %96 : vector<1x8x128xf32> to vector<8x128xf32>
        %cst = arith.constant 2.989000e-01 : f32
        %98 = vector.broadcast %cst : f32 to vector<8x128xf32>
        %99 = arith.mulf %98, %97 : vector<8x128xf32>
        %100 = vector.extract_strided_slice %95 {offsets = [1, 0, 0], sizes = [1, 8, 128], strides = [1, 1, 1]} : vector<3x8x128xf32> to vector<1x8x128xf32>
        %101 = vector.shape_cast %100 : vector<1x8x128xf32> to vector<8x128xf32>
        %cst_50 = arith.constant 5.870000e-01 : f32
        %102 = vector.broadcast %cst_50 : f32 to vector<8x128xf32>
        %103 = arith.mulf %102, %101 : vector<8x128xf32>
        %104 = arith.addf %99, %103 : vector<8x128xf32>
        %105 = vector.extract_strided_slice %95 {offsets = [2, 0, 0], sizes = [1, 8, 128], strides = [1, 1, 1]} : vector<3x8x128xf32> to vector<1x8x128xf32>
        %106 = vector.shape_cast %105 : vector<1x8x128xf32> to vector<8x128xf32>
        %cst_51 = arith.constant 1.140000e-01 : f32
        %107 = vector.broadcast %cst_51 : f32 to vector<8x128xf32>
        %108 = arith.mulf %107, %106 : vector<8x128xf32>
        %109 = arith.addf %104, %108 : vector<8x128xf32>
        %110 = vector.shape_cast %109 : vector<8x128xf32> to vector<1x8x128xf32>
        %cst_52 = arith.constant dense<0.000000e+00> : vector<1xf32>
        %111 = vector.multi_reduction <add>, %110, %cst_52 [1, 2] : vector<1x8x128xf32> to vector<1xf32>
        %112 = vector.shape_cast %111 : vector<1xf32> to vector<1x1x1xf32>
        %113 = vector.extract %112[0, 0, 0] : f32 from vector<1x1x1xf32>
        %cst_53 = arith.constant 3.906250e-03 : f32
        %114 = arith.mulf %113, %cst_53 : f32
        %115 = vector.broadcast %27 : f32 to vector<3x8x128xf32>
        %116 = arith.mulf %115, %95 : vector<3x8x128xf32>
        %cst_54 = arith.constant 1.000000e+00 : f32
        %117 = arith.subf %cst_54, %27 : f32
        %118 = arith.mulf %117, %114 : f32
        %119 = vector.broadcast %118 : f32 to vector<3x8x128xf32>
        %120 = arith.addf %116, %119 : vector<3x8x128xf32>
        %cst_55 = arith.constant 0.000000e+00 : f32
        %cst_56 = arith.constant 1.000000e+00 : f32
        %121 = vector.broadcast %cst_55 : f32 to vector<3x8x128xf32>
        %122 = arith.maximumf %121, %120 : vector<3x8x128xf32>
        %123 = vector.broadcast %cst_56 : f32 to vector<3x8x128xf32>
        %124 = arith.minimumf %123, %122 : vector<3x8x128xf32>
        %c1_57 = arith.constant 1 : index
        %c0_58 = arith.constant 0 : index
        %c0_59 = arith.constant 0 : index
        %c0_60 = arith.constant 0 : index
        %125 = vector.load %arg5[%c1_57, %c0_58, %c0_59, %c0_60] : memref<2x3x8x128xf32, #tpu.memory_space<vmem>>, vector<1x3x8x128xf32>
        %126 = vector.shape_cast %125 : vector<1x3x8x128xf32> to vector<3x8x128xf32>
        %127 = vector.shape_cast %124 : vector<3x8x128xf32> to vector<1x3x8x128xf32>
        tpu.vector_store %arg5[%c1_57, %c0_58, %c0_59, %c0_60], %127 {strides = array<i32>} : memref<2x3x8x128xf32, #tpu.memory_space<vmem>>, vector<1x3x8x128xf32>,
      } else {
      }
      %c2_i32_44 = arith.constant 2 : i32
      %88 = arith.cmpi eq, %81, %c2_i32_44 : i32
      %89 = arith.extui %88 : i1 to i32
      %c0_i32_45 = arith.constant 0 : i32
      %90 = arith.cmpi ne, %89, %c0_i32_45 : i32
      scf.if %90 {
        %c1 = arith.constant 1 : index
        %c0 = arith.constant 0 : index
        %c0_48 = arith.constant 0 : index
        %c0_49 = arith.constant 0 : index
        %94 = vector.load %arg5[%c1, %c0, %c0_48, %c0_49] : memref<2x3x8x128xf32, #tpu.memory_space<vmem>>, vector<1x3x8x128xf32>
        %95 = vector.shape_cast %94 : vector<1x3x8x128xf32> to vector<3x8x128xf32>
        %96 = vector.extract_strided_slice %95 {offsets = [0, 0, 0], sizes = [1, 8, 128], strides = [1, 1, 1]} : vector<3x8x128xf32> to vector<1x8x128xf32>
        %97 = vector.shape_cast %96 : vector<1x8x128xf32> to vector<8x128xf32>
        %cst = arith.constant 2.989000e-01 : f32
        %98 = vector.broadcast %cst : f32 to vector<8x128xf32>
        %99 = arith.mulf %98, %97 : vector<8x128xf32>
        %100 = vector.extract_strided_slice %95 {offsets = [1, 0, 0], sizes = [1, 8, 128], strides = [1, 1, 1]} : vector<3x8x128xf32> to vector<1x8x128xf32>
        %101 = vector.shape_cast %100 : vector<1x8x128xf32> to vector<8x128xf32>
        %cst_50 = arith.constant 5.870000e-01 : f32
        %102 = vector.broadcast %cst_50 : f32 to vector<8x128xf32>
        %103 = arith.mulf %102, %101 : vector<8x128xf32>
        %104 = arith.addf %99, %103 : vector<8x128xf32>
        %105 = vector.extract_strided_slice %95 {offsets = [2, 0, 0], sizes = [1, 8, 128], strides = [1, 1, 1]} : vector<3x8x128xf32> to vector<1x8x128xf32>
        %106 = vector.shape_cast %105 : vector<1x8x128xf32> to vector<8x128xf32>
        %cst_51 = arith.constant 1.140000e-01 : f32
        %107 = vector.broadcast %cst_51 : f32 to vector<8x128xf32>
        %108 = arith.mulf %107, %106 : vector<8x128xf32>
        %109 = arith.addf %104, %108 : vector<8x128xf32>
        %110 = vector.broadcast %30 : f32 to vector<3x8x128xf32>
        %111 = arith.mulf %110, %95 : vector<3x8x128xf32>
        %cst_52 = arith.constant 1.000000e+00 : f32
        %112 = arith.subf %cst_52, %30 : f32
        %113 = vector.shape_cast %109 : vector<8x128xf32> to vector<1x8x128xf32>
        %114 = vector.broadcast %112 : f32 to vector<1x8x128xf32>
        %115 = arith.mulf %114, %113 : vector<1x8x128xf32>
        %116 = vector.broadcast %115 : vector<1x8x128xf32> to vector<3x8x128xf32>
        %117 = arith.addf %111, %116 : vector<3x8x128xf32>
        %cst_53 = arith.constant 0.000000e+00 : f32
        %cst_54 = arith.constant 1.000000e+00 : f32
        %118 = vector.broadcast %cst_53 : f32 to vector<3x8x128xf32>
        %119 = arith.maximumf %118, %117 : vector<3x8x128xf32>
        %120 = vector.broadcast %cst_54 : f32 to vector<3x8x128xf32>
        %121 = arith.minimumf %120, %119 : vector<3x8x128xf32>
        %c1_55 = arith.constant 1 : index
        %c0_56 = arith.constant 0 : index
        %c0_57 = arith.constant 0 : index
        %c0_58 = arith.constant 0 : index
        %122 = vector.load %arg5[%c1_55, %c0_56, %c0_57, %c0_58] : memref<2x3x8x128xf32, #tpu.memory_space<vmem>>, vector<1x3x8x128xf32>
        %123 = vector.shape_cast %122 : vector<1x3x8x128xf32> to vector<3x8x128xf32>
        %124 = vector.shape_cast %121 : vector<3x8x128xf32> to vector<1x3x8x128xf32>
        tpu.vector_store %arg5[%c1_55, %c0_56, %c0_57, %c0_58], %124 {strides = array<i32>} : memref<2x3x8x128xf32, #tpu.memory_space<vmem>>, vector<1x3x8x128xf32>,
      } else {
      }
      %c3_i32_46 = arith.constant 3 : i32
      %91 = arith.cmpi eq, %81, %c3_i32_46 : i32
      %92 = arith.extui %91 : i1 to i32
      %c0_i32_47 = arith.constant 0 : i32
      %93 = arith.cmpi ne, %92, %c0_i32_47 : i32
      scf.if %93 {
        %c1 = arith.constant 1 : index
        %c0 = arith.constant 0 : index
        %c0_48 = arith.constant 0 : index
        %c0_49 = arith.constant 0 : index
        %94 = vector.load %arg5[%c1, %c0, %c0_48, %c0_49] : memref<2x3x8x128xf32, #tpu.memory_space<vmem>>, vector<1x3x8x128xf32>
        %95 = vector.shape_cast %94 : vector<1x3x8x128xf32> to vector<3x8x128xf32>
        %96 = vector.extract_strided_slice %95 {offsets = [0, 0, 0], sizes = [1, 8, 128], strides = [1, 1, 1]} : vector<3x8x128xf32> to vector<1x8x128xf32>
        %97 = vector.shape_cast %96 : vector<1x8x128xf32> to vector<8x128xf32>
        %98 = vector.extract_strided_slice %95 {offsets = [1, 0, 0], sizes = [1, 8, 128], strides = [1, 1, 1]} : vector<3x8x128xf32> to vector<1x8x128xf32>
        %99 = vector.shape_cast %98 : vector<1x8x128xf32> to vector<8x128xf32>
        %100 = vector.extract_strided_slice %95 {offsets = [2, 0, 0], sizes = [1, 8, 128], strides = [1, 1, 1]} : vector<3x8x128xf32> to vector<1x8x128xf32>
        %101 = vector.shape_cast %100 : vector<1x8x128xf32> to vector<8x128xf32>
        %102 = arith.maximumf %97, %99 : vector<8x128xf32>
        %103 = arith.maximumf %102, %101 : vector<8x128xf32>
        %104 = arith.minimumf %97, %99 : vector<8x128xf32>
        %105 = arith.minimumf %104, %101 : vector<8x128xf32>
        %106 = arith.cmpf oeq, %103, %105 : vector<8x128xf32>
        %107 = arith.subf %103, %105 : vector<8x128xf32>
        %cst = arith.constant 1.000000e+00 : f32
        %108 = vector.broadcast %cst : f32 to vector<8x128xf32>
        %109 = arith.select %106, %108, %103 : vector<8x128xi1>, vector<8x128xf32>
        %110 = tpu.reciprocal %109 {approx = true} : vector<8x128xf32> -> vector<8x128xf32>
        %111 = arith.mulf %109, %110 : vector<8x128xf32>
        %cst_50 = arith.constant 2.000000e+00 : f32
        %112 = vector.broadcast %cst_50 : f32 to vector<8x128xf32>
        %113 = arith.subf %112, %111 : vector<8x128xf32>
        %114 = arith.mulf %110, %113 : vector<8x128xf32>
        %115 = arith.mulf %107, %114 : vector<8x128xf32>
        %116 = arith.select %106, %108, %107 : vector<8x128xi1>, vector<8x128xf32>
        %117 = tpu.reciprocal %116 {approx = true} : vector<8x128xf32> -> vector<8x128xf32>
        %118 = arith.mulf %116, %117 : vector<8x128xf32>
        %cst_51 = arith.constant 2.000000e+00 : f32
        %119 = vector.broadcast %cst_51 : f32 to vector<8x128xf32>
        %120 = arith.subf %119, %118 : vector<8x128xf32>
        %121 = arith.mulf %117, %120 : vector<8x128xf32>
        %122 = arith.subf %103, %97 : vector<8x128xf32>
        %123 = arith.mulf %122, %121 : vector<8x128xf32>
        %124 = arith.subf %103, %99 : vector<8x128xf32>
        %125 = arith.mulf %124, %121 : vector<8x128xf32>
        %126 = arith.subf %103, %101 : vector<8x128xf32>
        %127 = arith.mulf %126, %121 : vector<8x128xf32>
        %128 = arith.cmpf oeq, %103, %97 : vector<8x128xf32>
        %129 = arith.subf %127, %125 : vector<8x128xf32>
        %cst_52 = arith.constant 0.000000e+00 : f32
        %130 = vector.broadcast %cst_52 : f32 to vector<8x128xf32>
        %131 = arith.select %128, %129, %130 : vector<8x128xi1>, vector<8x128xf32>
        %132 = arith.cmpf oeq, %103, %99 : vector<8x128xf32>
        %133 = arith.cmpf one, %103, %97 : vector<8x128xf32>
        %134 = arith.andi %132, %133 : vector<8x128xi1>
        %cst_53 = arith.constant 2.000000e+00 : f32
        %135 = vector.broadcast %cst_53 : f32 to vector<8x128xf32>
        %136 = arith.addf %135, %123 : vector<8x128xf32>
        %137 = arith.subf %136, %127 : vector<8x128xf32>
        %cst_54 = arith.constant 0.000000e+00 : f32
        %138 = vector.broadcast %cst_54 : f32 to vector<8x128xf32>
        %139 = arith.select %134, %137, %138 : vector<8x128xi1>, vector<8x128xf32>
        %140 = arith.cmpf one, %103, %99 : vector<8x128xf32>
        %141 = arith.cmpf one, %103, %97 : vector<8x128xf32>
        %142 = arith.andi %140, %141 : vector<8x128xi1>
        %cst_55 = arith.constant 4.000000e+00 : f32
        %143 = vector.broadcast %cst_55 : f32 to vector<8x128xf32>
        %144 = arith.addf %143, %125 : vector<8x128xf32>
        %145 = arith.subf %144, %123 : vector<8x128xf32>
        %cst_56 = arith.constant 0.000000e+00 : f32
        %146 = vector.broadcast %cst_56 : f32 to vector<8x128xf32>
        %147 = arith.select %142, %145, %146 : vector<8x128xi1>, vector<8x128xf32>
        %148 = arith.addf %131, %139 : vector<8x128xf32>
        %149 = arith.addf %148, %147 : vector<8x128xf32>
        %cst_57 = arith.constant 0.166666672 : f32
        %150 = vector.broadcast %cst_57 : f32 to vector<8x128xf32>
        %151 = arith.mulf %149, %150 : vector<8x128xf32>
        %cst_58 = arith.constant 1.000000e+00 : f32
        %152 = vector.broadcast %cst_58 : f32 to vector<8x128xf32>
        %153 = arith.addf %151, %152 : vector<8x128xf32>
        %154 = vector.broadcast %33 : f32 to vector<8x128xf32>
        %155 = arith.addf %153, %154 : vector<8x128xf32>
        %156 = math.floor %155 : vector<8x128xf32>
        %157 = arith.subf %155, %156 : vector<8x128xf32>
        %cst_59 = arith.constant 6.000000e+00 : f32
        %158 = vector.broadcast %cst_59 : f32 to vector<8x128xf32>
        %159 = arith.mulf %157, %158 : vector<8x128xf32>
        %160 = math.floor %159 : vector<8x128xf32>
        %161 = arith.subf %159, %160 : vector<8x128xf32>
        %cst_60 = arith.constant 1.000000e+00 : f32
        %162 = vector.broadcast %cst_60 : f32 to vector<8x128xf32>
        %163 = arith.subf %162, %115 : vector<8x128xf32>
        %164 = arith.mulf %103, %163 : vector<8x128xf32>
        %165 = arith.mulf %115, %161 : vector<8x128xf32>
        %cst_61 = arith.constant 1.000000e+00 : f32
        %166 = vector.broadcast %cst_61 : f32 to vector<8x128xf32>
        %167 = arith.subf %166, %165 : vector<8x128xf32>
        %168 = arith.mulf %103, %167 : vector<8x128xf32>
        %cst_62 = arith.constant 1.000000e+00 : f32
        %169 = vector.broadcast %cst_62 : f32 to vector<8x128xf32>
        %170 = arith.subf %169, %161 : vector<8x128xf32>
        %171 = arith.mulf %115, %170 : vector<8x128xf32>
        %cst_63 = arith.constant 1.000000e+00 : f32
        %172 = vector.broadcast %cst_63 : f32 to vector<8x128xf32>
        %173 = arith.subf %172, %171 : vector<8x128xf32>
        %174 = arith.mulf %103, %173 : vector<8x128xf32>
        %cst_64 = arith.constant 0.000000e+00 : f32
        %175 = vector.broadcast %cst_64 : f32 to vector<8x128xf32>
        %176 = arith.cmpf oeq, %160, %175 : vector<8x128xf32>
        %cst_65 = arith.constant 1.000000e+00 : f32
        %177 = vector.broadcast %cst_65 : f32 to vector<8x128xf32>
        %178 = arith.cmpf oeq, %160, %177 : vector<8x128xf32>
        %cst_66 = arith.constant 2.000000e+00 : f32
        %179 = vector.broadcast %cst_66 : f32 to vector<8x128xf32>
        %180 = arith.cmpf oeq, %160, %179 : vector<8x128xf32>
        %cst_67 = arith.constant 3.000000e+00 : f32
        %181 = vector.broadcast %cst_67 : f32 to vector<8x128xf32>
        %182 = arith.cmpf oeq, %160, %181 : vector<8x128xf32>
        %cst_68 = arith.constant 4.000000e+00 : f32
        %183 = vector.broadcast %cst_68 : f32 to vector<8x128xf32>
        %184 = arith.cmpf oeq, %160, %183 : vector<8x128xf32>
        %185 = arith.select %184, %174, %103 : vector<8x128xi1>, vector<8x128xf32>
        %186 = arith.select %182, %164, %185 : vector<8x128xi1>, vector<8x128xf32>
        %187 = arith.select %180, %164, %186 : vector<8x128xi1>, vector<8x128xf32>
        %188 = arith.select %178, %168, %187 : vector<8x128xi1>, vector<8x128xf32>
        %189 = arith.select %176, %103, %188 : vector<8x128xi1>, vector<8x128xf32>
        %cst_69 = arith.constant 0.000000e+00 : f32
        %cst_70 = arith.constant 1.000000e+00 : f32
        %190 = vector.broadcast %cst_69 : f32 to vector<8x128xf32>
        %191 = arith.maximumf %190, %189 : vector<8x128xf32>
        %192 = vector.broadcast %cst_70 : f32 to vector<8x128xf32>
        %193 = arith.minimumf %192, %191 : vector<8x128xf32>
        %194 = arith.select %184, %164, %164 : vector<8x128xi1>, vector<8x128xf32>
        %195 = arith.select %182, %168, %194 : vector<8x128xi1>, vector<8x128xf32>
        %196 = arith.select %180, %103, %195 : vector<8x128xi1>, vector<8x128xf32>
        %197 = arith.select %178, %103, %196 : vector<8x128xi1>, vector<8x128xf32>
        %198 = arith.select %176, %174, %197 : vector<8x128xi1>, vector<8x128xf32>
        %cst_71 = arith.constant 0.000000e+00 : f32
        %cst_72 = arith.constant 1.000000e+00 : f32
        %199 = vector.broadcast %cst_71 : f32 to vector<8x128xf32>
        %200 = arith.maximumf %199, %198 : vector<8x128xf32>
        %201 = vector.broadcast %cst_72 : f32 to vector<8x128xf32>
        %202 = arith.minimumf %201, %200 : vector<8x128xf32>
        %203 = arith.select %184, %103, %168 : vector<8x128xi1>, vector<8x128xf32>
        %204 = arith.select %182, %103, %203 : vector<8x128xi1>, vector<8x128xf32>
        %205 = arith.select %180, %174, %204 : vector<8x128xi1>, vector<8x128xf32>
        %206 = arith.select %178, %164, %205 : vector<8x128xi1>, vector<8x128xf32>
        %207 = arith.select %176, %164, %206 : vector<8x128xi1>, vector<8x128xf32>
        %cst_73 = arith.constant 0.000000e+00 : f32
        %cst_74 = arith.constant 1.000000e+00 : f32
        %208 = vector.broadcast %cst_73 : f32 to vector<8x128xf32>
        %209 = arith.maximumf %208, %207 : vector<8x128xf32>
        %210 = vector.broadcast %cst_74 : f32 to vector<8x128xf32>
        %211 = arith.minimumf %210, %209 : vector<8x128xf32>
        %c1_75 = arith.constant 1 : index
        %c0_76 = arith.constant 0 : index
        %c0_77 = arith.constant 0 : index
        %c0_78 = arith.constant 0 : index
        %212 = vector.load %arg5[%c1_75, %c0_76, %c0_77, %c0_78] : memref<2x3x8x128xf32, #tpu.memory_space<vmem>>, vector<1x1x8x128xf32>
        %213 = vector.shape_cast %212 : vector<1x1x8x128xf32> to vector<8x128xf32>
        %214 = vector.shape_cast %193 : vector<8x128xf32> to vector<1x1x8x128xf32>
        tpu.vector_store %arg5[%c1_75, %c0_76, %c0_77, %c0_78], %214 {strides = array<i32>} : memref<2x3x8x128xf32, #tpu.memory_space<vmem>>, vector<1x1x8x128xf32>,
        %c1_79 = arith.constant 1 : index
        %c1_80 = arith.constant 1 : index
        %c0_81 = arith.constant 0 : index
        %c0_82 = arith.constant 0 : index
        %215 = vector.load %arg5[%c1_79, %c1_80, %c0_81, %c0_82] : memref<2x3x8x128xf32, #tpu.memory_space<vmem>>, vector<1x1x8x128xf32>
        %216 = vector.shape_cast %215 : vector<1x1x8x128xf32> to vector<8x128xf32>
        %217 = vector.shape_cast %202 : vector<8x128xf32> to vector<1x1x8x128xf32>
        tpu.vector_store %arg5[%c1_79, %c1_80, %c0_81, %c0_82], %217 {strides = array<i32>} : memref<2x3x8x128xf32, #tpu.memory_space<vmem>>, vector<1x1x8x128xf32>,
        %c1_83 = arith.constant 1 : index
        %c2 = arith.constant 2 : index
        %c0_84 = arith.constant 0 : index
        %c0_85 = arith.constant 0 : index
        %218 = vector.load %arg5[%c1_83, %c2, %c0_84, %c0_85] : memref<2x3x8x128xf32, #tpu.memory_space<vmem>>, vector<1x1x8x128xf32>
        %219 = vector.shape_cast %218 : vector<1x1x8x128xf32> to vector<8x128xf32>
        %220 = vector.shape_cast %211 : vector<8x128xf32> to vector<1x1x8x128xf32>
        tpu.vector_store %arg5[%c1_83, %c2, %c0_84, %c0_85], %220 {strides = array<i32>} : memref<2x3x8x128xf32, #tpu.memory_space<vmem>>, vector<1x1x8x128xf32>,
      } else {
      }
    } else {
    }
    return
  }
  func.func @transform_0(%arg0: i32, %arg1: memref<4xi32, #tpu.memory_space<smem>>, %arg2: memref<16xf32, #tpu.memory_space<smem>>, %arg3: memref<16xi32, #tpu.memory_space<smem>>) -> (i32, i32, i32, i32) {
    %c0_i32 = arith.constant 0 : i32
    %c0_i32_0 = arith.constant 0 : i32
    %c0_i32_1 = arith.constant 0 : i32
    %c0_i32_2 = arith.constant 0 : i32
    return %arg0, %c0_i32, %c0_i32_0, %c0_i32_1 : i32, i32, i32, i32
  }
  func.func @transform_1(%arg0: i32, %arg1: memref<4xi32, #tpu.memory_space<smem>>, %arg2: memref<16xf32, #tpu.memory_space<smem>>, %arg3: memref<16xi32, #tpu.memory_space<smem>>) -> (i32, i32, i32, i32) {
    %c0_i32 = arith.constant 0 : i32
    %c0_i32_0 = arith.constant 0 : i32
    %c0_i32_1 = arith.constant 0 : i32
    %c0_i32_2 = arith.constant 0 : i32
    return %arg0, %c0_i32, %c0_i32_0, %c0_i32_1 : i32, i32, i32, i32
  }
}

</mosaic_0001>

<bundles_post_ra>
// kernel: tpu_custom_call.1
= control target key start
LH: loop header
LB: loop body
LE: loop exit
PB: predicated region body
PF: predicated region fallthrough
CT: control target
= control target key end

     0   :  { %s3000_s0 = inlined_call_operand.hbm [shape: s32[4], index: 0, kind: input, shape index: {}]   ;;  %s3001_s3 = inlined_call_operand.hbm [shape: f32[4,3,8,128], index: 3, kind: input, shape index: {}]   ;;  %s3002_s4 = inlined_call_operand.hbm [shape: f32[4,3,8,128], index: 4, kind: output, shape index: {}]   ;;  %s3003_s1 = inlined_call_operand.vmem [shape: f32[16], index: 1, kind: input, shape index: {}]   ;;  %s3004_s2 = inlined_call_operand.vmem [shape: s32[16], index: 2, kind: input, shape index: {}]  }
   0x1   :  { %s2076_s17 = scalar_lea.hbm %s3000_s0, 16 }
   0x2   :  { %p2077_p0 = scmp.ne.s32.totalorder %s3000_s0, %s2076_s17  ;;  %p2080_p1 = scmp.lt.u32.totalorder %s2076_s17, %s3000_s0 }
   0x4   :  { %p2082_p2 = pnand %p2080_p1, %p2077_p0 }
   0x6   :  { %2085 = shalt.err (!%p2082_p2)  }
   0x7   :  { %s2210_s22 = smov [#allocation3]   ;;  %s11_s27 = sshll.u32 %s3003_s1, 4  ;;  %s12_s27 = int_to_ptr.vmem [resolvable:$true] %s11_s27 }
   0x8   :  { %10 = dma.hbm_to_smem %s3000_s0, 16, %s2210_s22, [#allocation2] }
   0x9   :  { %s15_s30 = sshll.u32 %s3004_s2, 4  ;;  %s2086_s5 = scalar_lea.vmem %s12_s27, 16  ;;  %s16_s30 = int_to_ptr.vmem [resolvable:$true] %s15_s30 }
   0xa   :  { %p2087_p3 = scmp.ne.s32.totalorder %s12_s27, %s2086_s5  ;;  %p2091_p4 = scmp.lt.s32.totalorder %s12_s27, %s12_s27 }
   0xb   :  { %p2092_p5 = scmp.lt.s32.totalorder %s2086_s5, %s2086_s5 }
   0xd   :  { %p2093_p6 = por %p2092_p5, %p2091_p4 }
   0xf   :  { %p2094_p7 = pnand %p2093_p6, %p2087_p3 }
  0x11   :  { %2097 = shalt.err (!%p2094_p7)  }
  0x12   :  { %s2211_s6 = smov [#allocation4]   ;;  %s2098_s0 = scalar_lea.vmem %s16_s30, 16 }
  0x13   :  { %14 = dma.vmem_to_smem %s12_s27, 16, %s2211_s6, [#allocation2] }
  0x14   :  { %p2099_p8 = scmp.ne.s32.totalorder %s16_s30, %s2098_s0  ;;  %p2103_p9 = scmp.lt.s32.totalorder %s16_s30, %s16_s30 }
  0x15   :  { %p2104_p10 = scmp.lt.s32.totalorder %s2098_s0, %s2098_s0 }
  0x17   :  { %p2105_p11 = por %p2104_p10, %p2103_p9 }
  0x19   :  { %p2106_p12 = pnand %p2105_p11, %p2099_p8 }
  0x1b   :  { %2109 = shalt.err (!%p2106_p12)  }
  0x1c   :  { %s2212_s1 = smov [#allocation5]  }
  0x1d   :  { %18 = dma.vmem_to_smem %s16_s30, 16, %s2212_s1, [#allocation2] }
  0x1e   :  { %2184 = dma.done.wait [#allocation2], 48 }
  0x1f   :  { %2185 = vsyncadd [#allocation2], 4294967248 }
  0x20   :  { %20 = sfence }
  0x21   :  { %21 = vsyncpa [#allocation7], 0 }
  0x22   :  { %23 = vsyncpa [#allocation7 + $0x1], 0 }
  0x23   :  { %24 = vsyncpa [#allocation8], 0 }
  0x24   :  { %26 = vsyncpa [#allocation8 + $0x1], 0  ;;  %s2262_s2 = smov 0   ;;  %s2264_s7 = smov 0  }
  0x25   :  { %s2266_s8 = smov 0   ;;  %s2268_s9 = smov 0  }
  0x26 LB: > { %s2283_s10 = sadd.s32 4294967295, %s2208_s9   ;;  %s1807_s11 = sadd.s32 4294967294, %s2208_s9   ;;  %s2208_s9 = sphi %s2268_s9, %s3016_s9   ;;  %s2204_s8 = sphi %s2266_s8, %s3015_s8   ;;  %s2200_s7 = sphi %s2264_s7, %s3014_s7   ;;  %s2196_s2 = sphi %s2262_s2, %s3013_s2  }
  0x27   : > { %s2287_s12 = sadd.s32 1, %s2208_s9   ;;  %s39_s13 = sadd.s32 1, %s2204_s8 }
  0x28   : > { %s36_s14 = ssub.s32 %s2208_s9, %s2287_s12  ;;  %p46_p13 = scmp.ne.s32.totalorder %s2204_s8, %s2200_s7 }
  0x29   : > { %p37_p0 = scmp.eq.s32.totalorder %s36_s14, 0  ;;  %p47_p1 = scmp.eq.s32.totalorder %s2208_s9, 0 }
  0x2a   : > { %p52_p2 = scmp.ne.s32.totalorder %s2200_s7, %s2196_s2  ;;  %p53_p3 = scmp.eq.s32.totalorder %s2283_s10, 0 }
  0x2b   : > { %s2299_s15 = scalar_select %p37_p0, %s2204_s8, %s39_s13  }
  0x2c   : > { %p48_p4 = por %p47_p1, %p46_p13  ;;  %p2301_p5 = por %p53_p3, %p52_p2 }
  0x2d   : > { %p76_p6 = scmp.eq.s32.totalorder %s2283_s10, 1  ;;  %p82_p7 = scmp.eq.s32.totalorder %s1807_s11, 1 }
  0x2e   : > { %p2003_p9 = scmp.lt.s32.totalorder %s2208_s9, 2  ;;  %s102_s19 = sand.u32 1, %s2204_s8  }
  0x2f   : > { %p2308_p10 = por %p76_p6, %p46_p13  ;;  %p2312_p11 = por %p82_p7, %p52_p2 }
  0x30   : > { %s1972_s20 = smul.u32 768, %s2208_s9  ;;  %p2323_p12 = pnand %p2003_p9, %p48_p4 }
  0x31   : > { %s3007_s17 = scalar_select %p2308_p10, 1, 0 }
  0x32   : > { %s3008_s18 = scalar_select %p2312_p11, 1, 0 }
  0x33   : > { %s1971_s21 = smul.u32 48, %s102_s19  ;;  %s2321_s24 = scalar_lea.hbm %s3001_s3, %s1972_s20 }
  0x34   : > { %s2329_s28 = scalar_lea.sflag [#allocation7], %s102_s19  ;;  %s2110_s29 = scalar_lea.hbm %s2321_s24, 768 }
  0x35   : > { %s106_s26 = scalar_lea.vmem [#allocation6], %s1971_s21  ;;  %p2111_p13 = scmp.ne.s32.totalorder %s2321_s24, %s2110_s29 }
  0x36   : > { %s114_s27 = sshll.u32 %s106_s26, 4  ;;  %p2112_p0 = pneg %p2323_p12  ;;  %s2327_s27 = int_to_ptr.vmem [resolvable:$true] %s114_s27 }
  0x37   : > { %s2115_s6 = scalar_lea.hbm %s3001_s3, 1536  ;;  %p2116_p3 = scmp.lt.u32.totalorder %s2321_s24, %s3001_s3 }
  0x38   : > { %p2113_p1 = pnand %p2112_p0, %p2111_p13  ;;  %p2117_p4 = scmp.lt.u32.totalorder %s2115_s6, %s2110_s29 }
  0x39   : > { %p2119_p7 = scmp.lt.u32.totalorder %s2110_s29, %s2321_s24 }
  0x3a   : > { %p2114_p2 = pneg %p2113_p1  ;;  %p2118_p6 = por %p2117_p4, %p2116_p3 }
  0x3c   : > { %p2120_p9 = por %p2119_p7, %p2118_p6 }
  0x3e   : > { %p2121_p8 = pnand %p2120_p9, %p2114_p2 }
  0x40   : > { %2124 = shalt.err (!%p2121_p8)
}
  0x41   : > { %s2125_s11 = scalar_lea.vmem %s2327_s27, 768  ;;  %s2213_s13 = smov [#allocation6]  }
  0x42   : > { %p2126_p13 = scmp.ne.s32.totalorder %s2327_s27, %s2125_s11  ;;  %s2130_s14 = sshll.u32 %s2213_s13, 4  ;;  %s2131_s14 = int_to_ptr.vmem [resolvable:$false] %s2130_s14 }
  0x43   : > { %s2132_s19 = scalar_lea.vmem %s2131_s14, 1536  ;;  %p2133_p10 = scmp.lt.s32.totalorder %s2327_s27, %s2131_s14 }
  0x44   : > { %p2128_p1 = pnand %p2126_p13, %p2112_p0  ;;  %p2134_p3 = scmp.lt.s32.totalorder %s2132_s19, %s2125_s11 }
  0x46   : > { %p2129_p11 = pneg %p2128_p1  ;;  %p2135_p4 = por %p2134_p3, %p2133_p10 }
  0x48   : > { %p2136_p6 = pnand %p2135_p4, %p2129_p11 }
  0x4a   : > { %2139 = shalt.err (!%p2136_p6)
}
  0x4b   : > { %s2214_s20 = smov 128   ;;  %s2215_s21 = smov 8  }
  0x4c   : > { %1998 = dma.hbm_to_vmem [thread:$0]  (!%p2323_p12), %s2321_s24, 768, %s2327_s27, %s2329_s28, %s2214_s20, %s2214_s20, %s2215_s21  }
  0x4d   : > { %p1813_p8 = scmp.ge.s32.totalorder %s2208_s9, 1  ;;  %p122_p0 = scmp.lt.s32.totalorder %s2208_s9, 3 }
  0x4f   : > { %p123_p2 = pnand %p1813_p8, %p122_p0 }
  0x50   : > { %s2360_s22 = sand.u32 (!%p123_p2), 1, %s2200_s7  }
  0x51   : > { %126 = sbr.rel (%p123_p2) target bundleno = 2877 (0xb3d), region = 24  ;;  %s129_s26 = scalar_lea.sflag (!%p123_p2), [#allocation7], %s2360_s22 }
  0x52   : > { %s1973_s23 = smul.u32 (!%p123_p2), 48, %s2360_s22 }
  0x54   : > { %s2364_s29 = scalar_lea.vmem (!%p123_p2), [#allocation6], %s1973_s23 }
  0x58   : > { %2187 = dma.done.wait (%p2301_p5), %s129_s26, 768  }
  0x59   : > { %2189 = vsyncadd (%p2301_p5), %s129_s26, 4294966528  ;;  %s1814_s24 = sshll.u32 %s2283_s10, 1  ;;  %s2374_s27 = sshll.u32 %s2283_s10, 3 }
  0x5a   : > { %s155_s25 = sld [smem:[#allocation3 + %s1814_s24]]  ;;  %s2376_s28 = scalar_lea.vmem [#allocation9], %s1973_s23 }
  0x60   : > { %p1816_p10 = scmp.ne.s32.totalorder %s155_s25, 0 }
  0x61   : > { %v161_v0 = vld [vmem:[%s2364_s29] sm:$0xff] (!%p1816_p10)  ;;  %v162_v1 = vld [vmem:[%s2364_s29 + $0x8] sm:$0xff] (!%p1816_p10)  ;;  %v163_v2 = vld [vmem:[%s2364_s29 + $0x10] sm:$0xff] (!%p1816_p10) }
  0x62   : > { %160 = sbr.rel (%p1816_p10) target bundleno = 105 (0x69), region = 32  ;;  %164 = vst [vmem:[%s2376_s28] sm:$0xff] (!%p1816_p10), %v161_v0  ;;  %165 = vst [vmem:[%s2376_s28 + $0x8] sm:$0xff] (!%p1816_p10), %v162_v1 }
  0x63   : > { %166 = vst [vmem:[%s2376_s28 + $0x10] sm:$0xff] (!%p1816_p10), %v163_v2 }
  0x69 PF: > { %p1817_p5 = scmp.eq.s32.totalorder %s155_s25, 0 }
  0x6a   : > { %s2385_s16 = sld [smem:[#allocation4 + %s2374_s27]] (!%p1817_p5)  ;;  %s171_s30 = sadd.s32 (!%p1817_p5), 1, %s2374_s27 }
  0x6b   : > { %169 = sbr.rel (%p1817_p5) target bundleno = 1470 (0x5be), region = 36  ;;  %s2390_s5 = sld [smem:[#allocation4 + %s171_s30]] (!%p1817_p5) }
  0x6c   : > { %s173_s6 = sadd.s32 (!%p1817_p5), 2, %s2374_s27  ;;  %s175_s1 = sadd.s32 (!%p1817_p5), 3, %s2374_s27 }
  0x6d   : > { %s2395_s0 = sld [smem:[#allocation4 + %s173_s6]] (!%p1817_p5) }
  0x6e   : > { %s2400_s11 = sld [smem:[#allocation4 + %s175_s1]] (!%p1817_p5) }
  0x6f   : > { %s2403_s13 = sld [smem:[#allocation5 + %s2374_s27]] (!%p1817_p5) }
  0x75   : > { %p1818_p11 = scmp.ne.s32.totalorder %s2403_s13, 0 }
  0x76   : > { %v182_v3 = vld [vmem:[%s2364_s29] sm:$0xff] (!%p1818_p11)  ;;  %v185_v4 = vstv (!%p1818_p11), %s2385_s16  ;;  %v183_v5 = vld [vmem:[%s2364_s29 + $0x8] sm:$0xff] (!%p1818_p11)  ;;  %v184_v6 = vld [vmem:[%s2364_s29 + $0x10] sm:$0xff] (!%p1818_p11) }
  0x77   : > { %181 = sbr.rel (%p1818_p11) target bundleno = 127 (0x7f), region = 40  ;;  %v186_v7 = vmul.f32 (!%p1818_p11), %v185_v4, %v182_v3  ;;  %v187_v8 = vmul.f32 (!%p1818_p11), %v185_v4, %v183_v5  ;;  %v188_v9 = vmul.f32 (!%p1818_p11), %v185_v4, %v184_v6 }
  0x79   : > { %v189_v10 = vmax.f32 (!%p1818_p11), %v186_v7, 0.0  ;;  %v190_v11 = vmax.f32 (!%p1818_p11), %v187_v8, 0.0  ;;  %v191_v12 = vmax.f32 (!%p1818_p11), %v188_v9, 0.0 }
  0x7b   : > { %v192_v13 = vmin.f32 (!%p1818_p11), %v189_v10, 1.0  ;;  %v193_v14 = vmin.f32 (!%p1818_p11), %v190_v11, 1.0  ;;  %v194_v15 = vmin.f32 (!%p1818_p11), %v191_v12, 1.0 }
  0x7d   : > { %195 = vst [vmem:[%s2376_s28] sm:$0xff] (!%p1818_p11), %v192_v13  ;;  %196 = vst [vmem:[%s2376_s28 + $0x8] sm:$0xff] (!%p1818_p11), %v193_v14 }
  0x7e   : > { %197 = vst [vmem:[%s2376_s28 + $0x10] sm:$0xff] %v194_v15 }
  0x7f PF: > { %p1819_p12 = scmp.ne.s32.totalorder %s2403_s13, 1 }
  0x80   : > { %v202_v16 = vld [vmem:[%s2364_s29] sm:$0xff] (!%p1819_p12)  ;;  %v203_v17 = vld [vmem:[%s2364_s29 + $0x8] sm:$0xff] (!%p1819_p12)  ;;  %v204_v18 = vld [vmem:[%s2364_s29 + $0x10] sm:$0xff] (!%p1819_p12)  ;;  %v220_v31 = vstv (!%p1819_p12), %s2390_s5  ;;  %s224_s14 = ssub.f32 (!%p1819_p12), 1.0, %s2390_s5 }
  0x81   : > { %201 = sbr.rel (%p1819_p12) target bundleno = 352 (0x160), region = 44  ;;  %v205_v19 = vmul.f32 (!%p1819_p12), 0.2989, %v202_v16  ;;  %v206_v20 = vmul.f32 (!%p1819_p12), 0.587, %v203_v17  ;;  %v221_v32 = vmul.f32 (!%p1819_p12), %v220_v31, %v202_v16  ;;  %v222_v33 = vmul.f32 (!%p1819_p12), %v220_v31, %v203_v17 }
  0x82   : > { %v208_v21 = vmul.f32 (!%p1819_p12), 0.114, %v204_v18  ;;  %v223_v34 = vmul.f32 (!%p1819_p12), %v220_v31, %v204_v18 }
  0x83   : > { %v207_v22 = vadd.f32 (!%p1819_p12), %v206_v20, %v205_v19 }
  0x85   : > { %v209_v23 = vadd.f32 (!%p1819_p12), %v208_v21, %v207_v22 }
  0x87   : > { %210 = vadd.xlane.f32.xlu0 (!%p1819_p12), %v209_v23 }
 0x114   : > { %v211_v24 = vpop.xlane.xlu0 %210 }
 0x115   : > { %v212_v25 = vrot.slane %v211_v24, 4 }
 0x117   : > { %v213_v26 = vadd.f32 %v212_v25, %v211_v24 }
 0x119   : > { %v214_v27 = vrot.slane %v213_v26, 2 }
 0x11b   : > { %v215_v28 = vadd.f32 %v214_v27, %v213_v26 }
 0x11d   : > { %v216_v29 = vrot.slane %v215_v28, 1 }
 0x11f   : > { %v217_v30 = vadd.f32 %v216_v29, %v215_v28 }
 0x121   : > { %1974 = vpush %v217_v30 }
 0x152   : > { %s1975_s19 = spop %1974 }
 0x153   : > { %s219_s20 = smul.f32 0.00390625, %s1975_s19 }
 0x155   : > { %s225_s21 = smul.f32 %s224_s14, %s219_s20 }
 0x157   : > { %v226_v35 = vstv %s225_s21 }
 0x158   : > { %v227_v36 = vadd.f32 %v226_v35, %v221_v32  ;;  %v228_v37 = vadd.f32 %v226_v35, %v222_v33  ;;  %v229_v38 = vadd.f32 %v226_v35, %v223_v34 }
 0x15a   : > { %v230_v39 = vmax.f32 %v227_v36, 0.0  ;;  %v231_v40 = vmax.f32 %v228_v37, 0.0  ;;  %v232_v41 = vmax.f32 %v229_v38, 0.0 }
 0x15c   : > { %v233_v42 = vmin.f32 %v230_v39, 1.0  ;;  %v234_v43 = vmin.f32 %v231_v40, 1.0  ;;  %v235_v44 = vmin.f32 %v232_v41, 1.0 }
 0x15e   : > { %236 = vst [vmem:[%s2376_s28] sm:$0xff] %v233_v42  ;;  %237 = vst [vmem:[%s2376_s28 + $0x8] sm:$0xff] %v234_v43 }
 0x15f   : > { %238 = vst [vmem:[%s2376_s28 + $0x10] sm:$0xff] %v235_v44 }
 0x160 PF: > { %p1820_p7 = scmp.ne.s32.totalorder %s2403_s13, 2 }
 0x161   : > { %v243_v45 = vld [vmem:[%s2364_s29] sm:$0xff] (!%p1820_p7)  ;;  %v244_v46 = vld [vmem:[%s2364_s29 + $0x8] sm:$0xff] (!%p1820_p7)  ;;  %v245_v47 = vld [vmem:[%s2364_s29 + $0x10] sm:$0xff] (!%p1820_p7)  ;;  %s255_s23 = ssub.f32 (!%p1820_p7), 1.0, %s2395_s0  ;;  %v251_v51 = vstv (!%p1820_p7), %s2395_s0 }
 0x162   : > { %242 = sbr.rel (%p1820_p7) target bundleno = 370 (0x172), region = 48  ;;  %v246_v48 = vmul.f32 (!%p1820_p7), 0.2989, %v243_v45  ;;  %v247_v49 = vmul.f32 (!%p1820_p7), 0.587, %v244_v46  ;;  %v252_v55 = vmul.f32 (!%p1820_p7), %v251_v51, %v243_v45  ;;  %v253_v56 = vmul.f32 (!%p1820_p7), %v251_v51, %v244_v46 }
 0x163   : > { %v249_v50 = vmul.f32 (!%p1820_p7), 0.114, %v245_v47  ;;  %v256_v53 = vstv (!%p1820_p7), %s255_s23  ;;  %v254_v57 = vmul.f32 (!%p1820_p7), %v251_v51, %v245_v47 }
 0x164   : > { %v248_v52 = vadd.f32 (!%p1820_p7), %v247_v49, %v246_v48 }
 0x166   : > { %v250_v54 = vadd.f32 (!%p1820_p7), %v249_v50, %v248_v52 }
 0x168   : > { %v257_v58 = vmul.f32 (!%p1820_p7), %v256_v53, %v250_v54 }
 0x16a   : > { %v258_v59 = vadd.f32 %v257_v58, %v252_v55  ;;  %v259_v60 = vadd.f32 %v257_v58, %v253_v56  ;;  %v260_v61 = vadd.f32 %v257_v58, %v254_v57 }
 0x16c   : > { %v261_v62 = vmax.f32 %v258_v59, 0.0  ;;  %v262_v63 = vmax.f32 %v259_v60, 0.0  ;;  %v263_v0 = vmax.f32 %v260_v61, 0.0 }
 0x16e   : > { %v264_v1 = vmin.f32 %v261_v62, 1.0  ;;  %v265_v2 = vmin.f32 %v262_v63, 1.0  ;;  %v266_v3 = vmin.f32 %v263_v0, 1.0 }
 0x170   : > { %267 = vst [vmem:[%s2376_s28] sm:$0xff] %v264_v1  ;;  %268 = vst [vmem:[%s2376_s28 + $0x8] sm:$0xff] %v265_v2 }
 0x171   : > { %269 = vst [vmem:[%s2376_s28 + $0x10] sm:$0xff] %v266_v3 }
 0x172 PF: > { %p1821_p9 = scmp.ne.s32.totalorder %s2403_s13, 3 }
 0x173   : > { %v274_v4 = vld [vmem:[%s2364_s29] sm:$0xff] (!%p1821_p9)  ;;  %v275_v5 = vld [vmem:[%s2364_s29 + $0x8] sm:$0xff] (!%p1821_p9)  ;;  %v276_v6 = vld [vmem:[%s2364_s29 + $0x10] sm:$0xff] (!%p1821_p9)  ;;  %v318_v37 = vstv (!%p1821_p9), %s2400_s11 }
 0x174   : > { %273 = sbr.rel (%p1821_p9) target bundleno = 441 (0x1b9), region = 52  ;;  %v277_v7 = vmax.f32 (!%p1821_p9), %v274_v4, %v275_v5  ;;  %v279_v8 = vmin.f32 (!%p1821_p9), %v274_v4, %v275_v5 }
 0x176   : > { %v2435_v9 = vmax.f32 (!%p1821_p9), %v277_v7, %v276_v6  ;;  %v280_v10 = vmin.f32 (!%p1821_p9), %v279_v8, %v276_v6 }
 0x178   : > { %vm281_vm0 = vcmp.eq.f32.partialorder (!%p1821_p9), %v2435_v9, %v280_v10  ;;  %v282_v11 = vsub.f32 (!%p1821_p9), %v2435_v9, %v280_v10  ;;  %v294_v17 = vsub.f32 (!%p1821_p9), %v2435_v9, %v274_v4  ;;  %v296_v18 = vsub.f32 (!%p1821_p9), %v2435_v9, %v275_v5 }
 0x179   : > { %v283_v15 = vsel (!%p1821_p9), %vm281_vm0, 1.0, %v2435_v9  ;;  %v298_v19 = vsub.f32 (!%p1821_p9), %v2435_v9, %v276_v6  ;;  %vm303_vm1 = vcmp.eq.f32.partialorder (!%p1821_p9), %v2435_v9, %v275_v5  ;;  %vm304_vm2 = vcmp.ne.f32.partialorder (!%p1821_p9), %v2435_v9, %v274_v4 }
 0x17a   : > { %v289_v12 = vsel (!%p1821_p9), %vm281_vm0, 1.0, %v282_v11  ;;  %vm309_vm3 = vcmp.ne.f32.partialorder (!%p1821_p9), %v2435_v9, %v275_v5  ;;  %vm300_vm4 = vcmp.eq.f32.partialorder (!%p1821_p9), %v2435_v9, %v274_v4  ;;  %vm305_vm5 = vmand (!%p1821_p9), %vm303_vm1, %vm304_vm2 }
 0x17b   : > { %2044 = vrcp.f32 %v289_v12  ;;  %vm310_vm6 = vmand %vm309_vm3, %vm304_vm2 }
 0x17c   : > { %2046 = vrcp.f32 %v283_v15 }
 0x185   : > { %v2045_v13 = vpop.eup %2044 }
 0x186   : > { %v291_v14 = vmul.f32 %v2045_v13, %v289_v12  ;;  %v2047_v33 = vpop.eup %2046 }
 0x187   : > { %v285_v35 = vmul.f32 %v2047_v33, %v283_v15 }
 0x188   : > { %v292_v16 = vsub.f32 2.0, %v291_v14 }
 0x189   : > { %v286_v39 = vsub.f32 2.0, %v285_v35 }
 0x18a   : > { %v293_v20 = vmul.f32 %v2045_v13, %v292_v16 }
 0x18b   : > { %v287_v42 = vmul.f32 %v2047_v33, %v286_v39 }
 0x18c   : > { %v295_v21 = vmul.f32 %v294_v17, %v293_v20  ;;  %v297_v22 = vmul.f32 %v296_v18, %v293_v20  ;;  %v299_v23 = vmul.f32 %v298_v19, %v293_v20 }
 0x18d   : > { %v288_v45 = vmul.f32 %v287_v42, %v282_v11 }
 0x18e   : > { %v301_v24 = vsub.f32 %v299_v23, %v297_v22  ;;  %v306_v25 = vadd.f32 2.0, %v295_v21  ;;  %v311_v26 = vadd.f32 4.0, %v297_v22 }
 0x18f   : > { %v325_v48 = vsub.f32 1.0, %v288_v45 }
 0x190   : > { %v302_v27 = vsel %vm300_vm4, %v301_v24, 0.0  ;;  %v307_v28 = vsub.f32 %v306_v25, %v299_v23  ;;  %v312_v29 = vsub.f32 %v311_v26, %v295_v21 }
 0x191   : > { %v326_v51 = vmul.f32 %v325_v48, %v2435_v9 }
 0x192   : > { %v308_v30 = vsel %vm305_vm5, %v307_v28, 0.0  ;;  %v313_v31 = vsel %vm310_vm6, %v312_v29, 0.0 }
 0x193   : > { %v314_v32 = vadd.f32 %v308_v30, %v302_v27 }
 0x195   : > { %v315_v34 = vadd.f32 %v314_v32, %v313_v31 }
 0x197   : > { %v316_v36 = vmul.f32 0.16666667, %v315_v34 }
 0x199   : > { %v317_v38 = vadd.f32 1.0, %v316_v36 }
 0x19b   : > { %v319_v40 = vadd.f32 %v318_v37, %v317_v38 }
 0x19d   : > { %v320_v41 = vfloor.f32 %v319_v40 }
 0x19f   : > { %v321_v43 = vsub.f32 %v319_v40, %v320_v41 }
 0x1a1   : > { %v322_v44 = vmul.f32 6.0, %v321_v43 }
 0x1a3   : > { %v323_v46 = vfloor.f32 %v322_v44 }
 0x1a5   : > { %v324_v47 = vsub.f32 %v322_v44, %v323_v46  ;;  %vm337_vm7 = vcmp.eq.f32.partialorder %v323_v46, 3.0  ;;  %vm338_vm8 = vcmp.eq.f32.partialorder %v323_v46, 4.0  ;;  %vm336_vm9 = vcmp.eq.f32.partialorder %v323_v46, 2.0 }
 0x1a6   : > { %vm335_vm10 = vcmp.eq.f32.partialorder %v323_v46, 1.0  ;;  %vm334_vm11 = vcmp.eq.f32.partialorder %v323_v46, 0.0 }
 0x1a7   : > { %v327_v49 = vmul.f32 %v324_v47, %v288_v45  ;;  %v330_v50 = vsub.f32 1.0, %v324_v47 }
 0x1a9   : > { %v328_v52 = vsub.f32 1.0, %v327_v49  ;;  %v331_v53 = vmul.f32 %v330_v50, %v288_v45 }
 0x1ab   : > { %v329_v54 = vmul.f32 %v328_v52, %v2435_v9  ;;  %v332_v55 = vsub.f32 1.0, %v331_v53 }
 0x1ad   : > { %v333_v56 = vmul.f32 %v332_v55, %v2435_v9  ;;  %v346_v57 = vsel %vm337_vm7, %v329_v54, %v326_v51  ;;  %v352_v58 = vsel %vm338_vm8, %v2435_v9, %v329_v54 }
 0x1ae   : > { %v347_v59 = vsel %vm336_vm9, %v2435_v9, %v346_v57  ;;  %v353_v60 = vsel %vm337_vm7, %v2435_v9, %v352_v58 }
 0x1af   : > { %v339_v61 = vsel %vm338_vm8, %v333_v56, %v2435_v9  ;;  %v348_v62 = vsel %vm335_vm10, %v2435_v9, %v347_v59  ;;  %v354_v63 = vsel %vm336_vm9, %v333_v56, %v353_v60 }
 0x1b0   : > { %v340_v0 = vsel %vm337_vm7, %v326_v51, %v339_v61  ;;  %v349_v1 = vsel %vm334_vm11, %v333_v56, %v348_v62  ;;  %v355_v2 = vsel %vm335_vm10, %v326_v51, %v354_v63 }
 0x1b1   : > { %v341_v3 = vsel %vm336_vm9, %v326_v51, %v340_v0  ;;  %v350_v4 = vmax.f32 %v349_v1, 0.0  ;;  %v356_v5 = vsel %vm334_vm11, %v326_v51, %v355_v2 }
 0x1b2   : > { %v342_v6 = vsel %vm335_vm10, %v329_v54, %v341_v3  ;;  %v357_v7 = vmax.f32 %v356_v5, 0.0 }
 0x1b3   : > { %v343_v8 = vsel %vm334_vm11, %v2435_v9, %v342_v6  ;;  %v351_v10 = vmin.f32 %v350_v4, 1.0 }
 0x1b4   : > { %v344_v11 = vmax.f32 %v343_v8, 0.0  ;;  %v358_v12 = vmin.f32 %v357_v7, 1.0 }
 0x1b5   : > { %1822 = vst [vmem:[%s2376_s28 + $0x8] sm:$0xff] %v351_v10 }
 0x1b6   : > { %v345_v13 = vmin.f32 %v344_v11, 1.0  ;;  %1823 = vst [vmem:[%s2376_s28 + $0x10] sm:$0xff] %v358_v12 }
 0x1b8   : > { %359 = vst [vmem:[%s2376_s28] sm:$0xff] %v345_v13 }
 0x1b9 PF: > { %s2468_s26 = sld [smem:[#allocation5 + %s171_s30]] }
 0x1bf   : > { %p1824_p13 = scmp.ne.s32.totalorder %s2468_s26, 0 }
 0x1c0   : > { %v369_v9 = vld [vmem:[%s2376_s28] sm:$0xff] (!%p1824_p13)  ;;  %v372_v14 = vstv (!%p1824_p13), %s2385_s16  ;;  %v370_v15 = vld [vmem:[%s2376_s28 + $0x8] sm:$0xff] (!%p1824_p13)  ;;  %v371_v16 = vld [vmem:[%s2376_s28 + $0x10] sm:$0xff] (!%p1824_p13) }
 0x1c1   : > { %368 = sbr.rel (%p1824_p13) target bundleno = 457 (0x1c9), region = 56  ;;  %v373_v17 = vmul.f32 (!%p1824_p13), %v372_v14, %v369_v9  ;;  %v374_v18 = vmul.f32 (!%p1824_p13), %v372_v14, %v370_v15  ;;  %v375_v19 = vmul.f32 (!%p1824_p13), %v372_v14, %v371_v16 }
 0x1c3   : > { %v376_v20 = vmax.f32 (!%p1824_p13), %v373_v17, 0.0  ;;  %v377_v21 = vmax.f32 (!%p1824_p13), %v374_v18, 0.0  ;;  %v378_v22 = vmax.f32 (!%p1824_p13), %v375_v19, 0.0 }
 0x1c5   : > { %v379_v23 = vmin.f32 (!%p1824_p13), %v376_v20, 1.0  ;;  %v380_v24 = vmin.f32 (!%p1824_p13), %v377_v21, 1.0  ;;  %v381_v25 = vmin.f32 (!%p1824_p13), %v378_v22, 1.0 }
 0x1c7   : > { %382 = vst [vmem:[%s2376_s28] sm:$0xff] (!%p1824_p13), %v379_v23  ;;  %383 = vst [vmem:[%s2376_s28 + $0x8] sm:$0xff] (!%p1824_p13), %v380_v24 }
 0x1c8   : > { %384 = vst [vmem:[%s2376_s28 + $0x10] sm:$0xff] %v381_v25 }
 0x1c9 PF: > { %p1825_p1 = scmp.ne.s32.totalorder %s2468_s26, 1 }
 0x1ca   : > { %v407_v41 = vstv (!%p1825_p1), %s2390_s5  ;;  %s411_s25 = ssub.f32 (!%p1825_p1), 1.0, %s2390_s5 }
 0x1cb   : > { %388 = sbr.rel (%p1825_p1) target bundleno = 687 (0x2af), region = 60 }
 0x1cf   : > { %v389_v26 = vld [vmem:[%s2376_s28] sm:$0xff] (!%p1825_p1)  ;;  %v390_v27 = vld [vmem:[%s2376_s28 + $0x8] sm:$0xff] (!%p1825_p1)  ;;  %v391_v28 = vld [vmem:[%s2376_s28 + $0x10] sm:$0xff] (!%p1825_p1) }
 0x1d0   : > { %v392_v29 = vmul.f32 (!%p1825_p1), 0.2989, %v389_v26  ;;  %v393_v30 = vmul.f32 (!%p1825_p1), 0.587, %v390_v27  ;;  %v395_v31 = vmul.f32 (!%p1825_p1), 0.114, %v391_v28  ;;  %v408_v42 = vmul.f32 (!%p1825_p1), %v407_v41, %v389_v26 }
 0x1d1   : > { %v409_v43 = vmul.f32 (!%p1825_p1), %v407_v41, %v390_v27  ;;  %v410_v44 = vmul.f32 (!%p1825_p1), %v407_v41, %v391_v28 }
 0x1d2   : > { %v394_v32 = vadd.f32 %v393_v30, %v392_v29 }
 0x1d4   : > { %v396_v33 = vadd.f32 %v395_v31, %v394_v32 }
 0x1d6   : > { %397 = vadd.xlane.f32.xlu0 %v396_v33 }
 0x263   : > { %v398_v34 = vpop.xlane.xlu0 %397 }
 0x264   : > { %v399_v35 = vrot.slane %v398_v34, 4 }
 0x266   : > { %v400_v36 = vadd.f32 %v399_v35, %v398_v34 }
 0x268   : > { %v401_v37 = vrot.slane %v400_v36, 2 }
 0x26a   : > { %v402_v38 = vadd.f32 %v401_v37, %v400_v36 }
 0x26c   : > { %v403_v39 = vrot.slane %v402_v38, 1 }
 0x26e   : > { %v404_v40 = vadd.f32 %v403_v39, %v402_v38 }
 0x270   : > { %1976 = vpush %v404_v40 }
 0x2a1   : > { %s1977_s30 = spop %1976 }
 0x2a2   : > { %s406_s13 = smul.f32 0.00390625, %s1977_s30 }
 0x2a4   : > { %s412_s14 = smul.f32 %s411_s25, %s406_s13 }
 0x2a6   : > { %v413_v45 = vstv %s412_s14 }
 0x2a7   : > { %v414_v46 = vadd.f32 %v413_v45, %v408_v42  ;;  %v415_v47 = vadd.f32 %v413_v45, %v409_v43  ;;  %v416_v48 = vadd.f32 %v413_v45, %v410_v44 }
 0x2a9   : > { %v417_v49 = vmax.f32 %v414_v46, 0.0  ;;  %v418_v50 = vmax.f32 %v415_v47, 0.0  ;;  %v419_v51 = vmax.f32 %v416_v48, 0.0 }
 0x2ab   : > { %v420_v52 = vmin.f32 %v417_v49, 1.0  ;;  %v421_v53 = vmin.f32 %v418_v50, 1.0  ;;  %v422_v54 = vmin.f32 %v419_v51, 1.0 }
 0x2ad   : > { %423 = vst [vmem:[%s2376_s28] sm:$0xff] %v420_v52  ;;  %424 = vst [vmem:[%s2376_s28 + $0x8] sm:$0xff] %v421_v53 }
 0x2ae   : > { %425 = vst [vmem:[%s2376_s28 + $0x10] sm:$0xff] %v422_v54 }
 0x2af PF: > { %p1826_p3 = scmp.ne.s32.totalorder %s2468_s26, 2 }
 0x2b0   : > { %s442_s19 = ssub.f32 (!%p1826_p3), 1.0, %s2395_s0  ;;  %v438_v61 = vstv (!%p1826_p3), %s2395_s0 }
 0x2b1   : > { %429 = sbr.rel (%p1826_p3) target bundleno = 709 (0x2c5), region = 64 }
 0x2b2   : > { %v443_v63 = vstv (!%p1826_p3), %s442_s19 }
 0x2b4   : > { %v430_v55 = vld [vmem:[%s2376_s28] sm:$0xff] (!%p1826_p3)  ;;  %v431_v56 = vld [vmem:[%s2376_s28 + $0x8] sm:$0xff] (!%p1826_p3) }
 0x2b5   : > { %v432_v57 = vld [vmem:[%s2376_s28 + $0x10] sm:$0xff] (!%p1826_p3)  ;;  %v433_v58 = vmul.f32 (!%p1826_p3), 0.2989, %v430_v55  ;;  %v434_v59 = vmul.f32 (!%p1826_p3), 0.587, %v431_v56  ;;  %v439_v1 = vmul.f32 (!%p1826_p3), %v438_v61, %v430_v55  ;;  %v440_v2 = vmul.f32 (!%p1826_p3), %v438_v61, %v431_v56 }
 0x2b6   : > { %v436_v60 = vmul.f32 (!%p1826_p3), 0.114, %v432_v57  ;;  %v441_v3 = vmul.f32 (!%p1826_p3), %v438_v61, %v432_v57 }
 0x2b7   : > { %v435_v62 = vadd.f32 (!%p1826_p3), %v434_v59, %v433_v58 }
 0x2b9   : > { %v437_v0 = vadd.f32 %v436_v60, %v435_v62 }
 0x2bb   : > { %v444_v4 = vmul.f32 %v443_v63, %v437_v0 }
 0x2bd   : > { %v445_v5 = vadd.f32 %v444_v4, %v439_v1  ;;  %v446_v6 = vadd.f32 %v444_v4, %v440_v2  ;;  %v447_v7 = vadd.f32 %v444_v4, %v441_v3 }
 0x2bf   : > { %v448_v8 = vmax.f32 %v445_v5, 0.0  ;;  %v449_v10 = vmax.f32 %v446_v6, 0.0  ;;  %v450_v11 = vmax.f32 %v447_v7, 0.0 }
 0x2c1   : > { %v451_v12 = vmin.f32 %v448_v8, 1.0  ;;  %v452_v13 = vmin.f32 %v449_v10, 1.0  ;;  %v453_v9 = vmin.f32 %v450_v11, 1.0 }
 0x2c3   : > { %454 = vst [vmem:[%s2376_s28] sm:$0xff] %v451_v12  ;;  %455 = vst [vmem:[%s2376_s28 + $0x8] sm:$0xff] %v452_v13 }
 0x2c4   : > { %456 = vst [vmem:[%s2376_s28 + $0x10] sm:$0xff] %v453_v9 }
 0x2c5 PF: > { %p1827_p4 = scmp.ne.s32.totalorder %s2468_s26, 3 }
 0x2c6   : > { %v505_v47 = vstv (!%p1827_p4), %s2400_s11 }
 0x2c7   : > { %460 = sbr.rel (%p1827_p4) target bundleno = 784 (0x310), region = 68 }
 0x2ca   : > { %v461_v14 = vld [vmem:[%s2376_s28] sm:$0xff] (!%p1827_p4)  ;;  %v462_v15 = vld [vmem:[%s2376_s28 + $0x8] sm:$0xff] (!%p1827_p4) }
 0x2cb   : > { %v463_v16 = vld [vmem:[%s2376_s28 + $0x10] sm:$0xff] (!%p1827_p4)  ;;  %v464_v17 = vmax.f32 (!%p1827_p4), %v461_v14, %v462_v15  ;;  %v466_v18 = vmin.f32 (!%p1827_p4), %v461_v14, %v462_v15 }
 0x2cd   : > { %v2500_v19 = vmax.f32 (!%p1827_p4), %v464_v17, %v463_v16  ;;  %v467_v20 = vmin.f32 (!%p1827_p4), %v466_v18, %v463_v16 }
 0x2cf   : > { %vm468_vm12 = vcmp.eq.f32.partialorder %v2500_v19, %v467_v20  ;;  %v469_v21 = vsub.f32 %v2500_v19, %v467_v20  ;;  %v481_v27 = vsub.f32 %v2500_v19, %v461_v14  ;;  %v483_v28 = vsub.f32 %v2500_v19, %v462_v15 }
 0x2d0   : > { %v470_v25 = vsel %vm468_vm12, 1.0, %v2500_v19  ;;  %v485_v29 = vsub.f32 %v2500_v19, %v463_v16  ;;  %vm490_vm13 = vcmp.eq.f32.partialorder %v2500_v19, %v462_v15  ;;  %vm491_vm14 = vcmp.ne.f32.partialorder %v2500_v19, %v461_v14 }
 0x2d1   : > { %v476_v22 = vsel %vm468_vm12, 1.0, %v469_v21  ;;  %vm496_vm15 = vcmp.ne.f32.partialorder %v2500_v19, %v462_v15  ;;  %vm487_vm0 = vcmp.eq.f32.partialorder %v2500_v19, %v461_v14  ;;  %vm492_vm1 = vmand %vm490_vm13, %vm491_vm14 }
 0x2d2   : > { %2048 = vrcp.f32 %v476_v22  ;;  %vm497_vm2 = vmand %vm496_vm15, %vm491_vm14 }
 0x2d3   : > { %2050 = vrcp.f32 %v470_v25 }
 0x2dc   : > { %v2049_v23 = vpop.eup %2048 }
 0x2dd   : > { %v478_v24 = vmul.f32 %v2049_v23, %v476_v22  ;;  %v2051_v43 = vpop.eup %2050 }
 0x2de   : > { %v472_v45 = vmul.f32 %v2051_v43, %v470_v25 }
 0x2df   : > { %v479_v26 = vsub.f32 2.0, %v478_v24 }
 0x2e0   : > { %v473_v49 = vsub.f32 2.0, %v472_v45 }
 0x2e1   : > { %v480_v30 = vmul.f32 %v2049_v23, %v479_v26 }
 0x2e2   : > { %v474_v52 = vmul.f32 %v2051_v43, %v473_v49 }
 0x2e3   : > { %v482_v31 = vmul.f32 %v481_v27, %v480_v30  ;;  %v484_v32 = vmul.f32 %v483_v28, %v480_v30  ;;  %v486_v33 = vmul.f32 %v485_v29, %v480_v30 }
 0x2e4   : > { %v475_v55 = vmul.f32 %v474_v52, %v469_v21 }
 0x2e5   : > { %v488_v34 = vsub.f32 %v486_v33, %v484_v32  ;;  %v493_v35 = vadd.f32 2.0, %v482_v31  ;;  %v498_v36 = vadd.f32 4.0, %v484_v32 }
 0x2e6   : > { %v512_v58 = vsub.f32 1.0, %v475_v55 }
 0x2e7   : > { %v489_v37 = vsel %vm487_vm0, %v488_v34, 0.0  ;;  %v494_v38 = vsub.f32 %v493_v35, %v486_v33  ;;  %v499_v39 = vsub.f32 %v498_v36, %v482_v31 }
 0x2e8   : > { %v513_v61 = vmul.f32 %v512_v58, %v2500_v19 }
 0x2e9   : > { %v495_v40 = vsel %vm492_vm1, %v494_v38, 0.0  ;;  %v500_v41 = vsel %vm497_vm2, %v499_v39, 0.0 }
 0x2ea   : > { %v501_v42 = vadd.f32 %v495_v40, %v489_v37 }
 0x2ec   : > { %v502_v44 = vadd.f32 %v501_v42, %v500_v41 }
 0x2ee   : > { %v503_v46 = vmul.f32 0.16666667, %v502_v44 }
 0x2f0   : > { %v504_v48 = vadd.f32 1.0, %v503_v46 }
 0x2f2   : > { %v506_v50 = vadd.f32 %v505_v47, %v504_v48 }
 0x2f4   : > { %v507_v51 = vfloor.f32 %v506_v50 }
 0x2f6   : > { %v508_v53 = vsub.f32 %v506_v50, %v507_v51 }
 0x2f8   : > { %v509_v54 = vmul.f32 6.0, %v508_v53 }
 0x2fa   : > { %v510_v56 = vfloor.f32 %v509_v54 }
 0x2fc   : > { %v511_v57 = vsub.f32 %v509_v54, %v510_v56  ;;  %vm524_vm3 = vcmp.eq.f32.partialorder %v510_v56, 3.0  ;;  %vm525_vm4 = vcmp.eq.f32.partialorder %v510_v56, 4.0  ;;  %vm523_vm5 = vcmp.eq.f32.partialorder %v510_v56, 2.0 }
 0x2fd   : > { %vm522_vm6 = vcmp.eq.f32.partialorder %v510_v56, 1.0  ;;  %vm521_vm7 = vcmp.eq.f32.partialorder %v510_v56, 0.0 }
 0x2fe   : > { %v514_v59 = vmul.f32 %v511_v57, %v475_v55  ;;  %v517_v60 = vsub.f32 1.0, %v511_v57 }
 0x300   : > { %v515_v62 = vsub.f32 1.0, %v514_v59  ;;  %v518_v63 = vmul.f32 %v517_v60, %v475_v55 }
 0x302   : > { %v516_v0 = vmul.f32 %v515_v62, %v2500_v19  ;;  %v519_v1 = vsub.f32 1.0, %v518_v63 }
 0x304   : > { %v520_v2 = vmul.f32 %v519_v1, %v2500_v19  ;;  %v533_v3 = vsel %vm524_vm3, %v516_v0, %v513_v61  ;;  %v539_v4 = vsel %vm525_vm4, %v2500_v19, %v516_v0 }
 0x305   : > { %v534_v5 = vsel %vm523_vm5, %v2500_v19, %v533_v3  ;;  %v540_v6 = vsel %vm524_vm3, %v2500_v19, %v539_v4 }
 0x306   : > { %v526_v7 = vsel %vm525_vm4, %v520_v2, %v2500_v19  ;;  %v535_v8 = vsel %vm522_vm6, %v2500_v19, %v534_v5  ;;  %v541_v10 = vsel %vm523_vm5, %v520_v2, %v540_v6 }
 0x307   : > { %v527_v11 = vsel %vm524_vm3, %v513_v61, %v526_v7  ;;  %v536_v12 = vsel %vm521_vm7, %v520_v2, %v535_v8  ;;  %v542_v13 = vsel %vm522_vm6, %v513_v61, %v541_v10 }
 0x308   : > { %v528_v9 = vsel %vm523_vm5, %v513_v61, %v527_v11  ;;  %v537_v14 = vmax.f32 %v536_v12, 0.0  ;;  %v543_v15 = vsel %vm521_vm7, %v513_v61, %v542_v13 }
 0x309   : > { %v529_v16 = vsel %vm522_vm6, %v516_v0, %v528_v9  ;;  %v544_v17 = vmax.f32 %v543_v15, 0.0 }
 0x30a   : > { %v530_v18 = vsel %vm521_vm7, %v2500_v19, %v529_v16  ;;  %v538_v20 = vmin.f32 %v537_v14, 1.0 }
 0x30b   : > { %v531_v21 = vmax.f32 %v530_v18, 0.0  ;;  %v545_v22 = vmin.f32 %v544_v17, 1.0 }
 0x30c   : > { %1828 = vst [vmem:[%s2376_s28 + $0x8] sm:$0xff] %v538_v20 }
 0x30d   : > { %v532_v23 = vmin.f32 %v531_v21, 1.0  ;;  %1829 = vst [vmem:[%s2376_s28 + $0x10] sm:$0xff] %v545_v22 }
 0x30f   : > { %546 = vst [vmem:[%s2376_s28] sm:$0xff] %v532_v23 }
 0x310 PF: > { %s2533_s20 = sld [smem:[#allocation5 + %s173_s6]] }
 0x316   : > { %p1830_p6 = scmp.ne.s32.totalorder %s2533_s20, 0 }
 0x317   : > { %v556_v19 = vld [vmem:[%s2376_s28] sm:$0xff] (!%p1830_p6)  ;;  %v559_v24 = vstv (!%p1830_p6), %s2385_s16  ;;  %v557_v25 = vld [vmem:[%s2376_s28 + $0x8] sm:$0xff] (!%p1830_p6)  ;;  %v558_v26 = vld [vmem:[%s2376_s28 + $0x10] sm:$0xff] (!%p1830_p6) }
 0x318   : > { %555 = sbr.rel (%p1830_p6) target bundleno = 800 (0x320), region = 72  ;;  %v560_v27 = vmul.f32 (!%p1830_p6), %v559_v24, %v556_v19  ;;  %v561_v28 = vmul.f32 (!%p1830_p6), %v559_v24, %v557_v25  ;;  %v562_v29 = vmul.f32 (!%p1830_p6), %v559_v24, %v558_v26 }
 0x31a   : > { %v563_v30 = vmax.f32 (!%p1830_p6), %v560_v27, 0.0  ;;  %v564_v31 = vmax.f32 (!%p1830_p6), %v561_v28, 0.0  ;;  %v565_v32 = vmax.f32 (!%p1830_p6), %v562_v29, 0.0 }
 0x31c   : > { %v566_v33 = vmin.f32 (!%p1830_p6), %v563_v30, 1.0  ;;  %v567_v34 = vmin.f32 (!%p1830_p6), %v564_v31, 1.0  ;;  %v568_v35 = vmin.f32 (!%p1830_p6), %v565_v32, 1.0 }
 0x31e   : > { %569 = vst [vmem:[%s2376_s28] sm:$0xff] (!%p1830_p6), %v566_v33  ;;  %570 = vst [vmem:[%s2376_s28 + $0x8] sm:$0xff] (!%p1830_p6), %v567_v34 }
 0x31f   : > { %571 = vst [vmem:[%s2376_s28 + $0x10] sm:$0xff] %v568_v35 }
 0x320 PF: > { %p1831_p8 = scmp.ne.s32.totalorder %s2533_s20, 1 }
 0x321   : > { %v594_v51 = vstv (!%p1831_p8), %s2390_s5  ;;  %s598_s6 = ssub.f32 (!%p1831_p8), 1.0, %s2390_s5 }
 0x322   : > { %575 = sbr.rel (%p1831_p8) target bundleno = 1030 (0x406), region = 76 }
 0x326   : > { %v576_v36 = vld [vmem:[%s2376_s28] sm:$0xff] (!%p1831_p8)  ;;  %v577_v37 = vld [vmem:[%s2376_s28 + $0x8] sm:$0xff] (!%p1831_p8)  ;;  %v578_v38 = vld [vmem:[%s2376_s28 + $0x10] sm:$0xff] (!%p1831_p8) }
 0x327   : > { %v579_v39 = vmul.f32 (!%p1831_p8), 0.2989, %v576_v36  ;;  %v580_v40 = vmul.f32 (!%p1831_p8), 0.587, %v577_v37  ;;  %v582_v41 = vmul.f32 (!%p1831_p8), 0.114, %v578_v38  ;;  %v595_v52 = vmul.f32 (!%p1831_p8), %v594_v51, %v576_v36 }
 0x328   : > { %v596_v53 = vmul.f32 (!%p1831_p8), %v594_v51, %v577_v37  ;;  %v597_v54 = vmul.f32 (!%p1831_p8), %v594_v51, %v578_v38 }
 0x329   : > { %v581_v42 = vadd.f32 %v580_v40, %v579_v39 }
 0x32b   : > { %v583_v43 = vadd.f32 %v582_v41, %v581_v42 }
 0x32d   : > { %584 = vadd.xlane.f32.xlu0 %v583_v43 }
 0x3ba   : > { %v585_v44 = vpop.xlane.xlu0 %584 }
 0x3bb   : > { %v586_v45 = vrot.slane %v585_v44, 4 }
 0x3bd   : > { %v587_v46 = vadd.f32 %v586_v45, %v585_v44 }
 0x3bf   : > { %v588_v47 = vrot.slane %v587_v46, 2 }
 0x3c1   : > { %v589_v48 = vadd.f32 %v588_v47, %v587_v46 }
 0x3c3   : > { %v590_v49 = vrot.slane %v589_v48, 1 }
 0x3c5   : > { %v591_v50 = vadd.f32 %v590_v49, %v589_v48 }
 0x3c7   : > { %1978 = vpush %v591_v50 }
 0x3f8   : > { %s1979_s21 = spop %1978 }
 0x3f9   : > { %s593_s23 = smul.f32 0.00390625, %s1979_s21 }
 0x3fb   : > { %s599_s26 = smul.f32 %s598_s6, %s593_s23 }
 0x3fd   : > { %v600_v55 = vstv %s599_s26 }
 0x3fe   : > { %v601_v56 = vadd.f32 %v600_v55, %v595_v52  ;;  %v602_v57 = vadd.f32 %v600_v55, %v596_v53  ;;  %v603_v58 = vadd.f32 %v600_v55, %v597_v54 }
 0x400   : > { %v604_v59 = vmax.f32 %v601_v56, 0.0  ;;  %v605_v60 = vmax.f32 %v602_v57, 0.0  ;;  %v606_v61 = vmax.f32 %v603_v58, 0.0 }
 0x402   : > { %v607_v62 = vmin.f32 %v604_v59, 1.0  ;;  %v608_v63 = vmin.f32 %v605_v60, 1.0  ;;  %v609_v0 = vmin.f32 %v606_v61, 1.0 }
 0x404   : > { %610 = vst [vmem:[%s2376_s28] sm:$0xff] %v607_v62  ;;  %611 = vst [vmem:[%s2376_s28 + $0x8] sm:$0xff] %v608_v63 }
 0x405   : > { %612 = vst [vmem:[%s2376_s28 + $0x10] sm:$0xff] %v609_v0 }
 0x406 PF: > { %p1832_p0 = scmp.ne.s32.totalorder %s2533_s20, 2 }
 0x407   : > { %s629_s25 = ssub.f32 (!%p1832_p0), 1.0, %s2395_s0  ;;  %v625_v7 = vstv (!%p1832_p0), %s2395_s0 }
 0x408   : > { %616 = sbr.rel (%p1832_p0) target bundleno = 1052 (0x41c), region = 80 }
 0x409   : > { %v630_v10 = vstv (!%p1832_p0), %s629_s25 }
 0x40b   : > { %v617_v1 = vld [vmem:[%s2376_s28] sm:$0xff] (!%p1832_p0)  ;;  %v618_v2 = vld [vmem:[%s2376_s28 + $0x8] sm:$0xff] (!%p1832_p0) }
 0x40c   : > { %v619_v3 = vld [vmem:[%s2376_s28 + $0x10] sm:$0xff] (!%p1832_p0)  ;;  %v620_v4 = vmul.f32 (!%p1832_p0), 0.2989, %v617_v1  ;;  %v621_v5 = vmul.f32 (!%p1832_p0), 0.587, %v618_v2  ;;  %v626_v12 = vmul.f32 (!%p1832_p0), %v625_v7, %v617_v1  ;;  %v627_v13 = vmul.f32 (!%p1832_p0), %v625_v7, %v618_v2 }
 0x40d   : > { %v623_v6 = vmul.f32 (!%p1832_p0), 0.114, %v619_v3  ;;  %v628_v9 = vmul.f32 (!%p1832_p0), %v625_v7, %v619_v3 }
 0x40e   : > { %v622_v8 = vadd.f32 (!%p1832_p0), %v621_v5, %v620_v4 }
 0x410   : > { %v624_v11 = vadd.f32 %v623_v6, %v622_v8 }
 0x412   : > { %v631_v14 = vmul.f32 %v630_v10, %v624_v11 }
 0x414   : > { %v632_v15 = vadd.f32 %v631_v14, %v626_v12  ;;  %v633_v16 = vadd.f32 %v631_v14, %v627_v13  ;;  %v634_v17 = vadd.f32 %v631_v14, %v628_v9 }
 0x416   : > { %v635_v18 = vmax.f32 %v632_v15, 0.0  ;;  %v636_v20 = vmax.f32 %v633_v16, 0.0  ;;  %v637_v21 = vmax.f32 %v634_v17, 0.0 }
 0x418   : > { %v638_v22 = vmin.f32 %v635_v18, 1.0  ;;  %v639_v23 = vmin.f32 %v636_v20, 1.0  ;;  %v640_v19 = vmin.f32 %v637_v21, 1.0 }
 0x41a   : > { %641 = vst [vmem:[%s2376_s28] sm:$0xff] %v638_v22  ;;  %642 = vst [vmem:[%s2376_s28 + $0x8] sm:$0xff] %v639_v23 }
 0x41b   : > { %643 = vst [vmem:[%s2376_s28 + $0x10] sm:$0xff] %v640_v19 }
 0x41c PF: > { %p1833_p2 = scmp.ne.s32.totalorder %s2533_s20, 3 }
 0x41d   : > { %v692_v57 = vstv (!%p1833_p2), %s2400_s11 }
 0x41e   : > { %647 = sbr.rel (%p1833_p2) target bundleno = 1127 (0x467), region = 84 }
 0x421   : > { %v648_v24 = vld [vmem:[%s2376_s28] sm:$0xff] (!%p1833_p2)  ;;  %v649_v25 = vld [vmem:[%s2376_s28 + $0x8] sm:$0xff] (!%p1833_p2) }
 0x422   : > { %v650_v26 = vld [vmem:[%s2376_s28 + $0x10] sm:$0xff] (!%p1833_p2)  ;;  %v651_v27 = vmax.f32 (!%p1833_p2), %v648_v24, %v649_v25  ;;  %v653_v28 = vmin.f32 (!%p1833_p2), %v648_v24, %v649_v25 }
 0x424   : > { %v2565_v29 = vmax.f32 (!%p1833_p2), %v651_v27, %v650_v26  ;;  %v654_v30 = vmin.f32 (!%p1833_p2), %v653_v28, %v650_v26 }
 0x426   : > { %vm655_vm8 = vcmp.eq.f32.partialorder %v2565_v29, %v654_v30  ;;  %v656_v31 = vsub.f32 %v2565_v29, %v654_v30  ;;  %v668_v37 = vsub.f32 %v2565_v29, %v648_v24  ;;  %v670_v38 = vsub.f32 %v2565_v29, %v649_v25 }
 0x427   : > { %v657_v35 = vsel %vm655_vm8, 1.0, %v2565_v29  ;;  %v672_v39 = vsub.f32 %v2565_v29, %v650_v26  ;;  %vm677_vm9 = vcmp.eq.f32.partialorder %v2565_v29, %v649_v25  ;;  %vm678_vm10 = vcmp.ne.f32.partialorder %v2565_v29, %v648_v24 }
 0x428   : > { %v663_v32 = vsel %vm655_vm8, 1.0, %v656_v31  ;;  %vm683_vm11 = vcmp.ne.f32.partialorder %v2565_v29, %v649_v25  ;;  %vm674_vm12 = vcmp.eq.f32.partialorder %v2565_v29, %v648_v24  ;;  %vm679_vm13 = vmand %vm677_vm9, %vm678_vm10 }
 0x429   : > { %2052 = vrcp.f32 %v663_v32  ;;  %vm684_vm14 = vmand %vm683_vm11, %vm678_vm10 }
 0x42a   : > { %2054 = vrcp.f32 %v657_v35 }
 0x433   : > { %v2053_v33 = vpop.eup %2052 }
 0x434   : > { %v665_v34 = vmul.f32 %v2053_v33, %v663_v32  ;;  %v2055_v53 = vpop.eup %2054 }
 0x435   : > { %v659_v55 = vmul.f32 %v2055_v53, %v657_v35 }
 0x436   : > { %v666_v36 = vsub.f32 2.0, %v665_v34 }
 0x437   : > { %v660_v59 = vsub.f32 2.0, %v659_v55 }
 0x438   : > { %v667_v40 = vmul.f32 %v2053_v33, %v666_v36 }
 0x439   : > { %v661_v62 = vmul.f32 %v2055_v53, %v660_v59 }
 0x43a   : > { %v669_v41 = vmul.f32 %v668_v37, %v667_v40  ;;  %v671_v42 = vmul.f32 %v670_v38, %v667_v40  ;;  %v673_v43 = vmul.f32 %v672_v39, %v667_v40 }
 0x43b   : > { %v662_v1 = vmul.f32 %v661_v62, %v656_v31 }
 0x43c   : > { %v675_v44 = vsub.f32 %v673_v43, %v671_v42  ;;  %v680_v45 = vadd.f32 2.0, %v669_v41  ;;  %v685_v46 = vadd.f32 4.0, %v671_v42 }
 0x43d   : > { %v699_v4 = vsub.f32 1.0, %v662_v1 }
 0x43e   : > { %v676_v47 = vsel %vm674_vm12, %v675_v44, 0.0  ;;  %v681_v48 = vsub.f32 %v680_v45, %v673_v43  ;;  %v686_v49 = vsub.f32 %v685_v46, %v669_v41 }
 0x43f   : > { %v700_v7 = vmul.f32 %v699_v4, %v2565_v29 }
 0x440   : > { %v682_v50 = vsel %vm679_vm13, %v681_v48, 0.0  ;;  %v687_v51 = vsel %vm684_vm14, %v686_v49, 0.0 }
 0x441   : > { %v688_v52 = vadd.f32 %v682_v50, %v676_v47 }
 0x443   : > { %v689_v54 = vadd.f32 %v688_v52, %v687_v51 }
 0x445   : > { %v690_v56 = vmul.f32 0.16666667, %v689_v54 }
 0x447   : > { %v691_v58 = vadd.f32 1.0, %v690_v56 }
 0x449   : > { %v693_v60 = vadd.f32 %v692_v57, %v691_v58 }
 0x44b   : > { %v694_v61 = vfloor.f32 %v693_v60 }
 0x44d   : > { %v695_v63 = vsub.f32 %v693_v60, %v694_v61 }
 0x44f   : > { %v696_v0 = vmul.f32 6.0, %v695_v63 }
 0x451   : > { %v697_v2 = vfloor.f32 %v696_v0 }
 0x453   : > { %v698_v3 = vsub.f32 %v696_v0, %v697_v2  ;;  %vm711_vm15 = vcmp.eq.f32.partialorder %v697_v2, 3.0  ;;  %vm712_vm0 = vcmp.eq.f32.partialorder %v697_v2, 4.0  ;;  %vm710_vm1 = vcmp.eq.f32.partialorder %v697_v2, 2.0 }
 0x454   : > { %vm709_vm2 = vcmp.eq.f32.partialorder %v697_v2, 1.0  ;;  %vm708_vm3 = vcmp.eq.f32.partialorder %v697_v2, 0.0 }
 0x455   : > { %v701_v5 = vmul.f32 %v698_v3, %v662_v1  ;;  %v704_v6 = vsub.f32 1.0, %v698_v3 }
 0x457   : > { %v702_v8 = vsub.f32 1.0, %v701_v5  ;;  %v705_v10 = vmul.f32 %v704_v6, %v662_v1 }
 0x459   : > { %v703_v11 = vmul.f32 %v702_v8, %v2565_v29  ;;  %v706_v12 = vsub.f32 1.0, %v705_v10 }
 0x45b   : > { %v707_v13 = vmul.f32 %v706_v12, %v2565_v29  ;;  %v720_v9 = vsel %vm711_vm15, %v703_v11, %v700_v7  ;;  %v726_v14 = vsel %vm712_vm0, %v2565_v29, %v703_v11 }
 0x45c   : > { %v721_v15 = vsel %vm710_vm1, %v2565_v29, %v720_v9  ;;  %v727_v16 = vsel %vm711_vm15, %v2565_v29, %v726_v14 }
 0x45d   : > { %v713_v17 = vsel %vm712_vm0, %v707_v13, %v2565_v29  ;;  %v722_v18 = vsel %vm709_vm2, %v2565_v29, %v721_v15  ;;  %v728_v20 = vsel %vm710_vm1, %v707_v13, %v727_v16 }
 0x45e   : > { %v714_v21 = vsel %vm711_vm15, %v700_v7, %v713_v17  ;;  %v723_v22 = vsel %vm708_vm3, %v707_v13, %v722_v18  ;;  %v729_v23 = vsel %vm709_vm2, %v700_v7, %v728_v20 }
 0x45f   : > { %v715_v19 = vsel %vm710_vm1, %v700_v7, %v714_v21  ;;  %v724_v24 = vmax.f32 %v723_v22, 0.0  ;;  %v730_v25 = vsel %vm708_vm3, %v700_v7, %v729_v23 }
 0x460   : > { %v716_v26 = vsel %vm709_vm2, %v703_v11, %v715_v19  ;;  %v731_v27 = vmax.f32 %v730_v25, 0.0 }
 0x461   : > { %v717_v28 = vsel %vm708_vm3, %v2565_v29, %v716_v26  ;;  %v725_v30 = vmin.f32 %v724_v24, 1.0 }
 0x462   : > { %v718_v31 = vmax.f32 %v717_v28, 0.0  ;;  %v732_v32 = vmin.f32 %v731_v27, 1.0 }
 0x463   : > { %1834 = vst [vmem:[%s2376_s28 + $0x8] sm:$0xff] %v725_v30 }
 0x464   : > { %v719_v33 = vmin.f32 %v718_v31, 1.0  ;;  %1835 = vst [vmem:[%s2376_s28 + $0x10] sm:$0xff] %v732_v32 }
 0x466   : > { %733 = vst [vmem:[%s2376_s28] sm:$0xff] %v719_v33 }
 0x467 PF: > { %s2598_s30 = sld [smem:[#allocation5 + %s175_s1]] }
 0x46d   : > { %p1836_p10 = scmp.ne.s32.totalorder %s2598_s30, 0 }
 0x46e   : > { %v743_v29 = vld [vmem:[%s2376_s28] sm:$0xff] (!%p1836_p10)  ;;  %v746_v34 = vstv (!%p1836_p10), %s2385_s16  ;;  %v744_v35 = vld [vmem:[%s2376_s28 + $0x8] sm:$0xff] (!%p1836_p10)  ;;  %v745_v36 = vld [vmem:[%s2376_s28 + $0x10] sm:$0xff] (!%p1836_p10) }
 0x46f   : > { %742 = sbr.rel (%p1836_p10) target bundleno = 1143 (0x477), region = 88  ;;  %v747_v37 = vmul.f32 (!%p1836_p10), %v746_v34, %v743_v29  ;;  %v748_v38 = vmul.f32 (!%p1836_p10), %v746_v34, %v744_v35  ;;  %v749_v39 = vmul.f32 (!%p1836_p10), %v746_v34, %v745_v36 }
 0x471   : > { %v750_v40 = vmax.f32 (!%p1836_p10), %v747_v37, 0.0  ;;  %v751_v41 = vmax.f32 (!%p1836_p10), %v748_v38, 0.0  ;;  %v752_v42 = vmax.f32 (!%p1836_p10), %v749_v39, 0.0 }
 0x473   : > { %v753_v43 = vmin.f32 (!%p1836_p10), %v750_v40, 1.0  ;;  %v754_v44 = vmin.f32 (!%p1836_p10), %v751_v41, 1.0  ;;  %v755_v45 = vmin.f32 (!%p1836_p10), %v752_v42, 1.0 }
 0x475   : > { %756 = vst [vmem:[%s2376_s28] sm:$0xff] (!%p1836_p10), %v753_v43  ;;  %757 = vst [vmem:[%s2376_s28 + $0x8] sm:$0xff] (!%p1836_p10), %v754_v44 }
 0x476   : > { %758 = vst [vmem:[%s2376_s28 + $0x10] sm:$0xff] %v755_v45 }
 0x477 PF: > { %p1837_p5 = scmp.ne.s32.totalorder %s2598_s30, 1 }
 0x478   : > { %v781_v61 = vstv (!%p1837_p5), %s2390_s5  ;;  %s785_s16 = ssub.f32 (!%p1837_p5), 1.0, %s2390_s5 }
 0x479   : > { %762 = sbr.rel (%p1837_p5) target bundleno = 1373 (0x55d), region = 92 }
 0x47d   : > { %v763_v46 = vld [vmem:[%s2376_s28] sm:$0xff] (!%p1837_p5)  ;;  %v764_v47 = vld [vmem:[%s2376_s28 + $0x8] sm:$0xff] (!%p1837_p5)  ;;  %v765_v48 = vld [vmem:[%s2376_s28 + $0x10] sm:$0xff] (!%p1837_p5) }
 0x47e   : > { %v766_v49 = vmul.f32 (!%p1837_p5), 0.2989, %v763_v46  ;;  %v767_v50 = vmul.f32 (!%p1837_p5), 0.587, %v764_v47  ;;  %v769_v51 = vmul.f32 (!%p1837_p5), 0.114, %v765_v48  ;;  %v782_v62 = vmul.f32 (!%p1837_p5), %v781_v61, %v763_v46 }
 0x47f   : > { %v783_v63 = vmul.f32 (!%p1837_p5), %v781_v61, %v764_v47  ;;  %v784_v0 = vmul.f32 (!%p1837_p5), %v781_v61, %v765_v48 }
 0x480   : > { %v768_v52 = vadd.f32 %v767_v50, %v766_v49 }
 0x482   : > { %v770_v53 = vadd.f32 %v769_v51, %v768_v52 }
 0x484   : > { %771 = vadd.xlane.f32.xlu0 %v770_v53 }
 0x511   : > { %v772_v54 = vpop.xlane.xlu0 %771 }
 0x512   : > { %v773_v55 = vrot.slane %v772_v54, 4 }
 0x514   : > { %v774_v56 = vadd.f32 %v773_v55, %v772_v54 }
 0x516   : > { %v775_v57 = vrot.slane %v774_v56, 2 }
 0x518   : > { %v776_v58 = vadd.f32 %v775_v57, %v774_v56 }
 0x51a   : > { %v777_v59 = vrot.slane %v776_v58, 1 }
 0x51c   : > { %v778_v60 = vadd.f32 %v777_v59, %v776_v58 }
 0x51e   : > { %1980 = vpush %v778_v60 }
 0x54f   : > { %s1981_s1 = spop %1980 }
 0x550   : > { %s780_s13 = smul.f32 0.00390625, %s1981_s1 }
 0x552   : > { %s786_s14 = smul.f32 %s785_s16, %s780_s13 }
 0x554   : > { %v787_v1 = vstv %s786_s14 }
 0x555   : > { %v788_v2 = vadd.f32 %v787_v1, %v782_v62  ;;  %v789_v3 = vadd.f32 %v787_v1, %v783_v63  ;;  %v790_v4 = vadd.f32 %v787_v1, %v784_v0 }
 0x557   : > { %v791_v5 = vmax.f32 %v788_v2, 0.0  ;;  %v792_v6 = vmax.f32 %v789_v3, 0.0  ;;  %v793_v7 = vmax.f32 %v790_v4, 0.0 }
 0x559   : > { %v794_v8 = vmin.f32 %v791_v5, 1.0  ;;  %v795_v10 = vmin.f32 %v792_v6, 1.0  ;;  %v796_v11 = vmin.f32 %v793_v7, 1.0 }
 0x55b   : > { %797 = vst [vmem:[%s2376_s28] sm:$0xff] %v794_v8  ;;  %798 = vst [vmem:[%s2376_s28 + $0x8] sm:$0xff] %v795_v10 }
 0x55c   : > { %799 = vst [vmem:[%s2376_s28 + $0x10] sm:$0xff] %v796_v11 }
 0x55d PF: > { %p1838_p11 = scmp.ne.s32.totalorder %s2598_s30, 2 }
 0x55e   : > { %s816_s5 = ssub.f32 (!%p1838_p11), 1.0, %s2395_s0  ;;  %v812_v17 = vstv (!%p1838_p11), %s2395_s0 }
 0x55f   : > { %803 = sbr.rel (%p1838_p11) target bundleno = 1395 (0x573), region = 96 }
 0x560   : > { %v817_v20 = vstv (!%p1838_p11), %s816_s5 }
 0x562   : > { %v804_v12 = vld [vmem:[%s2376_s28] sm:$0xff] (!%p1838_p11)  ;;  %v805_v13 = vld [vmem:[%s2376_s28 + $0x8] sm:$0xff] (!%p1838_p11) }
 0x563   : > { %v806_v9 = vld [vmem:[%s2376_s28 + $0x10] sm:$0xff] (!%p1838_p11)  ;;  %v807_v14 = vmul.f32 (!%p1838_p11), 0.2989, %v804_v12  ;;  %v808_v15 = vmul.f32 (!%p1838_p11), 0.587, %v805_v13  ;;  %v813_v22 = vmul.f32 (!%p1838_p11), %v812_v17, %v804_v12  ;;  %v814_v23 = vmul.f32 (!%p1838_p11), %v812_v17, %v805_v13 }
 0x564   : > { %v810_v16 = vmul.f32 (!%p1838_p11), 0.114, %v806_v9  ;;  %v815_v19 = vmul.f32 (!%p1838_p11), %v812_v17, %v806_v9 }
 0x565   : > { %v809_v18 = vadd.f32 (!%p1838_p11), %v808_v15, %v807_v14 }
 0x567   : > { %v811_v21 = vadd.f32 %v810_v16, %v809_v18 }
 0x569   : > { %v818_v24 = vmul.f32 %v817_v20, %v811_v21 }
 0x56b   : > { %v819_v25 = vadd.f32 %v818_v24, %v813_v22  ;;  %v820_v26 = vadd.f32 %v818_v24, %v814_v23  ;;  %v821_v27 = vadd.f32 %v818_v24, %v815_v19 }
 0x56d   : > { %v822_v28 = vmax.f32 %v819_v25, 0.0  ;;  %v823_v30 = vmax.f32 %v820_v26, 0.0  ;;  %v824_v31 = vmax.f32 %v821_v27, 0.0 }
 0x56f   : > { %v825_v32 = vmin.f32 %v822_v28, 1.0  ;;  %v826_v33 = vmin.f32 %v823_v30, 1.0  ;;  %v827_v29 = vmin.f32 %v824_v31, 1.0 }
 0x571   : > { %828 = vst [vmem:[%s2376_s28] sm:$0xff] %v825_v32  ;;  %829 = vst [vmem:[%s2376_s28 + $0x8] sm:$0xff] %v826_v33 }
 0x572   : > { %830 = vst [vmem:[%s2376_s28 + $0x10] sm:$0xff] %v827_v29 }
 0x573 PF: > { %p1839_p12 = scmp.ne.s32.totalorder %s2598_s30, 3 }
 0x574   : > { %v879_v3 = vstv (!%p1839_p12), %s2400_s11 }
 0x575   : > { %834 = sbr.rel (%p1839_p12) target bundleno = 1470 (0x5be), region = 100 }
 0x578   : > { %v835_v34 = vld [vmem:[%s2376_s28] sm:$0xff] (!%p1839_p12)  ;;  %v836_v35 = vld [vmem:[%s2376_s28 + $0x8] sm:$0xff] (!%p1839_p12) }
 0x579   : > { %v837_v36 = vld [vmem:[%s2376_s28 + $0x10] sm:$0xff] (!%p1839_p12)  ;;  %v838_v37 = vmax.f32 (!%p1839_p12), %v835_v34, %v836_v35  ;;  %v840_v38 = vmin.f32 (!%p1839_p12), %v835_v34, %v836_v35 }
 0x57b   : > { %v2630_v39 = vmax.f32 (!%p1839_p12), %v838_v37, %v837_v36  ;;  %v841_v40 = vmin.f32 (!%p1839_p12), %v840_v38, %v837_v36 }
 0x57d   : > { %vm842_vm4 = vcmp.eq.f32.partialorder %v2630_v39, %v841_v40  ;;  %v843_v41 = vsub.f32 %v2630_v39, %v841_v40  ;;  %v855_v47 = vsub.f32 %v2630_v39, %v835_v34  ;;  %v857_v48 = vsub.f32 %v2630_v39, %v836_v35 }
 0x57e   : > { %v844_v45 = vsel %vm842_vm4, 1.0, %v2630_v39  ;;  %v859_v49 = vsub.f32 %v2630_v39, %v837_v36  ;;  %vm864_vm5 = vcmp.eq.f32.partialorder %v2630_v39, %v836_v35  ;;  %vm865_vm6 = vcmp.ne.f32.partialorder %v2630_v39, %v835_v34 }
 0x57f   : > { %v850_v42 = vsel %vm842_vm4, 1.0, %v843_v41  ;;  %vm870_vm7 = vcmp.ne.f32.partialorder %v2630_v39, %v836_v35  ;;  %vm861_vm8 = vcmp.eq.f32.partialorder %v2630_v39, %v835_v34  ;;  %vm866_vm9 = vmand %vm864_vm5, %vm865_vm6 }
 0x580   : > { %2056 = vrcp.f32 %v850_v42  ;;  %vm871_vm10 = vmand %vm870_vm7, %vm865_vm6 }
 0x581   : > { %2058 = vrcp.f32 %v844_v45 }
 0x58a   : > { %v2057_v43 = vpop.eup %2056 }
 0x58b   : > { %v852_v44 = vmul.f32 %v2057_v43, %v850_v42  ;;  %v2059_v63 = vpop.eup %2058 }
 0x58c   : > { %v846_v1 = vmul.f32 %v2059_v63, %v844_v45 }
 0x58d   : > { %v853_v46 = vsub.f32 2.0, %v852_v44 }
 0x58e   : > { %v847_v5 = vsub.f32 2.0, %v846_v1 }
 0x58f   : > { %v854_v50 = vmul.f32 %v2057_v43, %v853_v46 }
 0x590   : > { %v848_v8 = vmul.f32 %v2059_v63, %v847_v5 }
 0x591   : > { %v856_v51 = vmul.f32 %v855_v47, %v854_v50  ;;  %v858_v52 = vmul.f32 %v857_v48, %v854_v50  ;;  %v860_v53 = vmul.f32 %v859_v49, %v854_v50 }
 0x592   : > { %v849_v12 = vmul.f32 %v848_v8, %v843_v41 }
 0x593   : > { %v862_v54 = vsub.f32 %v860_v53, %v858_v52  ;;  %v867_v55 = vadd.f32 2.0, %v856_v51  ;;  %v872_v56 = vadd.f32 4.0, %v858_v52 }
 0x594   : > { %v886_v14 = vsub.f32 1.0, %v849_v12 }
 0x595   : > { %v863_v57 = vsel %vm861_vm8, %v862_v54, 0.0  ;;  %v868_v58 = vsub.f32 %v867_v55, %v860_v53  ;;  %v873_v59 = vsub.f32 %v872_v56, %v856_v51 }
 0x596   : > { %v887_v17 = vmul.f32 %v886_v14, %v2630_v39 }
 0x597   : > { %v869_v60 = vsel %vm866_vm9, %v868_v58, 0.0  ;;  %v874_v61 = vsel %vm871_vm10, %v873_v59, 0.0 }
 0x598   : > { %v875_v62 = vadd.f32 %v869_v60, %v863_v57 }
 0x59a   : > { %v876_v0 = vadd.f32 %v875_v62, %v874_v61 }
 0x59c   : > { %v877_v2 = vmul.f32 0.16666667, %v876_v0 }
 0x59e   : > { %v878_v4 = vadd.f32 1.0, %v877_v2 }
 0x5a0   : > { %v880_v6 = vadd.f32 %v879_v3, %v878_v4 }
 0x5a2   : > { %v881_v7 = vfloor.f32 %v880_v6 }
 0x5a4   : > { %v882_v10 = vsub.f32 %v880_v6, %v881_v7 }
 0x5a6   : > { %v883_v11 = vmul.f32 6.0, %v882_v10 }
 0x5a8   : > { %v884_v13 = vfloor.f32 %v883_v11 }
 0x5aa   : > { %v885_v9 = vsub.f32 %v883_v11, %v884_v13  ;;  %vm898_vm11 = vcmp.eq.f32.partialorder %v884_v13, 3.0  ;;  %vm899_vm12 = vcmp.eq.f32.partialorder %v884_v13, 4.0  ;;  %vm897_vm13 = vcmp.eq.f32.partialorder %v884_v13, 2.0 }
 0x5ab   : > { %vm896_vm14 = vcmp.eq.f32.partialorder %v884_v13, 1.0  ;;  %vm895_vm15 = vcmp.eq.f32.partialorder %v884_v13, 0.0 }
 0x5ac   : > { %v888_v15 = vmul.f32 %v885_v9, %v849_v12  ;;  %v891_v16 = vsub.f32 1.0, %v885_v9 }
 0x5ae   : > { %v889_v18 = vsub.f32 1.0, %v888_v15  ;;  %v892_v20 = vmul.f32 %v891_v16, %v849_v12 }
 0x5b0   : > { %v890_v21 = vmul.f32 %v889_v18, %v2630_v39  ;;  %v893_v22 = vsub.f32 1.0, %v892_v20 }
 0x5b2   : > { %v894_v23 = vmul.f32 %v893_v22, %v2630_v39  ;;  %v907_v19 = vsel %vm898_vm11, %v890_v21, %v887_v17  ;;  %v913_v24 = vsel %vm899_vm12, %v2630_v39, %v890_v21 }
 0x5b3   : > { %v908_v25 = vsel %vm897_vm13, %v2630_v39, %v907_v19  ;;  %v914_v26 = vsel %vm898_vm11, %v2630_v39, %v913_v24 }
 0x5b4   : > { %v900_v27 = vsel %vm899_vm12, %v894_v23, %v2630_v39  ;;  %v909_v28 = vsel %vm896_vm14, %v2630_v39, %v908_v25  ;;  %v915_v30 = vsel %vm897_vm13, %v894_v23, %v914_v26 }
 0x5b5   : > { %v901_v31 = vsel %vm898_vm11, %v887_v17, %v900_v27  ;;  %v910_v32 = vsel %vm895_vm15, %v894_v23, %v909_v28  ;;  %v916_v33 = vsel %vm896_vm14, %v887_v17, %v915_v30 }
 0x5b6   : > { %v902_v29 = vsel %vm897_vm13, %v887_v17, %v901_v31  ;;  %v911_v34 = vmax.f32 %v910_v32, 0.0  ;;  %v917_v35 = vsel %vm895_vm15, %v887_v17, %v916_v33 }
 0x5b7   : > { %v903_v36 = vsel %vm896_vm14, %v890_v21, %v902_v29  ;;  %v918_v37 = vmax.f32 %v917_v35, 0.0 }
 0x5b8   : > { %v904_v38 = vsel %vm895_vm15, %v2630_v39, %v903_v36  ;;  %v912_v40 = vmin.f32 %v911_v34, 1.0 }
 0x5b9   : > { %v905_v41 = vmax.f32 %v904_v38, 0.0  ;;  %v919_v42 = vmin.f32 %v918_v37, 1.0 }
 0x5ba   : > { %1840 = vst [vmem:[%s2376_s28 + $0x8] sm:$0xff] %v912_v40 }
 0x5bb   : > { %v906_v43 = vmin.f32 %v905_v41, 1.0  ;;  %1841 = vst [vmem:[%s2376_s28 + $0x10] sm:$0xff] %v919_v42 }
 0x5bd   : > { %920 = vst [vmem:[%s2376_s28] sm:$0xff] %v906_v43 }
 0x5be PF: > { %s925_s0 = sadd.s32 1, %s1814_s24  ;;  %s2664_s11 = sadd.s32 4, %s2374_s27 }
 0x5bf   : > { %s927_s19 = sld [smem:[#allocation3 + %s925_s0]] }
 0x5c5   : > { %p1843_p7 = scmp.ne.s32.totalorder %s927_s19, 0 }
 0x5c6   : > { %v1844_v39 = vld [vmem:[%s2364_s29 + $0x18] sm:$0xff] (!%p1843_p7)  ;;  %v1845_v44 = vld [vmem:[%s2364_s29 + $0x20] sm:$0xff] (!%p1843_p7)  ;;  %v1846_v45 = vld [vmem:[%s2364_s29 + $0x28] sm:$0xff] (!%p1843_p7) }
 0x5c7   : > { %932 = sbr.rel (%p1843_p7) target bundleno = 1486 (0x5ce), region = 104  ;;  %1847 = vst [vmem:[%s2376_s28 + $0x18] sm:$0xff] (!%p1843_p7), %v1844_v39  ;;  %1848 = vst [vmem:[%s2376_s28 + $0x20] sm:$0xff] (!%p1843_p7), %v1845_v44 }
 0x5c8   : > { %1849 = vst [vmem:[%s2376_s28 + $0x28] sm:$0xff] (!%p1843_p7), %v1846_v45 }
 0x5ce PF: > { %p1850_p9 = scmp.eq.s32.totalorder %s927_s19, 0 }
 0x5cf   : > { %s2673_s24 = sld [smem:[#allocation4 + %s2664_s11]] (!%p1850_p9)  ;;  %s945_s27 = sadd.s32 (!%p1850_p9), 1, %s2664_s11 }
 0x5d0   : > { %943 = sbr.rel (%p1850_p9) target bundleno = 2851 (0xb23), region = 108  ;;  %s2678_s20 = sld [smem:[#allocation4 + %s945_s27]] (!%p1850_p9) }
 0x5d1   : > { %s947_s6 = sadd.s32 (!%p1850_p9), 2, %s2664_s11  ;;  %s949_s23 = sadd.s32 (!%p1850_p9), 3, %s2664_s11 }
 0x5d2   : > { %s2683_s21 = sld [smem:[#allocation4 + %s947_s6]] (!%p1850_p9) }
 0x5d3   : > { %s2688_s26 = sld [smem:[#allocation4 + %s949_s23]] (!%p1850_p9) }
 0x5d4   : > { %s2691_s25 = sld [smem:[#allocation5 + %s2664_s11]] (!%p1850_p9) }
 0x5da   : > { %p1851_p13 = scmp.ne.s32.totalorder %s2691_s25, 0 }
 0x5db   : > { %v1852_v46 = vld [vmem:[%s2364_s29 + $0x18] sm:$0xff] (!%p1851_p13)  ;;  %v960_v47 = vstv (!%p1851_p13), %s2673_s24  ;;  %v1853_v48 = vld [vmem:[%s2364_s29 + $0x20] sm:$0xff] (!%p1851_p13)  ;;  %v1854_v49 = vld [vmem:[%s2364_s29 + $0x28] sm:$0xff] (!%p1851_p13) }
 0x5dc   : > { %955 = sbr.rel (%p1851_p13) target bundleno = 1508 (0x5e4), region = 112  ;;  %v961_v50 = vmul.f32 (!%p1851_p13), %v1852_v46, %v960_v47  ;;  %v962_v51 = vmul.f32 (!%p1851_p13), %v1853_v48, %v960_v47  ;;  %v963_v52 = vmul.f32 (!%p1851_p13), %v1854_v49, %v960_v47 }
 0x5de   : > { %v964_v53 = vmax.f32 (!%p1851_p13), %v961_v50, 0.0  ;;  %v965_v54 = vmax.f32 (!%p1851_p13), %v962_v51, 0.0  ;;  %v966_v55 = vmax.f32 (!%p1851_p13), %v963_v52, 0.0 }
 0x5e0   : > { %v967_v56 = vmin.f32 (!%p1851_p13), %v964_v53, 1.0  ;;  %v968_v57 = vmin.f32 (!%p1851_p13), %v965_v54, 1.0  ;;  %v969_v58 = vmin.f32 (!%p1851_p13), %v966_v55, 1.0 }
 0x5e2   : > { %1855 = vst [vmem:[%s2376_s28 + $0x18] sm:$0xff] (!%p1851_p13), %v967_v56  ;;  %1856 = vst [vmem:[%s2376_s28 + $0x20] sm:$0xff] (!%p1851_p13), %v968_v57 }
 0x5e3   : > { %1857 = vst [vmem:[%s2376_s28 + $0x28] sm:$0xff] %v969_v58 }
 0x5e4 PF: > { %p1858_p1 = scmp.ne.s32.totalorder %s2691_s25, 1 }
 0x5e5   : > { %v1859_v59 = vld [vmem:[%s2364_s29 + $0x18] sm:$0xff] (!%p1858_p1)  ;;  %v1860_v60 = vld [vmem:[%s2364_s29 + $0x20] sm:$0xff] (!%p1858_p1)  ;;  %v1861_v61 = vld [vmem:[%s2364_s29 + $0x28] sm:$0xff] (!%p1858_p1)  ;;  %v997_v11 = vstv (!%p1858_p1), %s2678_s20  ;;  %s1001_s30 = ssub.f32 (!%p1858_p1), 1.0, %s2678_s20 }
 0x5e6   : > { %977 = sbr.rel (%p1858_p1) target bundleno = 1733 (0x6c5), region = 116  ;;  %v982_v62 = vmul.f32 (!%p1858_p1), 0.2989, %v1859_v59  ;;  %v983_v63 = vmul.f32 (!%p1858_p1), 0.587, %v1860_v60  ;;  %v998_v12 = vmul.f32 (!%p1858_p1), %v1859_v59, %v997_v11  ;;  %v999_v13 = vmul.f32 (!%p1858_p1), %v1860_v60, %v997_v11 }
 0x5e7   : > { %v985_v0 = vmul.f32 (!%p1858_p1), 0.114, %v1861_v61  ;;  %v1000_v9 = vmul.f32 (!%p1858_p1), %v1861_v61, %v997_v11 }
 0x5e8   : > { %v984_v1 = vadd.f32 (!%p1858_p1), %v983_v63, %v982_v62 }
 0x5ea   : > { %v986_v2 = vadd.f32 (!%p1858_p1), %v985_v0, %v984_v1 }
 0x5ec   : > { %987 = vadd.xlane.f32.xlu0 (!%p1858_p1), %v986_v2 }
 0x679   : > { %v988_v3 = vpop.xlane.xlu0 %987 }
 0x67a   : > { %v989_v4 = vrot.slane %v988_v3, 4 }
 0x67c   : > { %v990_v5 = vadd.f32 %v989_v4, %v988_v3 }
 0x67e   : > { %v991_v6 = vrot.slane %v990_v5, 2 }
 0x680   : > { %v992_v7 = vadd.f32 %v991_v6, %v990_v5 }
 0x682   : > { %v993_v8 = vrot.slane %v992_v7, 1 }
 0x684   : > { %v994_v10 = vadd.f32 %v993_v8, %v992_v7 }
 0x686   : > { %1982 = vpush %v994_v10 }
 0x6b7   : > { %s1983_s16 = spop %1982 }
 0x6b8   : > { %s996_s1 = smul.f32 0.00390625, %s1983_s16 }
 0x6ba   : > { %s1002_s13 = smul.f32 %s1001_s30, %s996_s1 }
 0x6bc   : > { %v1003_v14 = vstv %s1002_s13 }
 0x6bd   : > { %v1004_v15 = vadd.f32 %v1003_v14, %v998_v12  ;;  %v1005_v16 = vadd.f32 %v1003_v14, %v999_v13  ;;  %v1006_v17 = vadd.f32 %v1003_v14, %v1000_v9 }
 0x6bf   : > { %v1007_v18 = vmax.f32 %v1004_v15, 0.0  ;;  %v1008_v20 = vmax.f32 %v1005_v16, 0.0  ;;  %v1009_v21 = vmax.f32 %v1006_v17, 0.0 }
 0x6c1   : > { %v1010_v22 = vmin.f32 %v1007_v18, 1.0  ;;  %v1011_v23 = vmin.f32 %v1008_v20, 1.0  ;;  %v1012_v19 = vmin.f32 %v1009_v21, 1.0 }
 0x6c3   : > { %1862 = vst [vmem:[%s2376_s28 + $0x18] sm:$0xff] %v1010_v22  ;;  %1863 = vst [vmem:[%s2376_s28 + $0x20] sm:$0xff] %v1011_v23 }
 0x6c4   : > { %1864 = vst [vmem:[%s2376_s28 + $0x28] sm:$0xff] %v1012_v19 }
 0x6c5 PF: > { %p1865_p3 = scmp.ne.s32.totalorder %s2691_s25, 2 }
 0x6c6   : > { %v1866_v24 = vld [vmem:[%s2364_s29 + $0x18] sm:$0xff] (!%p1865_p3)  ;;  %v1867_v25 = vld [vmem:[%s2364_s29 + $0x20] sm:$0xff] (!%p1865_p3)  ;;  %v1868_v26 = vld [vmem:[%s2364_s29 + $0x28] sm:$0xff] (!%p1865_p3)  ;;  %s1034_s14 = ssub.f32 (!%p1865_p3), 1.0, %s2683_s21  ;;  %v1030_v31 = vstv (!%p1865_p3), %s2683_s21 }
 0x6c7   : > { %1020 = sbr.rel (%p1865_p3) target bundleno = 1751 (0x6d7), region = 120  ;;  %v1025_v27 = vmul.f32 (!%p1865_p3), 0.2989, %v1866_v24  ;;  %v1026_v28 = vmul.f32 (!%p1865_p3), 0.587, %v1867_v25  ;;  %v1031_v34 = vmul.f32 (!%p1865_p3), %v1866_v24, %v1030_v31  ;;  %v1032_v35 = vmul.f32 (!%p1865_p3), %v1867_v25, %v1030_v31 }
 0x6c8   : > { %v1028_v30 = vmul.f32 (!%p1865_p3), 0.114, %v1868_v26  ;;  %v1035_v33 = vstv (!%p1865_p3), %s1034_s14  ;;  %v1033_v36 = vmul.f32 (!%p1865_p3), %v1868_v26, %v1030_v31 }
 0x6c9   : > { %v1027_v32 = vadd.f32 (!%p1865_p3), %v1026_v28, %v1025_v27 }
 0x6cb   : > { %v1029_v29 = vadd.f32 (!%p1865_p3), %v1028_v30, %v1027_v32 }
 0x6cd   : > { %v1036_v37 = vmul.f32 (!%p1865_p3), %v1035_v33, %v1029_v29 }
 0x6cf   : > { %v1037_v38 = vadd.f32 %v1036_v37, %v1031_v34  ;;  %v1038_v40 = vadd.f32 %v1036_v37, %v1032_v35  ;;  %v1039_v41 = vadd.f32 %v1036_v37, %v1033_v36 }
 0x6d1   : > { %v1040_v42 = vmax.f32 %v1037_v38, 0.0  ;;  %v1041_v43 = vmax.f32 %v1038_v40, 0.0  ;;  %v1042_v39 = vmax.f32 %v1039_v41, 0.0 }
 0x6d3   : > { %v1043_v44 = vmin.f32 %v1040_v42, 1.0  ;;  %v1044_v45 = vmin.f32 %v1041_v43, 1.0  ;;  %v1045_v46 = vmin.f32 %v1042_v39, 1.0 }
 0x6d5   : > { %1869 = vst [vmem:[%s2376_s28 + $0x18] sm:$0xff] %v1043_v44  ;;  %1870 = vst [vmem:[%s2376_s28 + $0x20] sm:$0xff] %v1044_v45 }
 0x6d6   : > { %1871 = vst [vmem:[%s2376_s28 + $0x28] sm:$0xff] %v1045_v46 }
 0x6d7 PF: > { %p1872_p4 = scmp.ne.s32.totalorder %s2691_s25, 3 }
 0x6d8   : > { %v1873_v47 = vld [vmem:[%s2364_s29 + $0x18] sm:$0xff] (!%p1872_p4)  ;;  %v1874_v48 = vld [vmem:[%s2364_s29 + $0x20] sm:$0xff] (!%p1872_p4)  ;;  %v1875_v49 = vld [vmem:[%s2364_s29 + $0x28] sm:$0xff] (!%p1872_p4)  ;;  %v1099_v16 = vstv (!%p1872_p4), %s2688_s26 }
 0x6d9   : > { %1053 = sbr.rel (%p1872_p4) target bundleno = 1822 (0x71e), region = 124  ;;  %v1058_v50 = vmax.f32 (!%p1872_p4), %v1873_v47, %v1874_v48  ;;  %v1060_v51 = vmin.f32 (!%p1872_p4), %v1873_v47, %v1874_v48 }
 0x6db   : > { %v2723_v52 = vmax.f32 (!%p1872_p4), %v1058_v50, %v1875_v49  ;;  %v1061_v53 = vmin.f32 (!%p1872_p4), %v1060_v51, %v1875_v49 }
 0x6dd   : > { %vm1062_vm0 = vcmp.eq.f32.partialorder (!%p1872_p4), %v2723_v52, %v1061_v53  ;;  %v1063_v54 = vsub.f32 (!%p1872_p4), %v2723_v52, %v1061_v53  ;;  %v1075_v60 = vsub.f32 (!%p1872_p4), %v2723_v52, %v1873_v47  ;;  %v1077_v61 = vsub.f32 (!%p1872_p4), %v2723_v52, %v1874_v48 }
 0x6de   : > { %v1064_v58 = vsel (!%p1872_p4), %vm1062_vm0, 1.0, %v2723_v52  ;;  %v1079_v62 = vsub.f32 (!%p1872_p4), %v2723_v52, %v1875_v49  ;;  %vm1084_vm1 = vcmp.eq.f32.partialorder (!%p1872_p4), %v2723_v52, %v1874_v48  ;;  %vm1085_vm2 = vcmp.ne.f32.partialorder (!%p1872_p4), %v2723_v52, %v1873_v47 }
 0x6df   : > { %v1070_v55 = vsel (!%p1872_p4), %vm1062_vm0, 1.0, %v1063_v54  ;;  %vm1090_vm3 = vcmp.ne.f32.partialorder (!%p1872_p4), %v2723_v52, %v1874_v48  ;;  %vm1081_vm4 = vcmp.eq.f32.partialorder (!%p1872_p4), %v2723_v52, %v1873_v47  ;;  %vm1086_vm5 = vmand (!%p1872_p4), %vm1084_vm1, %vm1085_vm2 }
 0x6e0   : > { %2060 = vrcp.f32 %v1070_v55  ;;  %vm1091_vm6 = vmand %vm1090_vm3, %vm1085_vm2 }
 0x6e1   : > { %2062 = vrcp.f32 %v1064_v58 }
 0x6ea   : > { %v2061_v56 = vpop.eup %2060 }
 0x6eb   : > { %v1072_v57 = vmul.f32 %v2061_v56, %v1070_v55  ;;  %v2063_v13 = vpop.eup %2062 }
 0x6ec   : > { %v1066_v14 = vmul.f32 %v2063_v13, %v1064_v58 }
 0x6ed   : > { %v1073_v59 = vsub.f32 2.0, %v1072_v57 }
 0x6ee   : > { %v1067_v18 = vsub.f32 2.0, %v1066_v14 }
 0x6ef   : > { %v1074_v63 = vmul.f32 %v2061_v56, %v1073_v59 }
 0x6f0   : > { %v1068_v22 = vmul.f32 %v2063_v13, %v1067_v18 }
 0x6f1   : > { %v1076_v0 = vmul.f32 %v1075_v60, %v1074_v63  ;;  %v1078_v1 = vmul.f32 %v1077_v61, %v1074_v63  ;;  %v1080_v2 = vmul.f32 %v1079_v62, %v1074_v63 }
 0x6f2   : > { %v1069_v24 = vmul.f32 %v1068_v22, %v1063_v54 }
 0x6f3   : > { %v1082_v3 = vsub.f32 %v1080_v2, %v1078_v1  ;;  %v1087_v4 = vadd.f32 2.0, %v1076_v0  ;;  %v1092_v5 = vadd.f32 4.0, %v1078_v1 }
 0x6f4   : > { %v1106_v27 = vsub.f32 1.0, %v1069_v24 }
 0x6f5   : > { %v1083_v6 = vsel %vm1081_vm4, %v1082_v3, 0.0  ;;  %v1088_v7 = vsub.f32 %v1087_v4, %v1080_v2  ;;  %v1093_v8 = vsub.f32 %v1092_v5, %v1076_v0 }
 0x6f6   : > { %v1107_v31 = vmul.f32 %v1106_v27, %v2723_v52 }
 0x6f7   : > { %v1089_v10 = vsel %vm1086_vm5, %v1088_v7, 0.0  ;;  %v1094_v11 = vsel %vm1091_vm6, %v1093_v8, 0.0 }
 0x6f8   : > { %v1095_v12 = vadd.f32 %v1089_v10, %v1083_v6 }
 0x6fa   : > { %v1096_v9 = vadd.f32 %v1095_v12, %v1094_v11 }
 0x6fc   : > { %v1097_v15 = vmul.f32 0.16666667, %v1096_v9 }
 0x6fe   : > { %v1098_v17 = vadd.f32 1.0, %v1097_v15 }
 0x700   : > { %v1100_v20 = vadd.f32 %v1099_v16, %v1098_v17 }
 0x702   : > { %v1101_v21 = vfloor.f32 %v1100_v20 }
 0x704   : > { %v1102_v23 = vsub.f32 %v1100_v20, %v1101_v21 }
 0x706   : > { %v1103_v19 = vmul.f32 6.0, %v1102_v23 }
 0x708   : > { %v1104_v25 = vfloor.f32 %v1103_v19 }
 0x70a   : > { %v1105_v26 = vsub.f32 %v1103_v19, %v1104_v25  ;;  %vm1118_vm7 = vcmp.eq.f32.partialorder %v1104_v25, 3.0  ;;  %vm1119_vm8 = vcmp.eq.f32.partialorder %v1104_v25, 4.0  ;;  %vm1117_vm9 = vcmp.eq.f32.partialorder %v1104_v25, 2.0 }
 0x70b   : > { %vm1116_vm10 = vcmp.eq.f32.partialorder %v1104_v25, 1.0  ;;  %vm1115_vm11 = vcmp.eq.f32.partialorder %v1104_v25, 0.0 }
 0x70c   : > { %v1108_v28 = vmul.f32 %v1105_v26, %v1069_v24  ;;  %v1111_v30 = vsub.f32 1.0, %v1105_v26 }
 0x70e   : > { %v1109_v32 = vsub.f32 1.0, %v1108_v28  ;;  %v1112_v33 = vmul.f32 %v1111_v30, %v1069_v24 }
 0x710   : > { %v1110_v29 = vmul.f32 %v1109_v32, %v2723_v52  ;;  %v1113_v34 = vsub.f32 1.0, %v1112_v33 }
 0x712   : > { %v1114_v35 = vmul.f32 %v1113_v34, %v2723_v52  ;;  %v1127_v36 = vsel %vm1118_vm7, %v1110_v29, %v1107_v31  ;;  %v1133_v37 = vsel %vm1119_vm8, %v2723_v52, %v1110_v29 }
 0x713   : > { %v1128_v38 = vsel %vm1117_vm9, %v2723_v52, %v1127_v36  ;;  %v1134_v40 = vsel %vm1118_vm7, %v2723_v52, %v1133_v37 }
 0x714   : > { %v1120_v41 = vsel %vm1119_vm8, %v1114_v35, %v2723_v52  ;;  %v1129_v42 = vsel %vm1116_vm10, %v2723_v52, %v1128_v38  ;;  %v1135_v43 = vsel %vm1117_vm9, %v1114_v35, %v1134_v40 }
 0x715   : > { %v1121_v39 = vsel %vm1118_vm7, %v1107_v31, %v1120_v41  ;;  %v1130_v44 = vsel %vm1115_vm11, %v1114_v35, %v1129_v42  ;;  %v1136_v45 = vsel %vm1116_vm10, %v1107_v31, %v1135_v43 }
 0x716   : > { %v1122_v46 = vsel %vm1117_vm9, %v1107_v31, %v1121_v39  ;;  %v1131_v47 = vmax.f32 %v1130_v44, 0.0  ;;  %v1137_v48 = vsel %vm1115_vm11, %v1107_v31, %v1136_v45 }
 0x717   : > { %v1123_v49 = vsel %vm1116_vm10, %v1110_v29, %v1122_v46  ;;  %v1138_v50 = vmax.f32 %v1137_v48, 0.0 }
 0x718   : > { %v1124_v51 = vsel %vm1115_vm11, %v2723_v52, %v1123_v49  ;;  %v1132_v53 = vmin.f32 %v1131_v47, 1.0 }
 0x719   : > { %v1125_v54 = vmax.f32 %v1124_v51, 0.0  ;;  %v1139_v55 = vmin.f32 %v1138_v50, 1.0 }
 0x71a   : > { %1877 = vst [vmem:[%s2376_s28 + $0x20] sm:$0xff] %v1132_v53 }
 0x71b   : > { %v1126_v56 = vmin.f32 %v1125_v54, 1.0  ;;  %1878 = vst [vmem:[%s2376_s28 + $0x28] sm:$0xff] %v1139_v55 }
 0x71d   : > { %1876 = vst [vmem:[%s2376_s28 + $0x18] sm:$0xff] %v1126_v56 }
 0x71e PF: > { %s2756_s29 = sld [smem:[#allocation5 + %s945_s27]] }
 0x724   : > { %p1879_p6 = scmp.ne.s32.totalorder %s2756_s29, 0 }
 0x725   : > { %v1880_v52 = vld [vmem:[%s2376_s28 + $0x18] sm:$0xff] (!%p1879_p6)  ;;  %v1155_v57 = vstv (!%p1879_p6), %s2673_s24  ;;  %v1881_v58 = vld [vmem:[%s2376_s28 + $0x20] sm:$0xff] (!%p1879_p6)  ;;  %v1882_v59 = vld [vmem:[%s2376_s28 + $0x28] sm:$0xff] (!%p1879_p6) }
 0x726   : > { %1150 = sbr.rel (%p1879_p6) target bundleno = 1838 (0x72e), region = 128  ;;  %v1156_v60 = vmul.f32 (!%p1879_p6), %v1880_v52, %v1155_v57  ;;  %v1157_v61 = vmul.f32 (!%p1879_p6), %v1881_v58, %v1155_v57  ;;  %v1158_v62 = vmul.f32 (!%p1879_p6), %v1882_v59, %v1155_v57 }
 0x728   : > { %v1159_v63 = vmax.f32 (!%p1879_p6), %v1156_v60, 0.0  ;;  %v1160_v0 = vmax.f32 (!%p1879_p6), %v1157_v61, 0.0  ;;  %v1161_v1 = vmax.f32 (!%p1879_p6), %v1158_v62, 0.0 }
 0x72a   : > { %v1162_v2 = vmin.f32 (!%p1879_p6), %v1159_v63, 1.0  ;;  %v1163_v3 = vmin.f32 (!%p1879_p6), %v1160_v0, 1.0  ;;  %v1164_v4 = vmin.f32 (!%p1879_p6), %v1161_v1, 1.0 }
 0x72c   : > { %1883 = vst [vmem:[%s2376_s28 + $0x18] sm:$0xff] (!%p1879_p6), %v1162_v2  ;;  %1884 = vst [vmem:[%s2376_s28 + $0x20] sm:$0xff] (!%p1879_p6), %v1163_v3 }
 0x72d   : > { %1885 = vst [vmem:[%s2376_s28 + $0x28] sm:$0xff] %v1164_v4 }
 0x72e PF: > { %p1886_p8 = scmp.ne.s32.totalorder %s2756_s29, 1 }
 0x72f   : > { %v1191_v21 = vstv (!%p1886_p8), %s2678_s20  ;;  %s1195_s5 = ssub.f32 (!%p1886_p8), 1.0, %s2678_s20 }
 0x730   : > { %1171 = sbr.rel (%p1886_p8) target bundleno = 2068 (0x814), region = 132 }
 0x734   : > { %v1887_v5 = vld [vmem:[%s2376_s28 + $0x18] sm:$0xff] (!%p1886_p8)  ;;  %v1888_v6 = vld [vmem:[%s2376_s28 + $0x20] sm:$0xff] (!%p1886_p8)  ;;  %v1889_v7 = vld [vmem:[%s2376_s28 + $0x28] sm:$0xff] (!%p1886_p8) }
 0x735   : > { %v1176_v8 = vmul.f32 (!%p1886_p8), 0.2989, %v1887_v5  ;;  %v1177_v10 = vmul.f32 (!%p1886_p8), 0.587, %v1888_v6  ;;  %v1179_v11 = vmul.f32 (!%p1886_p8), 0.114, %v1889_v7  ;;  %v1192_v22 = vmul.f32 (!%p1886_p8), %v1887_v5, %v1191_v21 }
 0x736   : > { %v1193_v23 = vmul.f32 (!%p1886_p8), %v1888_v6, %v1191_v21  ;;  %v1194_v19 = vmul.f32 (!%p1886_p8), %v1889_v7, %v1191_v21 }
 0x737   : > { %v1178_v12 = vadd.f32 %v1177_v10, %v1176_v8 }
 0x739   : > { %v1180_v13 = vadd.f32 %v1179_v11, %v1178_v12 }
 0x73b   : > { %1181 = vadd.xlane.f32.xlu0 %v1180_v13 }
 0x7c8   : > { %v1182_v9 = vpop.xlane.xlu0 %1181 }
 0x7c9   : > { %v1183_v14 = vrot.slane %v1182_v9, 4 }
 0x7cb   : > { %v1184_v15 = vadd.f32 %v1183_v14, %v1182_v9 }
 0x7cd   : > { %v1185_v16 = vrot.slane %v1184_v15, 2 }
 0x7cf   : > { %v1186_v17 = vadd.f32 %v1185_v16, %v1184_v15 }
 0x7d1   : > { %v1187_v18 = vrot.slane %v1186_v17, 1 }
 0x7d3   : > { %v1188_v20 = vadd.f32 %v1187_v18, %v1186_v17 }
 0x7d5   : > { %1984 = vpush %v1188_v20 }
 0x806   : > { %s1985_s0 = spop %1984 }
 0x807   : > { %s1190_s19 = smul.f32 0.00390625, %s1985_s0 }
 0x809   : > { %s1196_s27 = smul.f32 %s1195_s5, %s1190_s19 }
 0x80b   : > { %v1197_v24 = vstv %s1196_s27 }
 0x80c   : > { %v1198_v25 = vadd.f32 %v1197_v24, %v1192_v22  ;;  %v1199_v26 = vadd.f32 %v1197_v24, %v1193_v23  ;;  %v1200_v27 = vadd.f32 %v1197_v24, %v1194_v19 }
 0x80e   : > { %v1201_v28 = vmax.f32 %v1198_v25, 0.0  ;;  %v1202_v30 = vmax.f32 %v1199_v26, 0.0  ;;  %v1203_v31 = vmax.f32 %v1200_v27, 0.0 }
 0x810   : > { %v1204_v32 = vmin.f32 %v1201_v28, 1.0  ;;  %v1205_v33 = vmin.f32 %v1202_v30, 1.0  ;;  %v1206_v29 = vmin.f32 %v1203_v31, 1.0 }
 0x812   : > { %1890 = vst [vmem:[%s2376_s28 + $0x18] sm:$0xff] %v1204_v32  ;;  %1891 = vst [vmem:[%s2376_s28 + $0x20] sm:$0xff] %v1205_v33 }
 0x813   : > { %1892 = vst [vmem:[%s2376_s28 + $0x28] sm:$0xff] %v1206_v29 }
 0x814 PF: > { %p1893_p0 = scmp.ne.s32.totalorder %s2756_s29, 2 }
 0x815   : > { %s1227_s25 = ssub.f32 (!%p1893_p0), 1.0, %s2683_s21  ;;  %v1223_v41 = vstv (!%p1893_p0), %s2683_s21 }
 0x816   : > { %1213 = sbr.rel (%p1893_p0) target bundleno = 2090 (0x82a), region = 136 }
 0x817   : > { %v1228_v43 = vstv (!%p1893_p0), %s1227_s25 }
 0x819   : > { %v1894_v34 = vld [vmem:[%s2376_s28 + $0x18] sm:$0xff] (!%p1893_p0)  ;;  %v1895_v35 = vld [vmem:[%s2376_s28 + $0x20] sm:$0xff] (!%p1893_p0) }
 0x81a   : > { %v1896_v36 = vld [vmem:[%s2376_s28 + $0x28] sm:$0xff] (!%p1893_p0)  ;;  %v1218_v37 = vmul.f32 (!%p1893_p0), 0.2989, %v1894_v34  ;;  %v1219_v38 = vmul.f32 (!%p1893_p0), 0.587, %v1895_v35  ;;  %v1224_v44 = vmul.f32 (!%p1893_p0), %v1894_v34, %v1223_v41  ;;  %v1225_v45 = vmul.f32 (!%p1893_p0), %v1895_v35, %v1223_v41 }
 0x81b   : > { %v1221_v40 = vmul.f32 (!%p1893_p0), 0.114, %v1896_v36  ;;  %v1226_v46 = vmul.f32 (!%p1893_p0), %v1896_v36, %v1223_v41 }
 0x81c   : > { %v1220_v42 = vadd.f32 (!%p1893_p0), %v1219_v38, %v1218_v37 }
 0x81e   : > { %v1222_v39 = vadd.f32 %v1221_v40, %v1220_v42 }
 0x820   : > { %v1229_v47 = vmul.f32 %v1228_v43, %v1222_v39 }
 0x822   : > { %v1230_v48 = vadd.f32 %v1229_v47, %v1224_v44  ;;  %v1231_v49 = vadd.f32 %v1229_v47, %v1225_v45  ;;  %v1232_v50 = vadd.f32 %v1229_v47, %v1226_v46 }
 0x824   : > { %v1233_v51 = vmax.f32 %v1230_v48, 0.0  ;;  %v1234_v53 = vmax.f32 %v1231_v49, 0.0  ;;  %v1235_v54 = vmax.f32 %v1232_v50, 0.0 }
 0x826   : > { %v1236_v55 = vmin.f32 %v1233_v51, 1.0  ;;  %v1237_v56 = vmin.f32 %v1234_v53, 1.0  ;;  %v1238_v52 = vmin.f32 %v1235_v54, 1.0 }
 0x828   : > { %1897 = vst [vmem:[%s2376_s28 + $0x18] sm:$0xff] %v1236_v55  ;;  %1898 = vst [vmem:[%s2376_s28 + $0x20] sm:$0xff] %v1237_v56 }
 0x829   : > { %1899 = vst [vmem:[%s2376_s28 + $0x28] sm:$0xff] %v1238_v52 }
 0x82a PF: > { %p1900_p2 = scmp.ne.s32.totalorder %s2756_s29, 3 }
 0x82b   : > { %v1291_v26 = vstv (!%p1900_p2), %s2688_s26 }
 0x82c   : > { %1245 = sbr.rel (%p1900_p2) target bundleno = 2165 (0x875), region = 140 }
 0x82f   : > { %v1901_v57 = vld [vmem:[%s2376_s28 + $0x18] sm:$0xff] (!%p1900_p2)  ;;  %v1902_v58 = vld [vmem:[%s2376_s28 + $0x20] sm:$0xff] (!%p1900_p2) }
 0x830   : > { %v1903_v59 = vld [vmem:[%s2376_s28 + $0x28] sm:$0xff] (!%p1900_p2)  ;;  %v1250_v60 = vmax.f32 (!%p1900_p2), %v1901_v57, %v1902_v58  ;;  %v1252_v61 = vmin.f32 (!%p1900_p2), %v1901_v57, %v1902_v58 }
 0x832   : > { %v2788_v62 = vmax.f32 (!%p1900_p2), %v1250_v60, %v1903_v59  ;;  %v1253_v63 = vmin.f32 (!%p1900_p2), %v1252_v61, %v1903_v59 }
 0x834   : > { %vm1254_vm12 = vcmp.eq.f32.partialorder %v2788_v62, %v1253_v63  ;;  %v1255_v0 = vsub.f32 %v2788_v62, %v1253_v63  ;;  %v1267_v6 = vsub.f32 %v2788_v62, %v1901_v57  ;;  %v1269_v7 = vsub.f32 %v2788_v62, %v1902_v58 }
 0x835   : > { %v1256_v4 = vsel %vm1254_vm12, 1.0, %v2788_v62  ;;  %v1271_v8 = vsub.f32 %v2788_v62, %v1903_v59  ;;  %vm1276_vm13 = vcmp.eq.f32.partialorder %v2788_v62, %v1902_v58  ;;  %vm1277_vm14 = vcmp.ne.f32.partialorder %v2788_v62, %v1901_v57 }
 0x836   : > { %v1262_v1 = vsel %vm1254_vm12, 1.0, %v1255_v0  ;;  %vm1282_vm15 = vcmp.ne.f32.partialorder %v2788_v62, %v1902_v58  ;;  %vm1273_vm0 = vcmp.eq.f32.partialorder %v2788_v62, %v1901_v57  ;;  %vm1278_vm1 = vmand %vm1276_vm13, %vm1277_vm14 }
 0x837   : > { %2064 = vrcp.f32 %v1262_v1  ;;  %vm1283_vm2 = vmand %vm1282_vm15, %vm1277_vm14 }
 0x838   : > { %2066 = vrcp.f32 %v1256_v4 }
 0x841   : > { %v2065_v2 = vpop.eup %2064 }
 0x842   : > { %v1264_v3 = vmul.f32 %v2065_v2, %v1262_v1  ;;  %v2067_v23 = vpop.eup %2066 }
 0x843   : > { %v1258_v24 = vmul.f32 %v2067_v23, %v1256_v4 }
 0x844   : > { %v1265_v5 = vsub.f32 2.0, %v1264_v3 }
 0x845   : > { %v1259_v28 = vsub.f32 2.0, %v1258_v24 }
 0x846   : > { %v1266_v10 = vmul.f32 %v2065_v2, %v1265_v5 }
 0x847   : > { %v1260_v32 = vmul.f32 %v2067_v23, %v1259_v28 }
 0x848   : > { %v1268_v11 = vmul.f32 %v1267_v6, %v1266_v10  ;;  %v1270_v12 = vmul.f32 %v1269_v7, %v1266_v10  ;;  %v1272_v13 = vmul.f32 %v1271_v8, %v1266_v10 }
 0x849   : > { %v1261_v34 = vmul.f32 %v1260_v32, %v1255_v0 }
 0x84a   : > { %v1274_v9 = vsub.f32 %v1272_v13, %v1270_v12  ;;  %v1279_v14 = vadd.f32 2.0, %v1268_v11  ;;  %v1284_v15 = vadd.f32 4.0, %v1270_v12 }
 0x84b   : > { %v1298_v37 = vsub.f32 1.0, %v1261_v34 }
 0x84c   : > { %v1275_v16 = vsel %vm1273_vm0, %v1274_v9, 0.0  ;;  %v1280_v17 = vsub.f32 %v1279_v14, %v1272_v13  ;;  %v1285_v18 = vsub.f32 %v1284_v15, %v1268_v11 }
 0x84d   : > { %v1299_v41 = vmul.f32 %v1298_v37, %v2788_v62 }
 0x84e   : > { %v1281_v20 = vsel %vm1278_vm1, %v1280_v17, 0.0  ;;  %v1286_v21 = vsel %vm1283_vm2, %v1285_v18, 0.0 }
 0x84f   : > { %v1287_v22 = vadd.f32 %v1281_v20, %v1275_v16 }
 0x851   : > { %v1288_v19 = vadd.f32 %v1287_v22, %v1286_v21 }
 0x853   : > { %v1289_v25 = vmul.f32 0.16666667, %v1288_v19 }
 0x855   : > { %v1290_v27 = vadd.f32 1.0, %v1289_v25 }
 0x857   : > { %v1292_v30 = vadd.f32 %v1291_v26, %v1290_v27 }
 0x859   : > { %v1293_v31 = vfloor.f32 %v1292_v30 }
 0x85b   : > { %v1294_v33 = vsub.f32 %v1292_v30, %v1293_v31 }
 0x85d   : > { %v1295_v29 = vmul.f32 6.0, %v1294_v33 }
 0x85f   : > { %v1296_v35 = vfloor.f32 %v1295_v29 }
 0x861   : > { %v1297_v36 = vsub.f32 %v1295_v29, %v1296_v35  ;;  %vm1310_vm3 = vcmp.eq.f32.partialorder %v1296_v35, 3.0  ;;  %vm1311_vm4 = vcmp.eq.f32.partialorder %v1296_v35, 4.0  ;;  %vm1309_vm5 = vcmp.eq.f32.partialorder %v1296_v35, 2.0 }
 0x862   : > { %vm1308_vm6 = vcmp.eq.f32.partialorder %v1296_v35, 1.0  ;;  %vm1307_vm7 = vcmp.eq.f32.partialorder %v1296_v35, 0.0 }
 0x863   : > { %v1300_v38 = vmul.f32 %v1297_v36, %v1261_v34  ;;  %v1303_v40 = vsub.f32 1.0, %v1297_v36 }
 0x865   : > { %v1301_v42 = vsub.f32 1.0, %v1300_v38  ;;  %v1304_v43 = vmul.f32 %v1303_v40, %v1261_v34 }
 0x867   : > { %v1302_v39 = vmul.f32 %v1301_v42, %v2788_v62  ;;  %v1305_v44 = vsub.f32 1.0, %v1304_v43 }
 0x869   : > { %v1306_v45 = vmul.f32 %v1305_v44, %v2788_v62  ;;  %v1319_v46 = vsel %vm1310_vm3, %v1302_v39, %v1299_v41  ;;  %v1325_v47 = vsel %vm1311_vm4, %v2788_v62, %v1302_v39 }
 0x86a   : > { %v1320_v48 = vsel %vm1309_vm5, %v2788_v62, %v1319_v46  ;;  %v1326_v49 = vsel %vm1310_vm3, %v2788_v62, %v1325_v47 }
 0x86b   : > { %v1312_v50 = vsel %vm1311_vm4, %v1306_v45, %v2788_v62  ;;  %v1321_v51 = vsel %vm1308_vm6, %v2788_v62, %v1320_v48  ;;  %v1327_v53 = vsel %vm1309_vm5, %v1306_v45, %v1326_v49 }
 0x86c   : > { %v1313_v54 = vsel %vm1310_vm3, %v1299_v41, %v1312_v50  ;;  %v1322_v55 = vsel %vm1307_vm7, %v1306_v45, %v1321_v51  ;;  %v1328_v56 = vsel %vm1308_vm6, %v1299_v41, %v1327_v53 }
 0x86d   : > { %v1314_v52 = vsel %vm1309_vm5, %v1299_v41, %v1313_v54  ;;  %v1323_v57 = vmax.f32 %v1322_v55, 0.0  ;;  %v1329_v58 = vsel %vm1307_vm7, %v1299_v41, %v1328_v56 }
 0x86e   : > { %v1315_v59 = vsel %vm1308_vm6, %v1302_v39, %v1314_v52  ;;  %v1330_v60 = vmax.f32 %v1329_v58, 0.0 }
 0x86f   : > { %v1316_v61 = vsel %vm1307_vm7, %v2788_v62, %v1315_v59  ;;  %v1324_v63 = vmin.f32 %v1323_v57, 1.0 }
 0x870   : > { %v1317_v0 = vmax.f32 %v1316_v61, 0.0  ;;  %v1331_v1 = vmin.f32 %v1330_v60, 1.0 }
 0x871   : > { %1905 = vst [vmem:[%s2376_s28 + $0x20] sm:$0xff] %v1324_v63 }
 0x872   : > { %v1318_v2 = vmin.f32 %v1317_v0, 1.0  ;;  %1906 = vst [vmem:[%s2376_s28 + $0x28] sm:$0xff] %v1331_v1 }
 0x874   : > { %1904 = vst [vmem:[%s2376_s28 + $0x18] sm:$0xff] %v1318_v2 }
 0x875 PF: > { %s2821_s30 = sld [smem:[#allocation5 + %s947_s6]] }
 0x87b   : > { %p1907_p10 = scmp.ne.s32.totalorder %s2821_s30, 0 }
 0x87c   : > { %v1908_v62 = vld [vmem:[%s2376_s28 + $0x18] sm:$0xff] (!%p1907_p10)  ;;  %v1346_v3 = vstv (!%p1907_p10), %s2673_s24  ;;  %v1909_v4 = vld [vmem:[%s2376_s28 + $0x20] sm:$0xff] (!%p1907_p10)  ;;  %v1910_v5 = vld [vmem:[%s2376_s28 + $0x28] sm:$0xff] (!%p1907_p10) }
 0x87d   : > { %1341 = sbr.rel (%p1907_p10) target bundleno = 2181 (0x885), region = 144  ;;  %v1347_v6 = vmul.f32 (!%p1907_p10), %v1908_v62, %v1346_v3  ;;  %v1348_v7 = vmul.f32 (!%p1907_p10), %v1909_v4, %v1346_v3  ;;  %v1349_v8 = vmul.f32 (!%p1907_p10), %v1910_v5, %v1346_v3 }
 0x87f   : > { %v1350_v10 = vmax.f32 (!%p1907_p10), %v1347_v6, 0.0  ;;  %v1351_v11 = vmax.f32 (!%p1907_p10), %v1348_v7, 0.0  ;;  %v1352_v12 = vmax.f32 (!%p1907_p10), %v1349_v8, 0.0 }
 0x881   : > { %v1353_v13 = vmin.f32 (!%p1907_p10), %v1350_v10, 1.0  ;;  %v1354_v9 = vmin.f32 (!%p1907_p10), %v1351_v11, 1.0  ;;  %v1355_v14 = vmin.f32 (!%p1907_p10), %v1352_v12, 1.0 }
 0x883   : > { %1911 = vst [vmem:[%s2376_s28 + $0x18] sm:$0xff] (!%p1907_p10), %v1353_v13  ;;  %1912 = vst [vmem:[%s2376_s28 + $0x20] sm:$0xff] (!%p1907_p10), %v1354_v9 }
 0x884   : > { %1913 = vst [vmem:[%s2376_s28 + $0x28] sm:$0xff] %v1355_v14 }
 0x885 PF: > { %p1914_p5 = scmp.ne.s32.totalorder %s2821_s30, 1 }
 0x886   : > { %v1382_v31 = vstv (!%p1914_p5), %s2678_s20  ;;  %s1386_s6 = ssub.f32 (!%p1914_p5), 1.0, %s2678_s20 }
 0x887   : > { %1362 = sbr.rel (%p1914_p5) target bundleno = 2411 (0x96b), region = 148 }
 0x88b   : > { %v1915_v15 = vld [vmem:[%s2376_s28 + $0x18] sm:$0xff] (!%p1914_p5)  ;;  %v1916_v16 = vld [vmem:[%s2376_s28 + $0x20] sm:$0xff] (!%p1914_p5)  ;;  %v1917_v17 = vld [vmem:[%s2376_s28 + $0x28] sm:$0xff] (!%p1914_p5) }
 0x88c   : > { %v1367_v18 = vmul.f32 (!%p1914_p5), 0.2989, %v1915_v15  ;;  %v1368_v20 = vmul.f32 (!%p1914_p5), 0.587, %v1916_v16  ;;  %v1370_v21 = vmul.f32 (!%p1914_p5), 0.114, %v1917_v17  ;;  %v1383_v32 = vmul.f32 (!%p1914_p5), %v1915_v15, %v1382_v31 }
 0x88d   : > { %v1384_v33 = vmul.f32 (!%p1914_p5), %v1916_v16, %v1382_v31  ;;  %v1385_v29 = vmul.f32 (!%p1914_p5), %v1917_v17, %v1382_v31 }
 0x88e   : > { %v1369_v22 = vadd.f32 %v1368_v20, %v1367_v18 }
 0x890   : > { %v1371_v23 = vadd.f32 %v1370_v21, %v1369_v22 }
 0x892   : > { %1372 = vadd.xlane.f32.xlu0 %v1371_v23 }
 0x91f   : > { %v1373_v19 = vpop.xlane.xlu0 %1372 }
 0x920   : > { %v1374_v24 = vrot.slane %v1373_v19, 4 }
 0x922   : > { %v1375_v25 = vadd.f32 %v1374_v24, %v1373_v19 }
 0x924   : > { %v1376_v26 = vrot.slane %v1375_v25, 2 }
 0x926   : > { %v1377_v27 = vadd.f32 %v1376_v26, %v1375_v25 }
 0x928   : > { %v1378_v28 = vrot.slane %v1377_v27, 1 }
 0x92a   : > { %v1379_v30 = vadd.f32 %v1378_v28, %v1377_v27 }
 0x92c   : > { %1986 = vpush %v1379_v30 }
 0x95d   : > { %s1987_s16 = spop %1986 }
 0x95e   : > { %s1381_s1 = smul.f32 0.00390625, %s1987_s16 }
 0x960   : > { %s1387_s13 = smul.f32 %s1386_s6, %s1381_s1 }
 0x962   : > { %v1388_v34 = vstv %s1387_s13 }
 0x963   : > { %v1389_v35 = vadd.f32 %v1388_v34, %v1383_v32  ;;  %v1390_v36 = vadd.f32 %v1388_v34, %v1384_v33  ;;  %v1391_v37 = vadd.f32 %v1388_v34, %v1385_v29 }
 0x965   : > { %v1392_v38 = vmax.f32 %v1389_v35, 0.0  ;;  %v1393_v40 = vmax.f32 %v1390_v36, 0.0  ;;  %v1394_v41 = vmax.f32 %v1391_v37, 0.0 }
 0x967   : > { %v1395_v42 = vmin.f32 %v1392_v38, 1.0  ;;  %v1396_v43 = vmin.f32 %v1393_v40, 1.0  ;;  %v1397_v39 = vmin.f32 %v1394_v41, 1.0 }
 0x969   : > { %1918 = vst [vmem:[%s2376_s28 + $0x18] sm:$0xff] %v1395_v42  ;;  %1919 = vst [vmem:[%s2376_s28 + $0x20] sm:$0xff] %v1396_v43 }
 0x96a   : > { %1920 = vst [vmem:[%s2376_s28 + $0x28] sm:$0xff] %v1397_v39 }
 0x96b PF: > { %p1921_p11 = scmp.ne.s32.totalorder %s2821_s30, 2 }
 0x96c   : > { %s1418_s14 = ssub.f32 (!%p1921_p11), 1.0, %s2683_s21  ;;  %v1414_v50 = vstv (!%p1921_p11), %s2683_s21 }
 0x96d   : > { %1404 = sbr.rel (%p1921_p11) target bundleno = 2433 (0x981), region = 152 }
 0x96e   : > { %v1419_v53 = vstv (!%p1921_p11), %s1418_s14 }
 0x970   : > { %v1922_v44 = vld [vmem:[%s2376_s28 + $0x18] sm:$0xff] (!%p1921_p11)  ;;  %v1923_v45 = vld [vmem:[%s2376_s28 + $0x20] sm:$0xff] (!%p1921_p11) }
 0x971   : > { %v1924_v46 = vld [vmem:[%s2376_s28 + $0x28] sm:$0xff] (!%p1921_p11)  ;;  %v1409_v47 = vmul.f32 (!%p1921_p11), 0.2989, %v1922_v44  ;;  %v1410_v48 = vmul.f32 (!%p1921_p11), 0.587, %v1923_v45  ;;  %v1415_v55 = vmul.f32 (!%p1921_p11), %v1922_v44, %v1414_v50  ;;  %v1416_v56 = vmul.f32 (!%p1921_p11), %v1923_v45, %v1414_v50 }
 0x972   : > { %v1412_v49 = vmul.f32 (!%p1921_p11), 0.114, %v1924_v46  ;;  %v1417_v52 = vmul.f32 (!%p1921_p11), %v1924_v46, %v1414_v50 }
 0x973   : > { %v1411_v51 = vadd.f32 (!%p1921_p11), %v1410_v48, %v1409_v47 }
 0x975   : > { %v1413_v54 = vadd.f32 %v1412_v49, %v1411_v51 }
 0x977   : > { %v1420_v57 = vmul.f32 %v1419_v53, %v1413_v54 }
 0x979   : > { %v1421_v58 = vadd.f32 %v1420_v57, %v1415_v55  ;;  %v1422_v59 = vadd.f32 %v1420_v57, %v1416_v56  ;;  %v1423_v60 = vadd.f32 %v1420_v57, %v1417_v52 }
 0x97b   : > { %v1424_v61 = vmax.f32 %v1421_v58, 0.0  ;;  %v1425_v63 = vmax.f32 %v1422_v59, 0.0  ;;  %v1426_v0 = vmax.f32 %v1423_v60, 0.0 }
 0x97d   : > { %v1427_v1 = vmin.f32 %v1424_v61, 1.0  ;;  %v1428_v2 = vmin.f32 %v1425_v63, 1.0  ;;  %v1429_v62 = vmin.f32 %v1426_v0, 1.0 }
 0x97f   : > { %1925 = vst [vmem:[%s2376_s28 + $0x18] sm:$0xff] %v1427_v1  ;;  %1926 = vst [vmem:[%s2376_s28 + $0x20] sm:$0xff] %v1428_v2 }
 0x980   : > { %1927 = vst [vmem:[%s2376_s28 + $0x28] sm:$0xff] %v1429_v62 }
 0x981 PF: > { %p1928_p12 = scmp.ne.s32.totalorder %s2821_s30, 3 }
 0x982   : > { %v1482_v36 = vstv (!%p1928_p12), %s2688_s26 }
 0x983   : > { %1436 = sbr.rel (%p1928_p12) target bundleno = 2508 (0x9cc), region = 156 }
 0x986   : > { %v1929_v3 = vld [vmem:[%s2376_s28 + $0x18] sm:$0xff] (!%p1928_p12)  ;;  %v1930_v4 = vld [vmem:[%s2376_s28 + $0x20] sm:$0xff] (!%p1928_p12) }
 0x987   : > { %v1931_v5 = vld [vmem:[%s2376_s28 + $0x28] sm:$0xff] (!%p1928_p12)  ;;  %v1441_v6 = vmax.f32 (!%p1928_p12), %v1929_v3, %v1930_v4  ;;  %v1443_v7 = vmin.f32 (!%p1928_p12), %v1929_v3, %v1930_v4 }
 0x989   : > { %v2853_v8 = vmax.f32 (!%p1928_p12), %v1441_v6, %v1931_v5  ;;  %v1444_v10 = vmin.f32 (!%p1928_p12), %v1443_v7, %v1931_v5 }
 0x98b   : > { %vm1445_vm8 = vcmp.eq.f32.partialorder %v2853_v8, %v1444_v10  ;;  %v1446_v11 = vsub.f32 %v2853_v8, %v1444_v10  ;;  %v1458_v16 = vsub.f32 %v2853_v8, %v1929_v3  ;;  %v1460_v17 = vsub.f32 %v2853_v8, %v1930_v4 }
 0x98c   : > { %v1447_v14 = vsel %vm1445_vm8, 1.0, %v2853_v8  ;;  %v1462_v18 = vsub.f32 %v2853_v8, %v1931_v5  ;;  %vm1467_vm9 = vcmp.eq.f32.partialorder %v2853_v8, %v1930_v4  ;;  %vm1468_vm10 = vcmp.ne.f32.partialorder %v2853_v8, %v1929_v3 }
 0x98d   : > { %v1453_v12 = vsel %vm1445_vm8, 1.0, %v1446_v11  ;;  %vm1473_vm11 = vcmp.ne.f32.partialorder %v2853_v8, %v1930_v4  ;;  %vm1464_vm12 = vcmp.eq.f32.partialorder %v2853_v8, %v1929_v3  ;;  %vm1469_vm13 = vmand %vm1467_vm9, %vm1468_vm10 }
 0x98e   : > { %2068 = vrcp.f32 %v1453_v12  ;;  %vm1474_vm14 = vmand %vm1473_vm11, %vm1468_vm10 }
 0x98f   : > { %2070 = vrcp.f32 %v1447_v14 }
 0x998   : > { %v2069_v13 = vpop.eup %2068 }
 0x999   : > { %v1455_v9 = vmul.f32 %v2069_v13, %v1453_v12  ;;  %v2071_v33 = vpop.eup %2070 }
 0x99a   : > { %v1449_v34 = vmul.f32 %v2071_v33, %v1447_v14 }
 0x99b   : > { %v1456_v15 = vsub.f32 2.0, %v1455_v9 }
 0x99c   : > { %v1450_v38 = vsub.f32 2.0, %v1449_v34 }
 0x99d   : > { %v1457_v20 = vmul.f32 %v2069_v13, %v1456_v15 }
 0x99e   : > { %v1451_v42 = vmul.f32 %v2071_v33, %v1450_v38 }
 0x99f   : > { %v1459_v21 = vmul.f32 %v1458_v16, %v1457_v20  ;;  %v1461_v22 = vmul.f32 %v1460_v17, %v1457_v20  ;;  %v1463_v23 = vmul.f32 %v1462_v18, %v1457_v20 }
 0x9a0   : > { %v1452_v44 = vmul.f32 %v1451_v42, %v1446_v11 }
 0x9a1   : > { %v1465_v19 = vsub.f32 %v1463_v23, %v1461_v22  ;;  %v1470_v24 = vadd.f32 2.0, %v1459_v21  ;;  %v1475_v25 = vadd.f32 4.0, %v1461_v22 }
 0x9a2   : > { %v1489_v47 = vsub.f32 1.0, %v1452_v44 }
 0x9a3   : > { %v1466_v26 = vsel %vm1464_vm12, %v1465_v19, 0.0  ;;  %v1471_v27 = vsub.f32 %v1470_v24, %v1463_v23  ;;  %v1476_v28 = vsub.f32 %v1475_v25, %v1459_v21 }
 0x9a4   : > { %v1490_v50 = vmul.f32 %v1489_v47, %v2853_v8 }
 0x9a5   : > { %v1472_v30 = vsel %vm1469_vm13, %v1471_v27, 0.0  ;;  %v1477_v31 = vsel %vm1474_vm14, %v1476_v28, 0.0 }
 0x9a6   : > { %v1478_v32 = vadd.f32 %v1472_v30, %v1466_v26 }
 0x9a8   : > { %v1479_v29 = vadd.f32 %v1478_v32, %v1477_v31 }
 0x9aa   : > { %v1480_v35 = vmul.f32 0.16666667, %v1479_v29 }
 0x9ac   : > { %v1481_v37 = vadd.f32 1.0, %v1480_v35 }
 0x9ae   : > { %v1483_v40 = vadd.f32 %v1482_v36, %v1481_v37 }
 0x9b0   : > { %v1484_v41 = vfloor.f32 %v1483_v40 }
 0x9b2   : > { %v1485_v43 = vsub.f32 %v1483_v40, %v1484_v41 }
 0x9b4   : > { %v1486_v39 = vmul.f32 6.0, %v1485_v43 }
 0x9b6   : > { %v1487_v45 = vfloor.f32 %v1486_v39 }
 0x9b8   : > { %v1488_v46 = vsub.f32 %v1486_v39, %v1487_v45  ;;  %vm1501_vm15 = vcmp.eq.f32.partialorder %v1487_v45, 3.0  ;;  %vm1502_vm0 = vcmp.eq.f32.partialorder %v1487_v45, 4.0  ;;  %vm1500_vm1 = vcmp.eq.f32.partialorder %v1487_v45, 2.0 }
 0x9b9   : > { %vm1499_vm2 = vcmp.eq.f32.partialorder %v1487_v45, 1.0  ;;  %vm1498_vm3 = vcmp.eq.f32.partialorder %v1487_v45, 0.0 }
 0x9ba   : > { %v1491_v48 = vmul.f32 %v1488_v46, %v1452_v44  ;;  %v1494_v49 = vsub.f32 1.0, %v1488_v46 }
 0x9bc   : > { %v1492_v51 = vsub.f32 1.0, %v1491_v48  ;;  %v1495_v53 = vmul.f32 %v1494_v49, %v1452_v44 }
 0x9be   : > { %v1493_v54 = vmul.f32 %v1492_v51, %v2853_v8  ;;  %v1496_v55 = vsub.f32 1.0, %v1495_v53 }
 0x9c0   : > { %v1497_v56 = vmul.f32 %v1496_v55, %v2853_v8  ;;  %v1510_v52 = vsel %vm1501_vm15, %v1493_v54, %v1490_v50  ;;  %v1516_v57 = vsel %vm1502_vm0, %v2853_v8, %v1493_v54 }
 0x9c1   : > { %v1511_v58 = vsel %vm1500_vm1, %v2853_v8, %v1510_v52  ;;  %v1517_v59 = vsel %vm1501_vm15, %v2853_v8, %v1516_v57 }
 0x9c2   : > { %v1503_v60 = vsel %vm1502_vm0, %v1497_v56, %v2853_v8  ;;  %v1512_v61 = vsel %vm1499_vm2, %v2853_v8, %v1511_v58  ;;  %v1518_v63 = vsel %vm1500_vm1, %v1497_v56, %v1517_v59 }
 0x9c3   : > { %v1504_v0 = vsel %vm1501_vm15, %v1490_v50, %v1503_v60  ;;  %v1513_v1 = vsel %vm1498_vm3, %v1497_v56, %v1512_v61  ;;  %v1519_v2 = vsel %vm1499_vm2, %v1490_v50, %v1518_v63 }
 0x9c4   : > { %v1505_v62 = vsel %vm1500_vm1, %v1490_v50, %v1504_v0  ;;  %v1514_v3 = vmax.f32 %v1513_v1, 0.0  ;;  %v1520_v4 = vsel %vm1498_vm3, %v1490_v50, %v1519_v2 }
 0x9c5   : > { %v1506_v5 = vsel %vm1499_vm2, %v1493_v54, %v1505_v62  ;;  %v1521_v6 = vmax.f32 %v1520_v4, 0.0 }
 0x9c6   : > { %v1507_v7 = vsel %vm1498_vm3, %v2853_v8, %v1506_v5  ;;  %v1515_v10 = vmin.f32 %v1514_v3, 1.0 }
 0x9c7   : > { %v1508_v11 = vmax.f32 %v1507_v7, 0.0  ;;  %v1522_v12 = vmin.f32 %v1521_v6, 1.0 }
 0x9c8   : > { %1933 = vst [vmem:[%s2376_s28 + $0x20] sm:$0xff] %v1515_v10 }
 0x9c9   : > { %v1509_v13 = vmin.f32 %v1508_v11, 1.0  ;;  %1934 = vst [vmem:[%s2376_s28 + $0x28] sm:$0xff] %v1522_v12 }
 0x9cb   : > { %1932 = vst [vmem:[%s2376_s28 + $0x18] sm:$0xff] %v1509_v13 }
 0x9cc PF: > { %s2886_s29 = sld [smem:[#allocation5 + %s949_s23]] }
 0x9d2   : > { %p1935_p7 = scmp.ne.s32.totalorder %s2886_s29, 0 }
 0x9d3   : > { %v1936_v8 = vld [vmem:[%s2376_s28 + $0x18] sm:$0xff] (!%p1935_p7)  ;;  %v1537_v9 = vstv (!%p1935_p7), %s2673_s24  ;;  %v1937_v14 = vld [vmem:[%s2376_s28 + $0x20] sm:$0xff] (!%p1935_p7)  ;;  %v1938_v15 = vld [vmem:[%s2376_s28 + $0x28] sm:$0xff] (!%p1935_p7) }
 0x9d4   : > { %1532 = sbr.rel (%p1935_p7) target bundleno = 2524 (0x9dc), region = 160  ;;  %v1538_v16 = vmul.f32 (!%p1935_p7), %v1936_v8, %v1537_v9  ;;  %v1539_v17 = vmul.f32 (!%p1935_p7), %v1937_v14, %v1537_v9  ;;  %v1540_v18 = vmul.f32 (!%p1935_p7), %v1938_v15, %v1537_v9 }
 0x9d6   : > { %v1541_v20 = vmax.f32 (!%p1935_p7), %v1538_v16, 0.0  ;;  %v1542_v21 = vmax.f32 (!%p1935_p7), %v1539_v17, 0.0  ;;  %v1543_v22 = vmax.f32 (!%p1935_p7), %v1540_v18, 0.0 }
 0x9d8   : > { %v1544_v23 = vmin.f32 (!%p1935_p7), %v1541_v20, 1.0  ;;  %v1545_v19 = vmin.f32 (!%p1935_p7), %v1542_v21, 1.0  ;;  %v1546_v24 = vmin.f32 (!%p1935_p7), %v1543_v22, 1.0 }
 0x9da   : > { %1939 = vst [vmem:[%s2376_s28 + $0x18] sm:$0xff] (!%p1935_p7), %v1544_v23  ;;  %1940 = vst [vmem:[%s2376_s28 + $0x20] sm:$0xff] (!%p1935_p7), %v1545_v19 }
 0x9db   : > { %1941 = vst [vmem:[%s2376_s28 + $0x28] sm:$0xff] %v1546_v24 }
 0x9dc PF: > { %p1942_p9 = scmp.ne.s32.totalorder %s2886_s29, 1 }
 0x9dd   : > { %v1573_v41 = vstv (!%p1942_p9), %s2678_s20  ;;  %s1577_s11 = ssub.f32 (!%p1942_p9), 1.0, %s2678_s20 }
 0x9de   : > { %1553 = sbr.rel (%p1942_p9) target bundleno = 2754 (0xac2), region = 164 }
 0x9e2   : > { %v1943_v25 = vld [vmem:[%s2376_s28 + $0x18] sm:$0xff] (!%p1942_p9)  ;;  %v1944_v26 = vld [vmem:[%s2376_s28 + $0x20] sm:$0xff] (!%p1942_p9)  ;;  %v1945_v27 = vld [vmem:[%s2376_s28 + $0x28] sm:$0xff] (!%p1942_p9) }
 0x9e3   : > { %v1558_v28 = vmul.f32 (!%p1942_p9), 0.2989, %v1943_v25  ;;  %v1559_v30 = vmul.f32 (!%p1942_p9), 0.587, %v1944_v26  ;;  %v1561_v31 = vmul.f32 (!%p1942_p9), 0.114, %v1945_v27  ;;  %v1574_v42 = vmul.f32 (!%p1942_p9), %v1943_v25, %v1573_v41 }
 0x9e4   : > { %v1575_v43 = vmul.f32 (!%p1942_p9), %v1944_v26, %v1573_v41  ;;  %v1576_v39 = vmul.f32 (!%p1942_p9), %v1945_v27, %v1573_v41 }
 0x9e5   : > { %v1560_v32 = vadd.f32 %v1559_v30, %v1558_v28 }
 0x9e7   : > { %v1562_v33 = vadd.f32 %v1561_v31, %v1560_v32 }
 0x9e9   : > { %1563 = vadd.xlane.f32.xlu0 %v1562_v33 }
 0xa76   : > { %v1564_v29 = vpop.xlane.xlu0 %1563 }
 0xa77   : > { %v1565_v34 = vrot.slane %v1564_v29, 4 }
 0xa79   : > { %v1566_v35 = vadd.f32 %v1565_v34, %v1564_v29 }
 0xa7b   : > { %v1567_v36 = vrot.slane %v1566_v35, 2 }
 0xa7d   : > { %v1568_v37 = vadd.f32 %v1567_v36, %v1566_v35 }
 0xa7f   : > { %v1569_v38 = vrot.slane %v1568_v37, 1 }
 0xa81   : > { %v1570_v40 = vadd.f32 %v1569_v38, %v1568_v37 }
 0xa83   : > { %1988 = vpush %v1570_v40 }
 0xab4   : > { %s1989_s24 = spop %1988 }
 0xab5   : > { %s1572_s23 = smul.f32 0.00390625, %s1989_s24 }
 0xab7   : > { %s1578_s5 = smul.f32 %s1577_s11, %s1572_s23 }
 0xab9   : > { %v1579_v44 = vstv %s1578_s5 }
 0xaba   : > { %v1580_v45 = vadd.f32 %v1579_v44, %v1574_v42  ;;  %v1581_v46 = vadd.f32 %v1579_v44, %v1575_v43  ;;  %v1582_v47 = vadd.f32 %v1579_v44, %v1576_v39 }
 0xabc   : > { %v1583_v48 = vmax.f32 %v1580_v45, 0.0  ;;  %v1584_v49 = vmax.f32 %v1581_v46, 0.0  ;;  %v1585_v50 = vmax.f32 %v1582_v47, 0.0 }
 0xabe   : > { %v1586_v51 = vmin.f32 %v1583_v48, 1.0  ;;  %v1587_v53 = vmin.f32 %v1584_v49, 1.0  ;;  %v1588_v54 = vmin.f32 %v1585_v50, 1.0 }
 0xac0   : > { %1946 = vst [vmem:[%s2376_s28 + $0x18] sm:$0xff] %v1586_v51  ;;  %1947 = vst [vmem:[%s2376_s28 + $0x20] sm:$0xff] %v1587_v53 }
 0xac1   : > { %1948 = vst [vmem:[%s2376_s28 + $0x28] sm:$0xff] %v1588_v54 }
 0xac2 PF: > { %p1949_p13 = scmp.ne.s32.totalorder %s2886_s29, 2 }
 0xac3   : > { %s1609_s20 = ssub.f32 (!%p1949_p13), 1.0, %s2683_s21  ;;  %v1605_v60 = vstv (!%p1949_p13), %s2683_s21 }
 0xac4   : > { %1595 = sbr.rel (%p1949_p13) target bundleno = 2776 (0xad8), region = 168 }
 0xac5   : > { %v1610_v63 = vstv (!%p1949_p13), %s1609_s20 }
 0xac7   : > { %v1950_v55 = vld [vmem:[%s2376_s28 + $0x18] sm:$0xff] (!%p1949_p13)  ;;  %v1951_v56 = vld [vmem:[%s2376_s28 + $0x20] sm:$0xff] (!%p1949_p13) }
 0xac8   : > { %v1952_v52 = vld [vmem:[%s2376_s28 + $0x28] sm:$0xff] (!%p1949_p13)  ;;  %v1600_v57 = vmul.f32 (!%p1949_p13), 0.2989, %v1950_v55  ;;  %v1601_v58 = vmul.f32 (!%p1949_p13), 0.587, %v1951_v56  ;;  %v1606_v1 = vmul.f32 (!%p1949_p13), %v1950_v55, %v1605_v60  ;;  %v1607_v2 = vmul.f32 (!%p1949_p13), %v1951_v56, %v1605_v60 }
 0xac9   : > { %v1603_v59 = vmul.f32 (!%p1949_p13), 0.114, %v1952_v52  ;;  %v1608_v62 = vmul.f32 (!%p1949_p13), %v1952_v52, %v1605_v60 }
 0xaca   : > { %v1602_v61 = vadd.f32 (!%p1949_p13), %v1601_v58, %v1600_v57 }
 0xacc   : > { %v1604_v0 = vadd.f32 %v1603_v59, %v1602_v61 }
 0xace   : > { %v1611_v3 = vmul.f32 %v1610_v63, %v1604_v0 }
 0xad0   : > { %v1612_v4 = vadd.f32 %v1611_v3, %v1606_v1  ;;  %v1613_v5 = vadd.f32 %v1611_v3, %v1607_v2  ;;  %v1614_v6 = vadd.f32 %v1611_v3, %v1608_v62 }
 0xad2   : > { %v1615_v7 = vmax.f32 %v1612_v4, 0.0  ;;  %v1616_v10 = vmax.f32 %v1613_v5, 0.0  ;;  %v1617_v11 = vmax.f32 %v1614_v6, 0.0 }
 0xad4   : > { %v1618_v12 = vmin.f32 %v1615_v7, 1.0  ;;  %v1619_v13 = vmin.f32 %v1616_v10, 1.0  ;;  %v1620_v8 = vmin.f32 %v1617_v11, 1.0 }
 0xad6   : > { %1953 = vst [vmem:[%s2376_s28 + $0x18] sm:$0xff] %v1618_v12  ;;  %1954 = vst [vmem:[%s2376_s28 + $0x20] sm:$0xff] %v1619_v13 }
 0xad7   : > { %1955 = vst [vmem:[%s2376_s28 + $0x28] sm:$0xff] %v1620_v8 }
 0xad8 PF: > { %p1956_p1 = scmp.ne.s32.totalorder %s2886_s29, 3 }
 0xad9   : > { %v1673_v46 = vstv (!%p1956_p1), %s2688_s26 }
 0xada   : > { %1627 = sbr.rel (%p1956_p1) target bundleno = 2851 (0xb23), region = 172 }
 0xadd   : > { %v1957_v9 = vld [vmem:[%s2376_s28 + $0x18] sm:$0xff] (!%p1956_p1)  ;;  %v1958_v14 = vld [vmem:[%s2376_s28 + $0x20] sm:$0xff] (!%p1956_p1) }
 0xade   : > { %v1959_v15 = vld [vmem:[%s2376_s28 + $0x28] sm:$0xff] (!%p1956_p1)  ;;  %v1632_v16 = vmax.f32 (!%p1956_p1), %v1957_v9, %v1958_v14  ;;  %v1634_v17 = vmin.f32 (!%p1956_p1), %v1957_v9, %v1958_v14 }
 0xae0   : > { %v2918_v18 = vmax.f32 (!%p1956_p1), %v1632_v16, %v1959_v15  ;;  %v1635_v20 = vmin.f32 (!%p1956_p1), %v1634_v17, %v1959_v15 }
 0xae2   : > { %vm1636_vm4 = vcmp.eq.f32.partialorder %v2918_v18, %v1635_v20  ;;  %v1637_v21 = vsub.f32 %v2918_v18, %v1635_v20  ;;  %v1649_v26 = vsub.f32 %v2918_v18, %v1957_v9  ;;  %v1651_v27 = vsub.f32 %v2918_v18, %v1958_v14 }
 0xae3   : > { %v1638_v24 = vsel %vm1636_vm4, 1.0, %v2918_v18  ;;  %v1653_v28 = vsub.f32 %v2918_v18, %v1959_v15  ;;  %vm1658_vm5 = vcmp.eq.f32.partialorder %v2918_v18, %v1958_v14  ;;  %vm1659_vm6 = vcmp.ne.f32.partialorder %v2918_v18, %v1957_v9 }
 0xae4   : > { %v1644_v22 = vsel %vm1636_vm4, 1.0, %v1637_v21  ;;  %vm1664_vm7 = vcmp.ne.f32.partialorder %v2918_v18, %v1958_v14  ;;  %vm1655_vm8 = vcmp.eq.f32.partialorder %v2918_v18, %v1957_v9  ;;  %vm1660_vm9 = vmand %vm1658_vm5, %vm1659_vm6 }
 0xae5   : > { %2072 = vrcp.f32 %v1644_v22  ;;  %vm1665_vm10 = vmand %vm1664_vm7, %vm1659_vm6 }
 0xae6   : > { %2074 = vrcp.f32 %v1638_v24 }
 0xaef   : > { %v2073_v23 = vpop.eup %2072 }
 0xaf0   : > { %v1646_v19 = vmul.f32 %v2073_v23, %v1644_v22  ;;  %v2075_v43 = vpop.eup %2074 }
 0xaf1   : > { %v1640_v44 = vmul.f32 %v2075_v43, %v1638_v24 }
 0xaf2   : > { %v1647_v25 = vsub.f32 2.0, %v1646_v19 }
 0xaf3   : > { %v1641_v48 = vsub.f32 2.0, %v1640_v44 }
 0xaf4   : > { %v1648_v30 = vmul.f32 %v2073_v23, %v1647_v25 }
 0xaf5   : > { %v1642_v51 = vmul.f32 %v2075_v43, %v1641_v48 }
 0xaf6   : > { %v1650_v31 = vmul.f32 %v1649_v26, %v1648_v30  ;;  %v1652_v32 = vmul.f32 %v1651_v27, %v1648_v30  ;;  %v1654_v33 = vmul.f32 %v1653_v28, %v1648_v30 }
 0xaf7   : > { %v1643_v55 = vmul.f32 %v1642_v51, %v1637_v21 }
 0xaf8   : > { %v1656_v29 = vsub.f32 %v1654_v33, %v1652_v32  ;;  %v1661_v34 = vadd.f32 2.0, %v1650_v31  ;;  %v1666_v35 = vadd.f32 4.0, %v1652_v32 }
 0xaf9   : > { %v1680_v57 = vsub.f32 1.0, %v1643_v55 }
 0xafa   : > { %v1657_v36 = vsel %vm1655_vm8, %v1656_v29, 0.0  ;;  %v1662_v37 = vsub.f32 %v1661_v34, %v1654_v33  ;;  %v1667_v38 = vsub.f32 %v1666_v35, %v1650_v31 }
 0xafb   : > { %v1681_v60 = vmul.f32 %v1680_v57, %v2918_v18 }
 0xafc   : > { %v1663_v40 = vsel %vm1660_vm9, %v1662_v37, 0.0  ;;  %v1668_v41 = vsel %vm1665_vm10, %v1667_v38, 0.0 }
 0xafd   : > { %v1669_v42 = vadd.f32 %v1663_v40, %v1657_v36 }
 0xaff   : > { %v1670_v39 = vadd.f32 %v1669_v42, %v1668_v41 }
 0xb01   : > { %v1671_v45 = vmul.f32 0.16666667, %v1670_v39 }
 0xb03   : > { %v1672_v47 = vadd.f32 1.0, %v1671_v45 }
 0xb05   : > { %v1674_v49 = vadd.f32 %v1673_v46, %v1672_v47 }
 0xb07   : > { %v1675_v50 = vfloor.f32 %v1674_v49 }
 0xb09   : > { %v1676_v53 = vsub.f32 %v1674_v49, %v1675_v50 }
 0xb0b   : > { %v1677_v54 = vmul.f32 6.0, %v1676_v53 }
 0xb0d   : > { %v1678_v56 = vfloor.f32 %v1677_v54 }
 0xb0f   : > { %v1679_v52 = vsub.f32 %v1677_v54, %v1678_v56  ;;  %vm1692_vm11 = vcmp.eq.f32.partialorder %v1678_v56, 3.0  ;;  %vm1693_vm12 = vcmp.eq.f32.partialorder %v1678_v56, 4.0  ;;  %vm1691_vm13 = vcmp.eq.f32.partialorder %v1678_v56, 2.0 }
 0xb10   : > { %vm1690_vm14 = vcmp.eq.f32.partialorder %v1678_v56, 1.0  ;;  %vm1689_vm15 = vcmp.eq.f32.partialorder %v1678_v56, 0.0 }
 0xb11   : > { %v1682_v58 = vmul.f32 %v1679_v52, %v1643_v55  ;;  %v1685_v59 = vsub.f32 1.0, %v1679_v52 }
 0xb13   : > { %v1683_v61 = vsub.f32 1.0, %v1682_v58  ;;  %v1686_v63 = vmul.f32 %v1685_v59, %v1643_v55 }
 0xb15   : > { %v1684_v0 = vmul.f32 %v1683_v61, %v2918_v18  ;;  %v1687_v1 = vsub.f32 1.0, %v1686_v63 }
 0xb17   : > { %v1688_v2 = vmul.f32 %v1687_v1, %v2918_v18  ;;  %v1701_v62 = vsel %vm1692_vm11, %v1684_v0, %v1681_v60  ;;  %v1707_v3 = vsel %vm1693_vm12, %v2918_v18, %v1684_v0 }
 0xb18   : > { %v1702_v4 = vsel %vm1691_vm13, %v2918_v18, %v1701_v62  ;;  %v1708_v5 = vsel %vm1692_vm11, %v2918_v18, %v1707_v3 }
 0xb19   : > { %v1694_v6 = vsel %vm1693_vm12, %v1688_v2, %v2918_v18  ;;  %v1703_v7 = vsel %vm1690_vm14, %v2918_v18, %v1702_v4  ;;  %v1709_v10 = vsel %vm1691_vm13, %v1688_v2, %v1708_v5 }
 0xb1a   : > { %v1695_v11 = vsel %vm1692_vm11, %v1681_v60, %v1694_v6  ;;  %v1704_v12 = vsel %vm1689_vm15, %v1688_v2, %v1703_v7  ;;  %v1710_v13 = vsel %vm1690_vm14, %v1681_v60, %v1709_v10 }
 0xb1b   : > { %v1696_v8 = vsel %vm1691_vm13, %v1681_v60, %v1695_v11  ;;  %v1705_v9 = vmax.f32 %v1704_v12, 0.0  ;;  %v1711_v14 = vsel %vm1689_vm15, %v1681_v60, %v1710_v13 }
 0xb1c   : > { %v1697_v15 = vsel %vm1690_vm14, %v1684_v0, %v1696_v8  ;;  %v1712_v16 = vmax.f32 %v1711_v14, 0.0 }
 0xb1d   : > { %v1698_v17 = vsel %vm1689_vm15, %v2918_v18, %v1697_v15  ;;  %v1706_v20 = vmin.f32 %v1705_v9, 1.0 }
 0xb1e   : > { %v1699_v21 = vmax.f32 %v1698_v17, 0.0  ;;  %v1713_v22 = vmin.f32 %v1712_v16, 1.0 }
 0xb1f   : > { %1961 = vst [vmem:[%s2376_s28 + $0x20] sm:$0xff] %v1706_v20 }
 0xb20   : > { %v1700_v23 = vmin.f32 %v1699_v21, 1.0  ;;  %1962 = vst [vmem:[%s2376_s28 + $0x28] sm:$0xff] %v1713_v22 }
 0xb22   : > { %1960 = vst [vmem:[%s2376_s28 + $0x18] sm:$0xff] %v1700_v23 }
 0xb23 PF: > { %s1990_s21 = smul.u32 768, %s2283_s10  ;;  %s1734_s26 = sshll.u32 %s2376_s28, 4  ;;  %s2956_s26 = int_to_ptr.vmem [resolvable:$true] %s1734_s26 }
 0xb24   : > { %s1720_s25 = scalar_lea.sflag [#allocation8], %s2360_s22  ;;  %s2140_s30 = scalar_lea.vmem %s2956_s26, 768 }
 0xb25   : > { %s2954_s27 = scalar_lea.hbm %s3002_s4, %s1990_s21  ;;  %p2141_p3 = scmp.ne.s32.totalorder %s2956_s26, %s2140_s30 }
 0xb26   : > { %p3010_p4 = scmp.ne.s32.totalorder %s3007_s17, 0  ;;  %s2216_s6 = smov [#allocation9]  }
 0xb27   : > { %s2144_s16 = sshll.u32 %s2216_s6, 4  ;;  %s2145_s16 = int_to_ptr.vmem [resolvable:$false] %s2144_s16 }
 0xb28   : > { %p2142_p6 = pnand %p2141_p3, %p3010_p4  ;;  %s2146_s10 = scalar_lea.vmem %s2145_s16, 1536 }
 0xb29   : > { %p2147_p0 = scmp.lt.s32.totalorder %s2956_s26, %s2145_s16  ;;  %p2148_p2 = scmp.lt.s32.totalorder %s2146_s10, %s2140_s30 }
 0xb2a   : > { %p2143_p8 = pneg %p2142_p6 }
 0xb2b   : > { %p2149_p10 = por %p2148_p2, %p2147_p0 }
 0xb2d   : > { %p2150_p5 = pnand %p2149_p10, %p2143_p8 }
 0xb2f   : > { %2153 = shalt.err (!%p2150_p5)
}
 0xb30   : > { %s2154_s28 = scalar_lea.hbm %s2954_s27, 768  ;;  %s2158_s14 = scalar_lea.hbm %s3002_s4, 1536 }
 0xb31   : > { %p2155_p11 = scmp.ne.s32.totalorder %s2954_s27, %s2154_s28  ;;  %p2159_p9 = scmp.lt.u32.totalorder %s2954_s27, %s3002_s4 }
 0xb32   : > { %p2160_p13 = scmp.lt.u32.totalorder %s2158_s14, %s2154_s28  ;;  %p2162_p3 = scmp.lt.u32.totalorder %s2154_s28, %s2954_s27 }
 0xb33   : > { %p2156_p12 = pnand %p2155_p11, %p3010_p4 }
 0xb34   : > { %p2161_p1 = por %p2160_p13, %p2159_p9 }
 0xb35   : > { %p2157_p7 = pneg %p2156_p12 }
 0xb36   : > { %p2163_p6 = por %p2162_p3, %p2161_p1 }
 0xb38   : > { %p2164_p8 = pnand %p2163_p6, %p2157_p7 }
 0xb3a   : > { %2167 = shalt.err (!%p2164_p8)
}
 0xb3b   : > { %s2217_s24 = smov 128   ;;  %s2218_s23 = smov 8  }
 0xb3c   : > { %1993 = dma.vmem_to_hbm [thread:$0]  (%p3010_p4), %s2956_s26, 768, %s2954_s27, %s1720_s25, %s2217_s24, %s2217_s24, %s2218_s23  }
 0xb3d PF: > { %s1749_s5 = sand.u32 1, %s2196_s2   ;;  %p3011_p0 = scmp.ne.s32.totalorder %s3008_s18, 0 }
 0xb3e   : > { %p3012_p2 = scmp.ge.s32.totalorder %s2208_s9, 2  ;;  %s1750_s20 = scalar_lea.sflag [#allocation8], %s1749_s5 }
 0xb40   : > { %p2000_p10 = pnand %p3012_p2, %p3011_p0 }
 0xb42   : > { %2191 = dma.done.wait (!%p2000_p10), %s1750_s20, 768  }
 0xb43   : > { %2193 = vsyncadd (!%p2000_p10), %s1750_s20, 4294966528  ;;  %p29_p5 = scmp.ge.s32.totalorder %s2287_s12, 4   ;;  %s3013_s2 = smov %s2200_s7 }
 0xb44   : > { %s3014_s7 = smov %s2204_s8  ;;  %s3015_s8 = smov %s2299_s15 }
 0xb45   : > { %s3016_s9 = smov %s2287_s12  ;;  %31 = sbr.rel (!%p29_p5) target bundleno = 38 (0x26), region = 251 }
 0xb4c   :  { %1755 = vsyncpa [#allocation7], 1 }
 0xb4d   :  { %1757 = vsyncpa [#allocation7 + $0x1], 1 }
 0xb4e   :  { %1758 = vsyncpa [#allocation8], 1 }
 0xb4f   :  { %1760 = vsyncpa [#allocation8 + $0x1], 1 }

</bundles_post_ra>
